<compile_context>
chip_gen: v5e
topology: v5e:2x2
jax: 0.10.0
libtpu: 0.0.40
codegen_flags: <defaults>
</compile_context>

<pallas_src>
import math
import functools
import numpy as np

import jax
import jax.numpy as jnp
from jax.experimental import pallas as pl
from jax.experimental.pallas import tpu as pltpu

# -------------------- hyperparameters (small, consistent with the module) ----
VOCAB = 64            # len(symbols)
E = 32                # hp.embedding_size
H = 32                # hp.hidden_size (num_hidden)
HEADS = 4             # Attention h
D = H // HEADS        # per-head dim
K = 5                 # prenet conv kernel size
PAD = K // 2          # 'same' padding
NLAYERS = 3
BN_SCALE = 1.0 / math.sqrt(1.0 + 1e-5)   # eval-mode BatchNorm1d with default stats
LN_EPS = 1e-5

assert E == H, "kernel assumes embedding_size == hidden_size (true for this module config)"


# ============================== fused encoder kernel =========================

def _encoder_kernel(
    xemb_ref, pos_ref, alpha_ref,
    convw_ref, convb_ref, projw_ref, projb_ref,
    qkvw_ref, finwx_ref, finwr_ref, finb_ref, ln1g_ref, ln1b_ref,
    w1_ref, b1_ref, w2_ref, b2_ref, ln2g_ref, ln2b_ref,
    xout_ref, attn_ref,
    xpad_buf,
    *, B, T,
):
    """Whole Encoder forward, everything resident in VMEM (single invocation, no grid)."""
    N = B * T

    def layer_norm(v, g, b):
        mu = jnp.mean(v, axis=-1, keepdims=True)
        var = jnp.mean(jnp.square(v - mu), axis=-1, keepdims=True)
        return (v - mu) * jax.lax.rsqrt(var + LN_EPS) * g + b

    # ---------------- EncoderPrenet: 3x (conv k=5 'same' -> eval-BN -> relu) -----------------
    # K accumulated depth-32 matmuls per conv (BN scale pre-folded into weights & biases);
    # no im2col scratch, no masked lane-offset stores.
    xpad_buf[...] = jnp.zeros_like(xpad_buf)               # padding rows stay zero
    xpad_buf[:, PAD:PAD + T, :] = xemb_ref[...]            # center <- embedded input (B,T,E)
    y = None
    for c in range(3):
        xp = xpad_buf[...]                                 # (B, T+2*PAD, H)
        acc = jnp.dot(xp[:, 0:T, :].reshape(N, H), convw_ref[c * K + 0],
                      preferred_element_type=jnp.float32)
        for k in range(1, K):
            acc = acc + jnp.dot(xp[:, k:k + T, :].reshape(N, H), convw_ref[c * K + k],
                                preferred_element_type=jnp.float32)
        y = jnp.maximum(acc + convb_ref[c], 0.0)           # (conv+BN folded) -> relu
        if c < 2:
            xpad_buf[:, PAD:PAD + T, :] = y.reshape(B, T, H)   # re-pad for next conv

    # projection + alpha-scaled positional encoding (alpha read from SMEM, scalar path)
    x = jnp.dot(y, projw_ref[...], preferred_element_type=jnp.float32) + projb_ref[...]
    x = pos_ref[...].reshape(N, H) * alpha_ref[0, 0] + x   # (N, H)

    # ---------------- 3 x (multi-head self-attention block + FFN block) ----------------------
    for l in range(NLAYERS):
        # final_linear split: y = x @ W_x + sum_h r_h @ W_r[h] + b    (no concat buffer)
        y_acc = jnp.dot(x, finwx_ref[l], preferred_element_type=jnp.float32) + finb_ref[l]

        for hh in range(HEADS):
            base = (l * HEADS + hh) * 3
            # per-head Q/K/V straight from per-head weight blocks; 1/sqrt(D) folded into Q.
            q_h = jnp.dot(x, qkvw_ref[base + 0],
                          preferred_element_type=jnp.float32).reshape(B, T, D)
            k_h = jnp.dot(x, qkvw_ref[base + 1],
                          preferred_element_type=jnp.float32).reshape(B, T, D)
            v_h = jnp.dot(x, qkvw_ref[base + 2],
                          preferred_element_type=jnp.float32).reshape(B, T, D)

            s = jnp.einsum('bqd,bkd->bqk', q_h, k_h,
                           preferred_element_type=jnp.float32)         # (B, T, T)
            s = s - jnp.max(s, axis=-1, keepdims=True)
            e = jnp.exp(s)
            p = e / jnp.sum(e, axis=-1, keepdims=True)                 # exact softmax
            attn_ref[l * HEADS + hh] = p                               # head-major probs out
            r = jnp.einsum('bqk,bkd->bqd', p, v_h,
                           preferred_element_type=jnp.float32)         # (B, T, D)
            y_acc = y_acc + jnp.dot(r.reshape(N, D), finwr_ref[l * HEADS + hh],
                                    preferred_element_type=jnp.float32)

        x = layer_norm(y_acc + x, ln1g_ref[l], ln1b_ref[l])            # residual + LN

        # FFN: 1x1 convs == linears, relu, residual, LN
        u = jnp.maximum(
            jnp.dot(x, w1_ref[l], preferred_element_type=jnp.float32) + b1_ref[l], 0.0)
        z = jnp.dot(u, w2_ref[l], preferred_element_type=jnp.float32) + b2_ref[l]
        x = layer_norm(z + x, ln2g_ref[l], ln2b_ref[l])

    xout_ref[...] = x.reshape(B, T, H)


def encoder_forward(params, characters, pos_text):
    """Eval-mode Encoder.forward(x=characters, pos=pos_text) -> (x, None, attns[3])."""
    B, T = characters.shape
    # glue: embedding + positional table gathers (tiny, data-dependent)
    x_emb = params["embed"][characters]            # (B, T, E)
    pos_enc = params["pos_table"][pos_text]        # (B, T, H)

    vm = pl.BlockSpec(memory_space=pltpu.MemorySpace.VMEM)
    sm = pl.BlockSpec(memory_space=pltpu.MemorySpace.SMEM)
    kern = functools.partial(_encoder_kernel, B=B, T=T)
    x_out, attn_flat = pl.pallas_call(
        kern,
        out_shape=(
            jax.ShapeDtypeStruct((B, T, H), jnp.float32),
            jax.ShapeDtypeStruct((NLAYERS * HEADS, B, T, T), jnp.float32),
        ),
        in_specs=[vm, vm, sm] + [vm] * 16,
        out_specs=(vm, vm),
        scratch_shapes=[
            pltpu.VMEM((B, T + 2 * PAD, H), jnp.float32),   # zero-padded conv activations
        ],
    )(
        x_emb, pos_enc, params["alpha"],
        params["conv_w"], params["conv_b"], params["proj_w"], params["proj_b"],
        params["qkv_w"], params["finw_x"], params["finw_r"], params["fin_b"],
        params["ln1_g"], params["ln1_b"],
        params["ffn_w1"], params["ffn_b1"], params["ffn_w2"], params["ffn_b2"],
        params["ln2_g"], params["ln2_b"],
    )
    # (NLAYERS*HEADS, B, T, T) -> per-layer (HEADS*B, T, T), head-major = torch ordering
    attns_all = attn_flat.reshape(NLAYERS, HEADS * B, T, T)
    return x_out, None, [attns_all[i] for i in range(NLAYERS)]


# ============================== parameter init ===============================

def sinusoid_table(n_position, d_hid, padding_idx=None):
    pos = np.arange(n_position)[:, None].astype(np.float64)
    hid = np.arange(d_hid)[None, :]
    angle = pos / np.power(10000, 2 * (hid // 2) / d_hid)
    table = np.zeros((n_position, d_hid), np.float64)
    table[:, 0::2] = np.sin(angle[:, 0::2])
    table[:, 1::2] = np.cos(angle[:, 1::2])
    if padding_idx is not None:
        table[padding_idx] = 0.0
    return jnp.asarray(table, jnp.float32)


def xavier(key, shape, gain=1.0):
    fan_in, fan_out = shape
    a = gain * math.sqrt(6.0 / (fan_in + fan_out))
    return jax.random.uniform(key, shape, jnp.float32, -a, a)


def ubias(key, fan_in, shape):
    a = 1.0 / math.sqrt(fan_in)
    return jax.random.uniform(key, shape, jnp.float32, -a, a)


def init_params(key):
    keys = iter(jax.random.split(key, 160))
    nk = lambda: next(keys)
    g_relu = math.sqrt(2.0)

    embed = jax.random.normal(nk(), (VOCAB, E), jnp.float32).at[0].set(0.0)  # padding_idx=0
    pos_table = sinusoid_table(1024, H, padding_idx=0)

    # prenet conv weights as per-tap (H, H) blocks, eval-BN scale folded in host-side.
    # NOTE: folding BN as a single scalar is only valid for eval-mode BatchNorm1d with default
    # running stats; with a trained checkpoint this becomes a per-channel scale+shift fold.
    conv_w, conv_b = [], []
    for c in range(3):
        cin = E if c == 0 else H
        a = g_relu * math.sqrt(6.0 / (cin * K + H * K))
        w = jax.random.uniform(nk(), (H, cin, K), jnp.float32, -a, a)   # torch (cout, cin, k)
        conv_w.append(jnp.transpose(w, (2, 1, 0)) * BN_SCALE)           # (K, cin, cout)
        conv_b.append(ubias(nk(), cin * K, (1, H)) * BN_SCALE)
    conv_w = jnp.concatenate(conv_w, axis=0)                            # (3*K, H, H)
    conv_b = jnp.stack(conv_b, axis=0)                                  # (3, 1, H)

    # NOTE: the reference uses clones() (identical init across layers); here each layer gets its
    # own deterministic init (synthetic weights, not a checkpoint) — forward math is identical.
    qkv_list = []                      # (NLAYERS*HEADS*3, H, D): per (layer, head, {q,k,v})
    finwx, finwr, finb = [], [], []    # final_linear split into x-part and per-head r-parts
    ln1_g, ln1_b = [], []
    w1, b1, w2, b2, ln2_g, ln2_b = [], [], [], [], [], []
    for _ in range(NLAYERS):
        qw = xavier(nk(), (H, H)) * (1.0 / math.sqrt(D))   # 1/sqrt(d_k) folded into Q weights
        kw = xavier(nk(), (H, H))
        vw = xavier(nk(), (H, H))
        for hh in range(HEADS):
            sl = slice(hh * D, (hh + 1) * D)
            qkv_list += [qw[:, sl], kw[:, sl], vw[:, sl]]
        fw = xavier(nk(), (2 * H, H))
        finwx.append(fw[:H])                                             # (H, H)
        for hh in range(HEADS):
            finwr.append(fw[H + hh * D:H + (hh + 1) * D])                # (D, H)
        finb.append(ubias(nk(), 2 * H, (1, H)))
        ln1_g.append(jnp.ones((1, H), jnp.float32))
        ln1_b.append(jnp.zeros((1, H), jnp.float32))
        w1.append(xavier(nk(), (H, 4 * H), gain=g_relu))
        b1.append(ubias(nk(), H, (1, 4 * H)))
        w2.append(xavier(nk(), (4 * H, H)))
        b2.append(ubias(nk(), 4 * H, (1, H)))
        ln2_g.append(jnp.ones((1, H), jnp.float32))
        ln2_b.append(jnp.zeros((1, H), jnp.float32))

    return dict(
        embed=embed,
        pos_table=pos_table,
        alpha=jnp.ones((1, 1), jnp.float32),
        conv_w=conv_w, conv_b=conv_b,
        proj_w=xavier(nk(), (H, H)), proj_b=ubias(nk(), H, (1, H)),
        qkv_w=jnp.stack(qkv_list),                 # (NLAYERS*HEADS*3, H, D)
        finw_x=jnp.stack(finwx),                   # (NLAYERS, H, H)
        finw_r=jnp.stack(finwr),                   # (NLAYERS*HEADS, D, H)
        fin_b=jnp.stack(finb),                     # (NLAYERS, 1, H)
        ln1_g=jnp.stack(ln1_g), ln1_b=jnp.stack(ln1_b),
        ffn_w1=jnp.stack(w1), ffn_b1=jnp.stack(b1),
        ffn_w2=jnp.stack(w2), ffn_b2=jnp.stack(b2),
        ln2_g=jnp.stack(ln2_g), ln2_b=jnp.stack(ln2_b),
    )


# ============================== main =========================================

if __name__ == "__main__":
    params = init_params(jax.random.PRNGKey(0))

    B, T = 2, 8
    key = jax.random.PRNGKey(0)
    characters = jax.random.randint(key, (B, T), 1, VOCAB)             # token ids (0 = pad)
    pos_text = jnp.tile(jnp.arange(1, T + 1)[None, :], (B, 1))         # positions 1..T

    fwd = jax.jit(encoder_forward)
    x_out, c_mask, attns = fwd(params, characters, pos_text)
    jax.block_until_ready((x_out, attns))

    assert x_out.shape == (B, T, H)
    assert c_mask is None
    assert len(attns) == NLAYERS
    assert all(a.shape == (HEADS * B, T, T) for a in attns)
    assert bool(jnp.all(jnp.isfinite(x_out)))
    # attention rows are exactly-normalized probabilities (exact softmax in-kernel)
    for a in attns:
        assert bool(jnp.all(jnp.abs(jnp.sum(a, axis=-1) - 1.0) < 1e-3))
    print("KERNEL_OK")
</pallas_src>

<mosaic_0001>
module attributes {stable_mosaic.version = 11 : i64} {
  func.func @_encoder_kernel(%arg0: memref<2x8x32xf32, #tpu.memory_space<vmem>>, %arg1: memref<2x8x32xf32, #tpu.memory_space<vmem>>, %arg2: memref<1x1xf32, #tpu.memory_space<smem>>, %arg3: memref<15x32x32xf32, #tpu.memory_space<vmem>>, %arg4: memref<3x1x32xf32, #tpu.memory_space<vmem>>, %arg5: memref<32x32xf32, #tpu.memory_space<vmem>>, %arg6: memref<1x32xf32, #tpu.memory_space<vmem>>, %arg7: memref<36x32x8xf32, #tpu.memory_space<vmem>>, %arg8: memref<3x32x32xf32, #tpu.memory_space<vmem>>, %arg9: memref<12x8x32xf32, #tpu.memory_space<vmem>>, %arg10: memref<3x1x32xf32, #tpu.memory_space<vmem>>, %arg11: memref<3x1x32xf32, #tpu.memory_space<vmem>>, %arg12: memref<3x1x32xf32, #tpu.memory_space<vmem>>, %arg13: memref<3x32x128xf32, #tpu.memory_space<vmem>>, %arg14: memref<3x1x128xf32, #tpu.memory_space<vmem>>, %arg15: memref<3x128x32xf32, #tpu.memory_space<vmem>>, %arg16: memref<3x1x32xf32, #tpu.memory_space<vmem>>, %arg17: memref<3x1x32xf32, #tpu.memory_space<vmem>>, %arg18: memref<3x1x32xf32, #tpu.memory_space<vmem>>, %arg19: memref<2x8x32xf32, #tpu.memory_space<vmem>>, %arg20: memref<12x2x8x8xf32, #tpu.memory_space<vmem>>, %arg21: memref<2x12x32xf32, #tpu.memory_space<vmem>>) attributes {dimension_semantics = [], scalar_prefetch = 0 : i64, scratch_operands = 1 : i64, tpu.core_type = #tpu.core_type<tc>} {
    %cst = arith.constant 0.000000e+00 : f32
    %0 = vector.broadcast %cst : f32 to vector<2x12x32xf32>
    %c0 = arith.constant 0 : index
    %c0_0 = arith.constant 0 : index
    %c0_1 = arith.constant 0 : index
    %1 = vector.load %arg21[%c0, %c0_0, %c0_1] : memref<2x12x32xf32, #tpu.memory_space<vmem>>, vector<2x12x32xf32>
    tpu.vector_store %arg21[%c0, %c0_0, %c0_1], %0 {strides = array<i32>} : memref<2x12x32xf32, #tpu.memory_space<vmem>>, vector<2x12x32xf32>,
    %c0_2 = arith.constant 0 : index
    %c0_3 = arith.constant 0 : index
    %c0_4 = arith.constant 0 : index
    %2 = vector.load %arg0[%c0_2, %c0_3, %c0_4] : memref<2x8x32xf32, #tpu.memory_space<vmem>>, vector<2x8x32xf32>
    %c0_5 = arith.constant 0 : index
    %c2 = arith.constant 2 : index
    %c0_6 = arith.constant 0 : index
    %3 = vector.load %arg21[%c0_5, %c2, %c0_6] : memref<2x12x32xf32, #tpu.memory_space<vmem>>, vector<2x8x32xf32>
    tpu.vector_store %arg21[%c0_5, %c2, %c0_6], %2 {strides = array<i32>} : memref<2x12x32xf32, #tpu.memory_space<vmem>>, vector<2x8x32xf32>,
    %c0_7 = arith.constant 0 : index
    %c0_8 = arith.constant 0 : index
    %c0_9 = arith.constant 0 : index
    %4 = vector.load %arg21[%c0_7, %c0_8, %c0_9] : memref<2x12x32xf32, #tpu.memory_space<vmem>>, vector<2x12x32xf32>
    %5 = vector.extract_strided_slice %4 {offsets = [0, 0, 0], sizes = [2, 8, 32], strides = [1, 1, 1]} : vector<2x12x32xf32> to vector<2x8x32xf32>
    %6 = vector.shape_cast %5 : vector<2x8x32xf32> to vector<16x32xf32>
    %c0_10 = arith.constant 0 : index
    %c0_11 = arith.constant 0 : index
    %c0_12 = arith.constant 0 : index
    %7 = vector.load %arg3[%c0_10, %c0_11, %c0_12] : memref<15x32x32xf32, #tpu.memory_space<vmem>>, vector<1x32x32xf32>
    %8 = vector.shape_cast %7 : vector<1x32x32xf32> to vector<32x32xf32>
    %cst_13 = arith.constant dense<0.000000e+00> : vector<16x32xf32>
    %9 = tpu.matmul %6, %8, %cst_13 {dimension_numbers = #tpu.dot_dimension_numbers<[1], [0], [0], [1], [0, 0, 1, 1], [], []>} : vector<16x32xf32>, vector<32x32xf32>, vector<16x32xf32> -> vector<16x32xf32>
    %10 = vector.extract_strided_slice %4 {offsets = [0, 1, 0], sizes = [2, 8, 32], strides = [1, 1, 1]} : vector<2x12x32xf32> to vector<2x8x32xf32>
    %11 = vector.shape_cast %10 : vector<2x8x32xf32> to vector<16x32xf32>
    %c1 = arith.constant 1 : index
    %c0_14 = arith.constant 0 : index
    %c0_15 = arith.constant 0 : index
    %12 = vector.load %arg3[%c1, %c0_14, %c0_15] : memref<15x32x32xf32, #tpu.memory_space<vmem>>, vector<1x32x32xf32>
    %13 = vector.shape_cast %12 : vector<1x32x32xf32> to vector<32x32xf32>
    %cst_16 = arith.constant dense<0.000000e+00> : vector<16x32xf32>
    %14 = tpu.matmul %11, %13, %cst_16 {dimension_numbers = #tpu.dot_dimension_numbers<[1], [0], [0], [1], [0, 0, 1, 1], [], []>} : vector<16x32xf32>, vector<32x32xf32>, vector<16x32xf32> -> vector<16x32xf32>
    %15 = arith.addf %9, %14 : vector<16x32xf32>
    %16 = vector.extract_strided_slice %4 {offsets = [0, 2, 0], sizes = [2, 8, 32], strides = [1, 1, 1]} : vector<2x12x32xf32> to vector<2x8x32xf32>
    %17 = vector.shape_cast %16 : vector<2x8x32xf32> to vector<16x32xf32>
    %c2_17 = arith.constant 2 : index
    %c0_18 = arith.constant 0 : index
    %c0_19 = arith.constant 0 : index
    %18 = vector.load %arg3[%c2_17, %c0_18, %c0_19] : memref<15x32x32xf32, #tpu.memory_space<vmem>>, vector<1x32x32xf32>
    %19 = vector.shape_cast %18 : vector<1x32x32xf32> to vector<32x32xf32>
    %cst_20 = arith.constant dense<0.000000e+00> : vector<16x32xf32>
    %20 = tpu.matmul %17, %19, %cst_20 {dimension_numbers = #tpu.dot_dimension_numbers<[1], [0], [0], [1], [0, 0, 1, 1], [], []>} : vector<16x32xf32>, vector<32x32xf32>, vector<16x32xf32> -> vector<16x32xf32>
    %21 = arith.addf %15, %20 : vector<16x32xf32>
    %22 = vector.extract_strided_slice %4 {offsets = [0, 3, 0], sizes = [2, 8, 32], strides = [1, 1, 1]} : vector<2x12x32xf32> to vector<2x8x32xf32>
    %23 = vector.shape_cast %22 : vector<2x8x32xf32> to vector<16x32xf32>
    %c3 = arith.constant 3 : index
    %c0_21 = arith.constant 0 : index
    %c0_22 = arith.constant 0 : index
    %24 = vector.load %arg3[%c3, %c0_21, %c0_22] : memref<15x32x32xf32, #tpu.memory_space<vmem>>, vector<1x32x32xf32>
    %25 = vector.shape_cast %24 : vector<1x32x32xf32> to vector<32x32xf32>
    %cst_23 = arith.constant dense<0.000000e+00> : vector<16x32xf32>
    %26 = tpu.matmul %23, %25, %cst_23 {dimension_numbers = #tpu.dot_dimension_numbers<[1], [0], [0], [1], [0, 0, 1, 1], [], []>} : vector<16x32xf32>, vector<32x32xf32>, vector<16x32xf32> -> vector<16x32xf32>
    %27 = arith.addf %21, %26 : vector<16x32xf32>
    %28 = vector.extract_strided_slice %4 {offsets = [0, 4, 0], sizes = [2, 8, 32], strides = [1, 1, 1]} : vector<2x12x32xf32> to vector<2x8x32xf32>
    %29 = vector.shape_cast %28 : vector<2x8x32xf32> to vector<16x32xf32>
    %c4 = arith.constant 4 : index
    %c0_24 = arith.constant 0 : index
    %c0_25 = arith.constant 0 : index
    %30 = vector.load %arg3[%c4, %c0_24, %c0_25] : memref<15x32x32xf32, #tpu.memory_space<vmem>>, vector<1x32x32xf32>
    %31 = vector.shape_cast %30 : vector<1x32x32xf32> to vector<32x32xf32>
    %cst_26 = arith.constant dense<0.000000e+00> : vector<16x32xf32>
    %32 = tpu.matmul %29, %31, %cst_26 {dimension_numbers = #tpu.dot_dimension_numbers<[1], [0], [0], [1], [0, 0, 1, 1], [], []>} : vector<16x32xf32>, vector<32x32xf32>, vector<16x32xf32> -> vector<16x32xf32>
    %33 = arith.addf %27, %32 : vector<16x32xf32>
    %c0_27 = arith.constant 0 : index
    %c0_28 = arith.constant 0 : index
    %c0_29 = arith.constant 0 : index
    %34 = vector.load %arg4[%c0_27, %c0_28, %c0_29] : memref<3x1x32xf32, #tpu.memory_space<vmem>>, vector<1x1x32xf32>
    %35 = vector.shape_cast %34 : vector<1x1x32xf32> to vector<1x32xf32>
    %36 = vector.broadcast %35 : vector<1x32xf32> to vector<16x32xf32>
    %37 = arith.addf %33, %36 : vector<16x32xf32>
    %cst_30 = arith.constant 0.000000e+00 : f32
    %38 = vector.broadcast %cst_30 : f32 to vector<16x32xf32>
    %39 = arith.maximumf %37, %38 : vector<16x32xf32>
    %40 = vector.shape_cast %39 : vector<16x32xf32> to vector<2x8x32xf32>
    %c0_31 = arith.constant 0 : index
    %c2_32 = arith.constant 2 : index
    %c0_33 = arith.constant 0 : index
    %41 = vector.load %arg21[%c0_31, %c2_32, %c0_33] : memref<2x12x32xf32, #tpu.memory_space<vmem>>, vector<2x8x32xf32>
    tpu.vector_store %arg21[%c0_31, %c2_32, %c0_33], %40 {strides = array<i32>} : memref<2x12x32xf32, #tpu.memory_space<vmem>>, vector<2x8x32xf32>,
    %c0_34 = arith.constant 0 : index
    %c0_35 = arith.constant 0 : index
    %c0_36 = arith.constant 0 : index
    %42 = vector.load %arg21[%c0_34, %c0_35, %c0_36] : memref<2x12x32xf32, #tpu.memory_space<vmem>>, vector<2x12x32xf32>
    %43 = vector.extract_strided_slice %42 {offsets = [0, 0, 0], sizes = [2, 8, 32], strides = [1, 1, 1]} : vector<2x12x32xf32> to vector<2x8x32xf32>
    %44 = vector.shape_cast %43 : vector<2x8x32xf32> to vector<16x32xf32>
    %c5 = arith.constant 5 : index
    %c0_37 = arith.constant 0 : index
    %c0_38 = arith.constant 0 : index
    %45 = vector.load %arg3[%c5, %c0_37, %c0_38] : memref<15x32x32xf32, #tpu.memory_space<vmem>>, vector<1x32x32xf32>
    %46 = vector.shape_cast %45 : vector<1x32x32xf32> to vector<32x32xf32>
    %cst_39 = arith.constant dense<0.000000e+00> : vector<16x32xf32>
    %47 = tpu.matmul %44, %46, %cst_39 {dimension_numbers = #tpu.dot_dimension_numbers<[1], [0], [0], [1], [0, 0, 1, 1], [], []>} : vector<16x32xf32>, vector<32x32xf32>, vector<16x32xf32> -> vector<16x32xf32>
    %48 = vector.extract_strided_slice %42 {offsets = [0, 1, 0], sizes = [2, 8, 32], strides = [1, 1, 1]} : vector<2x12x32xf32> to vector<2x8x32xf32>
    %49 = vector.shape_cast %48 : vector<2x8x32xf32> to vector<16x32xf32>
    %c6 = arith.constant 6 : index
    %c0_40 = arith.constant 0 : index
    %c0_41 = arith.constant 0 : index
    %50 = vector.load %arg3[%c6, %c0_40, %c0_41] : memref<15x32x32xf32, #tpu.memory_space<vmem>>, vector<1x32x32xf32>
    %51 = vector.shape_cast %50 : vector<1x32x32xf32> to vector<32x32xf32>
    %cst_42 = arith.constant dense<0.000000e+00> : vector<16x32xf32>
    %52 = tpu.matmul %49, %51, %cst_42 {dimension_numbers = #tpu.dot_dimension_numbers<[1], [0], [0], [1], [0, 0, 1, 1], [], []>} : vector<16x32xf32>, vector<32x32xf32>, vector<16x32xf32> -> vector<16x32xf32>
    %53 = arith.addf %47, %52 : vector<16x32xf32>
    %54 = vector.extract_strided_slice %42 {offsets = [0, 2, 0], sizes = [2, 8, 32], strides = [1, 1, 1]} : vector<2x12x32xf32> to vector<2x8x32xf32>
    %55 = vector.shape_cast %54 : vector<2x8x32xf32> to vector<16x32xf32>
    %c7 = arith.constant 7 : index
    %c0_43 = arith.constant 0 : index
    %c0_44 = arith.constant 0 : index
    %56 = vector.load %arg3[%c7, %c0_43, %c0_44] : memref<15x32x32xf32, #tpu.memory_space<vmem>>, vector<1x32x32xf32>
    %57 = vector.shape_cast %56 : vector<1x32x32xf32> to vector<32x32xf32>
    %cst_45 = arith.constant dense<0.000000e+00> : vector<16x32xf32>
    %58 = tpu.matmul %55, %57, %cst_45 {dimension_numbers = #tpu.dot_dimension_numbers<[1], [0], [0], [1], [0, 0, 1, 1], [], []>} : vector<16x32xf32>, vector<32x32xf32>, vector<16x32xf32> -> vector<16x32xf32>
    %59 = arith.addf %53, %58 : vector<16x32xf32>
    %60 = vector.extract_strided_slice %42 {offsets = [0, 3, 0], sizes = [2, 8, 32], strides = [1, 1, 1]} : vector<2x12x32xf32> to vector<2x8x32xf32>
    %61 = vector.shape_cast %60 : vector<2x8x32xf32> to vector<16x32xf32>
    %c8 = arith.constant 8 : index
    %c0_46 = arith.constant 0 : index
    %c0_47 = arith.constant 0 : index
    %62 = vector.load %arg3[%c8, %c0_46, %c0_47] : memref<15x32x32xf32, #tpu.memory_space<vmem>>, vector<1x32x32xf32>
    %63 = vector.shape_cast %62 : vector<1x32x32xf32> to vector<32x32xf32>
    %cst_48 = arith.constant dense<0.000000e+00> : vector<16x32xf32>
    %64 = tpu.matmul %61, %63, %cst_48 {dimension_numbers = #tpu.dot_dimension_numbers<[1], [0], [0], [1], [0, 0, 1, 1], [], []>} : vector<16x32xf32>, vector<32x32xf32>, vector<16x32xf32> -> vector<16x32xf32>
    %65 = arith.addf %59, %64 : vector<16x32xf32>
    %66 = vector.extract_strided_slice %42 {offsets = [0, 4, 0], sizes = [2, 8, 32], strides = [1, 1, 1]} : vector<2x12x32xf32> to vector<2x8x32xf32>
    %67 = vector.shape_cast %66 : vector<2x8x32xf32> to vector<16x32xf32>
    %c9 = arith.constant 9 : index
    %c0_49 = arith.constant 0 : index
    %c0_50 = arith.constant 0 : index
    %68 = vector.load %arg3[%c9, %c0_49, %c0_50] : memref<15x32x32xf32, #tpu.memory_space<vmem>>, vector<1x32x32xf32>
    %69 = vector.shape_cast %68 : vector<1x32x32xf32> to vector<32x32xf32>
    %cst_51 = arith.constant dense<0.000000e+00> : vector<16x32xf32>
    %70 = tpu.matmul %67, %69, %cst_51 {dimension_numbers = #tpu.dot_dimension_numbers<[1], [0], [0], [1], [0, 0, 1, 1], [], []>} : vector<16x32xf32>, vector<32x32xf32>, vector<16x32xf32> -> vector<16x32xf32>
    %71 = arith.addf %65, %70 : vector<16x32xf32>
    %c1_52 = arith.constant 1 : index
    %c0_53 = arith.constant 0 : index
    %c0_54 = arith.constant 0 : index
    %72 = vector.load %arg4[%c1_52, %c0_53, %c0_54] : memref<3x1x32xf32, #tpu.memory_space<vmem>>, vector<1x1x32xf32>
    %73 = vector.shape_cast %72 : vector<1x1x32xf32> to vector<1x32xf32>
    %74 = vector.broadcast %73 : vector<1x32xf32> to vector<16x32xf32>
    %75 = arith.addf %71, %74 : vector<16x32xf32>
    %cst_55 = arith.constant 0.000000e+00 : f32
    %76 = vector.broadcast %cst_55 : f32 to vector<16x32xf32>
    %77 = arith.maximumf %75, %76 : vector<16x32xf32>
    %78 = vector.shape_cast %77 : vector<16x32xf32> to vector<2x8x32xf32>
    %c0_56 = arith.constant 0 : index
    %c2_57 = arith.constant 2 : index
    %c0_58 = arith.constant 0 : index
    %79 = vector.load %arg21[%c0_56, %c2_57, %c0_58] : memref<2x12x32xf32, #tpu.memory_space<vmem>>, vector<2x8x32xf32>
    tpu.vector_store %arg21[%c0_56, %c2_57, %c0_58], %78 {strides = array<i32>} : memref<2x12x32xf32, #tpu.memory_space<vmem>>, vector<2x8x32xf32>,
    %c0_59 = arith.constant 0 : index
    %c0_60 = arith.constant 0 : index
    %c0_61 = arith.constant 0 : index
    %80 = vector.load %arg21[%c0_59, %c0_60, %c0_61] : memref<2x12x32xf32, #tpu.memory_space<vmem>>, vector<2x12x32xf32>
    %81 = vector.extract_strided_slice %80 {offsets = [0, 0, 0], sizes = [2, 8, 32], strides = [1, 1, 1]} : vector<2x12x32xf32> to vector<2x8x32xf32>
    %82 = vector.shape_cast %81 : vector<2x8x32xf32> to vector<16x32xf32>
    %c10 = arith.constant 10 : index
    %c0_62 = arith.constant 0 : index
    %c0_63 = arith.constant 0 : index
    %83 = vector.load %arg3[%c10, %c0_62, %c0_63] : memref<15x32x32xf32, #tpu.memory_space<vmem>>, vector<1x32x32xf32>
    %84 = vector.shape_cast %83 : vector<1x32x32xf32> to vector<32x32xf32>
    %cst_64 = arith.constant dense<0.000000e+00> : vector<16x32xf32>
    %85 = tpu.matmul %82, %84, %cst_64 {dimension_numbers = #tpu.dot_dimension_numbers<[1], [0], [0], [1], [0, 0, 1, 1], [], []>} : vector<16x32xf32>, vector<32x32xf32>, vector<16x32xf32> -> vector<16x32xf32>
    %86 = vector.extract_strided_slice %80 {offsets = [0, 1, 0], sizes = [2, 8, 32], strides = [1, 1, 1]} : vector<2x12x32xf32> to vector<2x8x32xf32>
    %87 = vector.shape_cast %86 : vector<2x8x32xf32> to vector<16x32xf32>
    %c11 = arith.constant 11 : index
    %c0_65 = arith.constant 0 : index
    %c0_66 = arith.constant 0 : index
    %88 = vector.load %arg3[%c11, %c0_65, %c0_66] : memref<15x32x32xf32, #tpu.memory_space<vmem>>, vector<1x32x32xf32>
    %89 = vector.shape_cast %88 : vector<1x32x32xf32> to vector<32x32xf32>
    %cst_67 = arith.constant dense<0.000000e+00> : vector<16x32xf32>
    %90 = tpu.matmul %87, %89, %cst_67 {dimension_numbers = #tpu.dot_dimension_numbers<[1], [0], [0], [1], [0, 0, 1, 1], [], []>} : vector<16x32xf32>, vector<32x32xf32>, vector<16x32xf32> -> vector<16x32xf32>
    %91 = arith.addf %85, %90 : vector<16x32xf32>
    %92 = vector.extract_strided_slice %80 {offsets = [0, 2, 0], sizes = [2, 8, 32], strides = [1, 1, 1]} : vector<2x12x32xf32> to vector<2x8x32xf32>
    %93 = vector.shape_cast %92 : vector<2x8x32xf32> to vector<16x32xf32>
    %c12 = arith.constant 12 : index
    %c0_68 = arith.constant 0 : index
    %c0_69 = arith.constant 0 : index
    %94 = vector.load %arg3[%c12, %c0_68, %c0_69] : memref<15x32x32xf32, #tpu.memory_space<vmem>>, vector<1x32x32xf32>
    %95 = vector.shape_cast %94 : vector<1x32x32xf32> to vector<32x32xf32>
    %cst_70 = arith.constant dense<0.000000e+00> : vector<16x32xf32>
    %96 = tpu.matmul %93, %95, %cst_70 {dimension_numbers = #tpu.dot_dimension_numbers<[1], [0], [0], [1], [0, 0, 1, 1], [], []>} : vector<16x32xf32>, vector<32x32xf32>, vector<16x32xf32> -> vector<16x32xf32>
    %97 = arith.addf %91, %96 : vector<16x32xf32>
    %98 = vector.extract_strided_slice %80 {offsets = [0, 3, 0], sizes = [2, 8, 32], strides = [1, 1, 1]} : vector<2x12x32xf32> to vector<2x8x32xf32>
    %99 = vector.shape_cast %98 : vector<2x8x32xf32> to vector<16x32xf32>
    %c13 = arith.constant 13 : index
    %c0_71 = arith.constant 0 : index
    %c0_72 = arith.constant 0 : index
    %100 = vector.load %arg3[%c13, %c0_71, %c0_72] : memref<15x32x32xf32, #tpu.memory_space<vmem>>, vector<1x32x32xf32>
    %101 = vector.shape_cast %100 : vector<1x32x32xf32> to vector<32x32xf32>
    %cst_73 = arith.constant dense<0.000000e+00> : vector<16x32xf32>
    %102 = tpu.matmul %99, %101, %cst_73 {dimension_numbers = #tpu.dot_dimension_numbers<[1], [0], [0], [1], [0, 0, 1, 1], [], []>} : vector<16x32xf32>, vector<32x32xf32>, vector<16x32xf32> -> vector<16x32xf32>
    %103 = arith.addf %97, %102 : vector<16x32xf32>
    %104 = vector.extract_strided_slice %80 {offsets = [0, 4, 0], sizes = [2, 8, 32], strides = [1, 1, 1]} : vector<2x12x32xf32> to vector<2x8x32xf32>
    %105 = vector.shape_cast %104 : vector<2x8x32xf32> to vector<16x32xf32>
    %c14 = arith.constant 14 : index
    %c0_74 = arith.constant 0 : index
    %c0_75 = arith.constant 0 : index
    %106 = vector.load %arg3[%c14, %c0_74, %c0_75] : memref<15x32x32xf32, #tpu.memory_space<vmem>>, vector<1x32x32xf32>
    %107 = vector.shape_cast %106 : vector<1x32x32xf32> to vector<32x32xf32>
    %cst_76 = arith.constant dense<0.000000e+00> : vector<16x32xf32>
    %108 = tpu.matmul %105, %107, %cst_76 {dimension_numbers = #tpu.dot_dimension_numbers<[1], [0], [0], [1], [0, 0, 1, 1], [], []>} : vector<16x32xf32>, vector<32x32xf32>, vector<16x32xf32> -> vector<16x32xf32>
    %109 = arith.addf %103, %108 : vector<16x32xf32>
    %c2_77 = arith.constant 2 : index
    %c0_78 = arith.constant 0 : index
    %c0_79 = arith.constant 0 : index
    %110 = vector.load %arg4[%c2_77, %c0_78, %c0_79] : memref<3x1x32xf32, #tpu.memory_space<vmem>>, vector<1x1x32xf32>
    %111 = vector.shape_cast %110 : vector<1x1x32xf32> to vector<1x32xf32>
    %112 = vector.broadcast %111 : vector<1x32xf32> to vector<16x32xf32>
    %113 = arith.addf %109, %112 : vector<16x32xf32>
    %cst_80 = arith.constant 0.000000e+00 : f32
    %114 = vector.broadcast %cst_80 : f32 to vector<16x32xf32>
    %115 = arith.maximumf %113, %114 : vector<16x32xf32>
    %c0_81 = arith.constant 0 : index
    %c0_82 = arith.constant 0 : index
    %116 = vector.load %arg5[%c0_81, %c0_82] : memref<32x32xf32, #tpu.memory_space<vmem>>, vector<32x32xf32>
    %cst_83 = arith.constant dense<0.000000e+00> : vector<16x32xf32>
    %117 = tpu.matmul %115, %116, %cst_83 {dimension_numbers = #tpu.dot_dimension_numbers<[1], [0], [0], [1], [0, 0, 1, 1], [], []>} : vector<16x32xf32>, vector<32x32xf32>, vector<16x32xf32> -> vector<16x32xf32>
    %c0_84 = arith.constant 0 : index
    %c0_85 = arith.constant 0 : index
    %118 = vector.load %arg6[%c0_84, %c0_85] : memref<1x32xf32, #tpu.memory_space<vmem>>, vector<1x32xf32>
    %119 = vector.broadcast %118 : vector<1x32xf32> to vector<16x32xf32>
    %120 = arith.addf %117, %119 : vector<16x32xf32>
    %c0_86 = arith.constant 0 : index
    %c0_87 = arith.constant 0 : index
    %c0_88 = arith.constant 0 : index
    %121 = vector.load %arg1[%c0_86, %c0_87, %c0_88] : memref<2x8x32xf32, #tpu.memory_space<vmem>>, vector<2x8x32xf32>
    %122 = vector.shape_cast %121 : vector<2x8x32xf32> to vector<16x32xf32>
    %c0_89 = arith.constant 0 : index
    %c0_90 = arith.constant 0 : index
    %123 = memref.load %arg2[%c0_89, %c0_90] : memref<1x1xf32, #tpu.memory_space<smem>>
    %124 = vector.broadcast %123 : f32 to vector<16x32xf32>
    %125 = arith.mulf %122, %124 : vector<16x32xf32>
    %126 = arith.addf %125, %120 : vector<16x32xf32>
    %c0_91 = arith.constant 0 : index
    %c0_92 = arith.constant 0 : index
    %c0_93 = arith.constant 0 : index
    %127 = vector.load %arg8[%c0_91, %c0_92, %c0_93] : memref<3x32x32xf32, #tpu.memory_space<vmem>>, vector<1x32x32xf32>
    %128 = vector.shape_cast %127 : vector<1x32x32xf32> to vector<32x32xf32>
    %cst_94 = arith.constant dense<0.000000e+00> : vector<16x32xf32>
    %129 = tpu.matmul %126, %128, %cst_94 {dimension_numbers = #tpu.dot_dimension_numbers<[1], [0], [0], [1], [0, 0, 1, 1], [], []>} : vector<16x32xf32>, vector<32x32xf32>, vector<16x32xf32> -> vector<16x32xf32>
    %c0_95 = arith.constant 0 : index
    %c0_96 = arith.constant 0 : index
    %c0_97 = arith.constant 0 : index
    %130 = vector.load %arg10[%c0_95, %c0_96, %c0_97] : memref<3x1x32xf32, #tpu.memory_space<vmem>>, vector<1x1x32xf32>
    %131 = vector.shape_cast %130 : vector<1x1x32xf32> to vector<1x32xf32>
    %132 = vector.broadcast %131 : vector<1x32xf32> to vector<16x32xf32>
    %133 = arith.addf %129, %132 : vector<16x32xf32>
    %c0_98 = arith.constant 0 : index
    %c0_99 = arith.constant 0 : index
    %c0_100 = arith.constant 0 : index
    %134 = vector.load %arg7[%c0_98, %c0_99, %c0_100] : memref<36x32x8xf32, #tpu.memory_space<vmem>>, vector<1x32x8xf32>
    %135 = vector.shape_cast %134 : vector<1x32x8xf32> to vector<32x8xf32>
    %cst_101 = arith.constant dense<0.000000e+00> : vector<16x8xf32>
    %136 = tpu.matmul %126, %135, %cst_101 {dimension_numbers = #tpu.dot_dimension_numbers<[1], [0], [0], [1], [0, 0, 1, 1], [], []>} : vector<16x32xf32>, vector<32x8xf32>, vector<16x8xf32> -> vector<16x8xf32>
    %137 = vector.shape_cast %136 : vector<16x8xf32> to vector<2x8x8xf32>
    %c1_102 = arith.constant 1 : index
    %c0_103 = arith.constant 0 : index
    %c0_104 = arith.constant 0 : index
    %138 = vector.load %arg7[%c1_102, %c0_103, %c0_104] : memref<36x32x8xf32, #tpu.memory_space<vmem>>, vector<1x32x8xf32>
    %139 = vector.shape_cast %138 : vector<1x32x8xf32> to vector<32x8xf32>
    %cst_105 = arith.constant dense<0.000000e+00> : vector<16x8xf32>
    %140 = tpu.matmul %126, %139, %cst_105 {dimension_numbers = #tpu.dot_dimension_numbers<[1], [0], [0], [1], [0, 0, 1, 1], [], []>} : vector<16x32xf32>, vector<32x8xf32>, vector<16x8xf32> -> vector<16x8xf32>
    %141 = vector.shape_cast %140 : vector<16x8xf32> to vector<2x8x8xf32>
    %c2_106 = arith.constant 2 : index
    %c0_107 = arith.constant 0 : index
    %c0_108 = arith.constant 0 : index
    %142 = vector.load %arg7[%c2_106, %c0_107, %c0_108] : memref<36x32x8xf32, #tpu.memory_space<vmem>>, vector<1x32x8xf32>
    %143 = vector.shape_cast %142 : vector<1x32x8xf32> to vector<32x8xf32>
    %cst_109 = arith.constant dense<0.000000e+00> : vector<16x8xf32>
    %144 = tpu.matmul %126, %143, %cst_109 {dimension_numbers = #tpu.dot_dimension_numbers<[1], [0], [0], [1], [0, 0, 1, 1], [], []>} : vector<16x32xf32>, vector<32x8xf32>, vector<16x8xf32> -> vector<16x8xf32>
    %145 = vector.shape_cast %144 : vector<16x8xf32> to vector<2x8x8xf32>
    "tpu.trace_start"() <{level = 10 : i32, message = "bqd,bkd->bqk"}> : () -> ()
    %cst_110 = arith.constant dense<0.000000e+00> : vector<2x8x8xf32>
    %146 = tpu.matmul %137, %141, %cst_110 {dimension_numbers = #tpu.dot_dimension_numbers<[2], [2], [1], [1], [0, 0, 0, 1, 1, 1], [0], [0]>} : vector<2x8x8xf32>, vector<2x8x8xf32>, vector<2x8x8xf32> -> vector<2x8x8xf32>
    "tpu.trace_stop"() : () -> ()
    %cst_111 = arith.constant dense<0xFF800000> : vector<2x8xf32>
    %147 = vector.multi_reduction <maximumf>, %146, %cst_111 [2] : vector<2x8x8xf32> to vector<2x8xf32>
    %148 = vector.shape_cast %147 : vector<2x8xf32> to vector<2x8x1xf32>
    %149 = vector.broadcast %148 : vector<2x8x1xf32> to vector<2x8x8xf32>
    %150 = arith.subf %146, %149 : vector<2x8x8xf32>
    %151 = math.exp %150 : vector<2x8x8xf32>
    %cst_112 = arith.constant dense<0.000000e+00> : vector<2x8xf32>
    %152 = vector.multi_reduction <add>, %151, %cst_112 [2] : vector<2x8x8xf32> to vector<2x8xf32>
    %153 = vector.shape_cast %152 : vector<2x8xf32> to vector<2x8x1xf32>
    %154 = vector.broadcast %153 : vector<2x8x1xf32> to vector<2x8x8xf32>
    %155 = arith.divf %151, %154 : vector<2x8x8xf32>
    %c0_113 = arith.constant 0 : index
    %c0_114 = arith.constant 0 : index
    %c0_115 = arith.constant 0 : index
    %c0_116 = arith.constant 0 : index
    %156 = vector.load %arg20[%c0_113, %c0_114, %c0_115, %c0_116] : memref<12x2x8x8xf32, #tpu.memory_space<vmem>>, vector<1x2x8x8xf32>
    %157 = vector.shape_cast %156 : vector<1x2x8x8xf32> to vector<2x8x8xf32>
    %158 = vector.shape_cast %155 : vector<2x8x8xf32> to vector<1x2x8x8xf32>
    tpu.vector_store %arg20[%c0_113, %c0_114, %c0_115, %c0_116], %158 {strides = array<i32>} : memref<12x2x8x8xf32, #tpu.memory_space<vmem>>, vector<1x2x8x8xf32>,
    "tpu.trace_start"() <{level = 10 : i32, message = "bqk,bkd->bqd"}> : () -> ()
    %cst_117 = arith.constant dense<0.000000e+00> : vector<2x8x8xf32>
    %159 = tpu.matmul %155, %145, %cst_117 {dimension_numbers = #tpu.dot_dimension_numbers<[2], [1], [1], [2], [0, 0, 0, 1, 1, 2], [0], [0]>} : vector<2x8x8xf32>, vector<2x8x8xf32>, vector<2x8x8xf32> -> vector<2x8x8xf32>
    "tpu.trace_stop"() : () -> ()
    %160 = vector.shape_cast %159 : vector<2x8x8xf32> to vector<16x8xf32>
    %c0_118 = arith.constant 0 : index
    %c0_119 = arith.constant 0 : index
    %c0_120 = arith.constant 0 : index
    %161 = vector.load %arg9[%c0_118, %c0_119, %c0_120] : memref<12x8x32xf32, #tpu.memory_space<vmem>>, vector<1x8x32xf32>
    %162 = vector.shape_cast %161 : vector<1x8x32xf32> to vector<8x32xf32>
    %cst_121 = arith.constant dense<0.000000e+00> : vector<16x32xf32>
    %163 = tpu.matmul %160, %162, %cst_121 {dimension_numbers = #tpu.dot_dimension_numbers<[1], [0], [0], [1], [0, 0, 1, 1], [], []>} : vector<16x8xf32>, vector<8x32xf32>, vector<16x32xf32> -> vector<16x32xf32>
    %164 = arith.addf %133, %163 : vector<16x32xf32>
    %c3_122 = arith.constant 3 : index
    %c0_123 = arith.constant 0 : index
    %c0_124 = arith.constant 0 : index
    %165 = vector.load %arg7[%c3_122, %c0_123, %c0_124] : memref<36x32x8xf32, #tpu.memory_space<vmem>>, vector<1x32x8xf32>
    %166 = vector.shape_cast %165 : vector<1x32x8xf32> to vector<32x8xf32>
    %cst_125 = arith.constant dense<0.000000e+00> : vector<16x8xf32>
    %167 = tpu.matmul %126, %166, %cst_125 {dimension_numbers = #tpu.dot_dimension_numbers<[1], [0], [0], [1], [0, 0, 1, 1], [], []>} : vector<16x32xf32>, vector<32x8xf32>, vector<16x8xf32> -> vector<16x8xf32>
    %168 = vector.shape_cast %167 : vector<16x8xf32> to vector<2x8x8xf32>
    %c4_126 = arith.constant 4 : index
    %c0_127 = arith.constant 0 : index
    %c0_128 = arith.constant 0 : index
    %169 = vector.load %arg7[%c4_126, %c0_127, %c0_128] : memref<36x32x8xf32, #tpu.memory_space<vmem>>, vector<1x32x8xf32>
    %170 = vector.shape_cast %169 : vector<1x32x8xf32> to vector<32x8xf32>
    %cst_129 = arith.constant dense<0.000000e+00> : vector<16x8xf32>
    %171 = tpu.matmul %126, %170, %cst_129 {dimension_numbers = #tpu.dot_dimension_numbers<[1], [0], [0], [1], [0, 0, 1, 1], [], []>} : vector<16x32xf32>, vector<32x8xf32>, vector<16x8xf32> -> vector<16x8xf32>
    %172 = vector.shape_cast %171 : vector<16x8xf32> to vector<2x8x8xf32>
    %c5_130 = arith.constant 5 : index
    %c0_131 = arith.constant 0 : index
    %c0_132 = arith.constant 0 : index
    %173 = vector.load %arg7[%c5_130, %c0_131, %c0_132] : memref<36x32x8xf32, #tpu.memory_space<vmem>>, vector<1x32x8xf32>
    %174 = vector.shape_cast %173 : vector<1x32x8xf32> to vector<32x8xf32>
    %cst_133 = arith.constant dense<0.000000e+00> : vector<16x8xf32>
    %175 = tpu.matmul %126, %174, %cst_133 {dimension_numbers = #tpu.dot_dimension_numbers<[1], [0], [0], [1], [0, 0, 1, 1], [], []>} : vector<16x32xf32>, vector<32x8xf32>, vector<16x8xf32> -> vector<16x8xf32>
    %176 = vector.shape_cast %175 : vector<16x8xf32> to vector<2x8x8xf32>
    "tpu.trace_start"() <{level = 10 : i32, message = "bqd,bkd->bqk"}> : () -> ()
    %cst_134 = arith.constant dense<0.000000e+00> : vector<2x8x8xf32>
    %177 = tpu.matmul %168, %172, %cst_134 {dimension_numbers = #tpu.dot_dimension_numbers<[2], [2], [1], [1], [0, 0, 0, 1, 1, 1], [0], [0]>} : vector<2x8x8xf32>, vector<2x8x8xf32>, vector<2x8x8xf32> -> vector<2x8x8xf32>
    "tpu.trace_stop"() : () -> ()
    %cst_135 = arith.constant dense<0xFF800000> : vector<2x8xf32>
    %178 = vector.multi_reduction <maximumf>, %177, %cst_135 [2] : vector<2x8x8xf32> to vector<2x8xf32>
    %179 = vector.shape_cast %178 : vector<2x8xf32> to vector<2x8x1xf32>
    %180 = vector.broadcast %179 : vector<2x8x1xf32> to vector<2x8x8xf32>
    %181 = arith.subf %177, %180 : vector<2x8x8xf32>
    %182 = math.exp %181 : vector<2x8x8xf32>
    %cst_136 = arith.constant dense<0.000000e+00> : vector<2x8xf32>
    %183 = vector.multi_reduction <add>, %182, %cst_136 [2] : vector<2x8x8xf32> to vector<2x8xf32>
    %184 = vector.shape_cast %183 : vector<2x8xf32> to vector<2x8x1xf32>
    %185 = vector.broadcast %184 : vector<2x8x1xf32> to vector<2x8x8xf32>
    %186 = arith.divf %182, %185 : vector<2x8x8xf32>
    %c1_137 = arith.constant 1 : index
    %c0_138 = arith.constant 0 : index
    %c0_139 = arith.constant 0 : index
    %c0_140 = arith.constant 0 : index
    %187 = vector.load %arg20[%c1_137, %c0_138, %c0_139, %c0_140] : memref<12x2x8x8xf32, #tpu.memory_space<vmem>>, vector<1x2x8x8xf32>
    %188 = vector.shape_cast %187 : vector<1x2x8x8xf32> to vector<2x8x8xf32>
    %189 = vector.shape_cast %186 : vector<2x8x8xf32> to vector<1x2x8x8xf32>
    tpu.vector_store %arg20[%c1_137, %c0_138, %c0_139, %c0_140], %189 {strides = array<i32>} : memref<12x2x8x8xf32, #tpu.memory_space<vmem>>, vector<1x2x8x8xf32>,
    "tpu.trace_start"() <{level = 10 : i32, message = "bqk,bkd->bqd"}> : () -> ()
    %cst_141 = arith.constant dense<0.000000e+00> : vector<2x8x8xf32>
    %190 = tpu.matmul %186, %176, %cst_141 {dimension_numbers = #tpu.dot_dimension_numbers<[2], [1], [1], [2], [0, 0, 0, 1, 1, 2], [0], [0]>} : vector<2x8x8xf32>, vector<2x8x8xf32>, vector<2x8x8xf32> -> vector<2x8x8xf32>
    "tpu.trace_stop"() : () -> ()
    %191 = vector.shape_cast %190 : vector<2x8x8xf32> to vector<16x8xf32>
    %c1_142 = arith.constant 1 : index
    %c0_143 = arith.constant 0 : index
    %c0_144 = arith.constant 0 : index
    %192 = vector.load %arg9[%c1_142, %c0_143, %c0_144] : memref<12x8x32xf32, #tpu.memory_space<vmem>>, vector<1x8x32xf32>
    %193 = vector.shape_cast %192 : vector<1x8x32xf32> to vector<8x32xf32>
    %cst_145 = arith.constant dense<0.000000e+00> : vector<16x32xf32>
    %194 = tpu.matmul %191, %193, %cst_145 {dimension_numbers = #tpu.dot_dimension_numbers<[1], [0], [0], [1], [0, 0, 1, 1], [], []>} : vector<16x8xf32>, vector<8x32xf32>, vector<16x32xf32> -> vector<16x32xf32>
    %195 = arith.addf %164, %194 : vector<16x32xf32>
    %c6_146 = arith.constant 6 : index
    %c0_147 = arith.constant 0 : index
    %c0_148 = arith.constant 0 : index
    %196 = vector.load %arg7[%c6_146, %c0_147, %c0_148] : memref<36x32x8xf32, #tpu.memory_space<vmem>>, vector<1x32x8xf32>
    %197 = vector.shape_cast %196 : vector<1x32x8xf32> to vector<32x8xf32>
    %cst_149 = arith.constant dense<0.000000e+00> : vector<16x8xf32>
    %198 = tpu.matmul %126, %197, %cst_149 {dimension_numbers = #tpu.dot_dimension_numbers<[1], [0], [0], [1], [0, 0, 1, 1], [], []>} : vector<16x32xf32>, vector<32x8xf32>, vector<16x8xf32> -> vector<16x8xf32>
    %199 = vector.shape_cast %198 : vector<16x8xf32> to vector<2x8x8xf32>
    %c7_150 = arith.constant 7 : index
    %c0_151 = arith.constant 0 : index
    %c0_152 = arith.constant 0 : index
    %200 = vector.load %arg7[%c7_150, %c0_151, %c0_152] : memref<36x32x8xf32, #tpu.memory_space<vmem>>, vector<1x32x8xf32>
    %201 = vector.shape_cast %200 : vector<1x32x8xf32> to vector<32x8xf32>
    %cst_153 = arith.constant dense<0.000000e+00> : vector<16x8xf32>
    %202 = tpu.matmul %126, %201, %cst_153 {dimension_numbers = #tpu.dot_dimension_numbers<[1], [0], [0], [1], [0, 0, 1, 1], [], []>} : vector<16x32xf32>, vector<32x8xf32>, vector<16x8xf32> -> vector<16x8xf32>
    %203 = vector.shape_cast %202 : vector<16x8xf32> to vector<2x8x8xf32>
    %c8_154 = arith.constant 8 : index
    %c0_155 = arith.constant 0 : index
    %c0_156 = arith.constant 0 : index
    %204 = vector.load %arg7[%c8_154, %c0_155, %c0_156] : memref<36x32x8xf32, #tpu.memory_space<vmem>>, vector<1x32x8xf32>
    %205 = vector.shape_cast %204 : vector<1x32x8xf32> to vector<32x8xf32>
    %cst_157 = arith.constant dense<0.000000e+00> : vector<16x8xf32>
    %206 = tpu.matmul %126, %205, %cst_157 {dimension_numbers = #tpu.dot_dimension_numbers<[1], [0], [0], [1], [0, 0, 1, 1], [], []>} : vector<16x32xf32>, vector<32x8xf32>, vector<16x8xf32> -> vector<16x8xf32>
    %207 = vector.shape_cast %206 : vector<16x8xf32> to vector<2x8x8xf32>
    "tpu.trace_start"() <{level = 10 : i32, message = "bqd,bkd->bqk"}> : () -> ()
    %cst_158 = arith.constant dense<0.000000e+00> : vector<2x8x8xf32>
    %208 = tpu.matmul %199, %203, %cst_158 {dimension_numbers = #tpu.dot_dimension_numbers<[2], [2], [1], [1], [0, 0, 0, 1, 1, 1], [0], [0]>} : vector<2x8x8xf32>, vector<2x8x8xf32>, vector<2x8x8xf32> -> vector<2x8x8xf32>
    "tpu.trace_stop"() : () -> ()
    %cst_159 = arith.constant dense<0xFF800000> : vector<2x8xf32>
    %209 = vector.multi_reduction <maximumf>, %208, %cst_159 [2] : vector<2x8x8xf32> to vector<2x8xf32>
    %210 = vector.shape_cast %209 : vector<2x8xf32> to vector<2x8x1xf32>
    %211 = vector.broadcast %210 : vector<2x8x1xf32> to vector<2x8x8xf32>
    %212 = arith.subf %208, %211 : vector<2x8x8xf32>
    %213 = math.exp %212 : vector<2x8x8xf32>
    %cst_160 = arith.constant dense<0.000000e+00> : vector<2x8xf32>
    %214 = vector.multi_reduction <add>, %213, %cst_160 [2] : vector<2x8x8xf32> to vector<2x8xf32>
    %215 = vector.shape_cast %214 : vector<2x8xf32> to vector<2x8x1xf32>
    %216 = vector.broadcast %215 : vector<2x8x1xf32> to vector<2x8x8xf32>
    %217 = arith.divf %213, %216 : vector<2x8x8xf32>
    %c2_161 = arith.constant 2 : index
    %c0_162 = arith.constant 0 : index
    %c0_163 = arith.constant 0 : index
    %c0_164 = arith.constant 0 : index
    %218 = vector.load %arg20[%c2_161, %c0_162, %c0_163, %c0_164] : memref<12x2x8x8xf32, #tpu.memory_space<vmem>>, vector<1x2x8x8xf32>
    %219 = vector.shape_cast %218 : vector<1x2x8x8xf32> to vector<2x8x8xf32>
    %220 = vector.shape_cast %217 : vector<2x8x8xf32> to vector<1x2x8x8xf32>
    tpu.vector_store %arg20[%c2_161, %c0_162, %c0_163, %c0_164], %220 {strides = array<i32>} : memref<12x2x8x8xf32, #tpu.memory_space<vmem>>, vector<1x2x8x8xf32>,
    "tpu.trace_start"() <{level = 10 : i32, message = "bqk,bkd->bqd"}> : () -> ()
    %cst_165 = arith.constant dense<0.000000e+00> : vector<2x8x8xf32>
    %221 = tpu.matmul %217, %207, %cst_165 {dimension_numbers = #tpu.dot_dimension_numbers<[2], [1], [1], [2], [0, 0, 0, 1, 1, 2], [0], [0]>} : vector<2x8x8xf32>, vector<2x8x8xf32>, vector<2x8x8xf32> -> vector<2x8x8xf32>
    "tpu.trace_stop"() : () -> ()
    %222 = vector.shape_cast %221 : vector<2x8x8xf32> to vector<16x8xf32>
    %c2_166 = arith.constant 2 : index
    %c0_167 = arith.constant 0 : index
    %c0_168 = arith.constant 0 : index
    %223 = vector.load %arg9[%c2_166, %c0_167, %c0_168] : memref<12x8x32xf32, #tpu.memory_space<vmem>>, vector<1x8x32xf32>
    %224 = vector.shape_cast %223 : vector<1x8x32xf32> to vector<8x32xf32>
    %cst_169 = arith.constant dense<0.000000e+00> : vector<16x32xf32>
    %225 = tpu.matmul %222, %224, %cst_169 {dimension_numbers = #tpu.dot_dimension_numbers<[1], [0], [0], [1], [0, 0, 1, 1], [], []>} : vector<16x8xf32>, vector<8x32xf32>, vector<16x32xf32> -> vector<16x32xf32>
    %226 = arith.addf %195, %225 : vector<16x32xf32>
    %c9_170 = arith.constant 9 : index
    %c0_171 = arith.constant 0 : index
    %c0_172 = arith.constant 0 : index
    %227 = vector.load %arg7[%c9_170, %c0_171, %c0_172] : memref<36x32x8xf32, #tpu.memory_space<vmem>>, vector<1x32x8xf32>
    %228 = vector.shape_cast %227 : vector<1x32x8xf32> to vector<32x8xf32>
    %cst_173 = arith.constant dense<0.000000e+00> : vector<16x8xf32>
    %229 = tpu.matmul %126, %228, %cst_173 {dimension_numbers = #tpu.dot_dimension_numbers<[1], [0], [0], [1], [0, 0, 1, 1], [], []>} : vector<16x32xf32>, vector<32x8xf32>, vector<16x8xf32> -> vector<16x8xf32>
    %230 = vector.shape_cast %229 : vector<16x8xf32> to vector<2x8x8xf32>
    %c10_174 = arith.constant 10 : index
    %c0_175 = arith.constant 0 : index
    %c0_176 = arith.constant 0 : index
    %231 = vector.load %arg7[%c10_174, %c0_175, %c0_176] : memref<36x32x8xf32, #tpu.memory_space<vmem>>, vector<1x32x8xf32>
    %232 = vector.shape_cast %231 : vector<1x32x8xf32> to vector<32x8xf32>
    %cst_177 = arith.constant dense<0.000000e+00> : vector<16x8xf32>
    %233 = tpu.matmul %126, %232, %cst_177 {dimension_numbers = #tpu.dot_dimension_numbers<[1], [0], [0], [1], [0, 0, 1, 1], [], []>} : vector<16x32xf32>, vector<32x8xf32>, vector<16x8xf32> -> vector<16x8xf32>
    %234 = vector.shape_cast %233 : vector<16x8xf32> to vector<2x8x8xf32>
    %c11_178 = arith.constant 11 : index
    %c0_179 = arith.constant 0 : index
    %c0_180 = arith.constant 0 : index
    %235 = vector.load %arg7[%c11_178, %c0_179, %c0_180] : memref<36x32x8xf32, #tpu.memory_space<vmem>>, vector<1x32x8xf32>
    %236 = vector.shape_cast %235 : vector<1x32x8xf32> to vector<32x8xf32>
    %cst_181 = arith.constant dense<0.000000e+00> : vector<16x8xf32>
    %237 = tpu.matmul %126, %236, %cst_181 {dimension_numbers = #tpu.dot_dimension_numbers<[1], [0], [0], [1], [0, 0, 1, 1], [], []>} : vector<16x32xf32>, vector<32x8xf32>, vector<16x8xf32> -> vector<16x8xf32>
    %238 = vector.shape_cast %237 : vector<16x8xf32> to vector<2x8x8xf32>
    "tpu.trace_start"() <{level = 10 : i32, message = "bqd,bkd->bqk"}> : () -> ()
    %cst_182 = arith.constant dense<0.000000e+00> : vector<2x8x8xf32>
    %239 = tpu.matmul %230, %234, %cst_182 {dimension_numbers = #tpu.dot_dimension_numbers<[2], [2], [1], [1], [0, 0, 0, 1, 1, 1], [0], [0]>} : vector<2x8x8xf32>, vector<2x8x8xf32>, vector<2x8x8xf32> -> vector<2x8x8xf32>
    "tpu.trace_stop"() : () -> ()
    %cst_183 = arith.constant dense<0xFF800000> : vector<2x8xf32>
    %240 = vector.multi_reduction <maximumf>, %239, %cst_183 [2] : vector<2x8x8xf32> to vector<2x8xf32>
    %241 = vector.shape_cast %240 : vector<2x8xf32> to vector<2x8x1xf32>
    %242 = vector.broadcast %241 : vector<2x8x1xf32> to vector<2x8x8xf32>
    %243 = arith.subf %239, %242 : vector<2x8x8xf32>
    %244 = math.exp %243 : vector<2x8x8xf32>
    %cst_184 = arith.constant dense<0.000000e+00> : vector<2x8xf32>
    %245 = vector.multi_reduction <add>, %244, %cst_184 [2] : vector<2x8x8xf32> to vector<2x8xf32>
    %246 = vector.shape_cast %245 : vector<2x8xf32> to vector<2x8x1xf32>
    %247 = vector.broadcast %246 : vector<2x8x1xf32> to vector<2x8x8xf32>
    %248 = arith.divf %244, %247 : vector<2x8x8xf32>
    %c3_185 = arith.constant 3 : index
    %c0_186 = arith.constant 0 : index
    %c0_187 = arith.constant 0 : index
    %c0_188 = arith.constant 0 : index
    %249 = vector.load %arg20[%c3_185, %c0_186, %c0_187, %c0_188] : memref<12x2x8x8xf32, #tpu.memory_space<vmem>>, vector<1x2x8x8xf32>
    %250 = vector.shape_cast %249 : vector<1x2x8x8xf32> to vector<2x8x8xf32>
    %251 = vector.shape_cast %248 : vector<2x8x8xf32> to vector<1x2x8x8xf32>
    tpu.vector_store %arg20[%c3_185, %c0_186, %c0_187, %c0_188], %251 {strides = array<i32>} : memref<12x2x8x8xf32, #tpu.memory_space<vmem>>, vector<1x2x8x8xf32>,
    "tpu.trace_start"() <{level = 10 : i32, message = "bqk,bkd->bqd"}> : () -> ()
    %cst_189 = arith.constant dense<0.000000e+00> : vector<2x8x8xf32>
    %252 = tpu.matmul %248, %238, %cst_189 {dimension_numbers = #tpu.dot_dimension_numbers<[2], [1], [1], [2], [0, 0, 0, 1, 1, 2], [0], [0]>} : vector<2x8x8xf32>, vector<2x8x8xf32>, vector<2x8x8xf32> -> vector<2x8x8xf32>
    "tpu.trace_stop"() : () -> ()
    %253 = vector.shape_cast %252 : vector<2x8x8xf32> to vector<16x8xf32>
    %c3_190 = arith.constant 3 : index
    %c0_191 = arith.constant 0 : index
    %c0_192 = arith.constant 0 : index
    %254 = vector.load %arg9[%c3_190, %c0_191, %c0_192] : memref<12x8x32xf32, #tpu.memory_space<vmem>>, vector<1x8x32xf32>
    %255 = vector.shape_cast %254 : vector<1x8x32xf32> to vector<8x32xf32>
    %cst_193 = arith.constant dense<0.000000e+00> : vector<16x32xf32>
    %256 = tpu.matmul %253, %255, %cst_193 {dimension_numbers = #tpu.dot_dimension_numbers<[1], [0], [0], [1], [0, 0, 1, 1], [], []>} : vector<16x8xf32>, vector<8x32xf32>, vector<16x32xf32> -> vector<16x32xf32>
    %257 = arith.addf %226, %256 : vector<16x32xf32>
    %258 = arith.addf %257, %126 : vector<16x32xf32>
    %c0_194 = arith.constant 0 : index
    %c0_195 = arith.constant 0 : index
    %c0_196 = arith.constant 0 : index
    %259 = vector.load %arg11[%c0_194, %c0_195, %c0_196] : memref<3x1x32xf32, #tpu.memory_space<vmem>>, vector<1x1x32xf32>
    %260 = vector.shape_cast %259 : vector<1x1x32xf32> to vector<1x32xf32>
    %c0_197 = arith.constant 0 : index
    %c0_198 = arith.constant 0 : index
    %c0_199 = arith.constant 0 : index
    %261 = vector.load %arg12[%c0_197, %c0_198, %c0_199] : memref<3x1x32xf32, #tpu.memory_space<vmem>>, vector<1x1x32xf32>
    %262 = vector.shape_cast %261 : vector<1x1x32xf32> to vector<1x32xf32>
    %cst_200 = arith.constant dense<0.000000e+00> : vector<16xf32>
    %263 = vector.multi_reduction <add>, %258, %cst_200 [1] : vector<16x32xf32> to vector<16xf32>
    %264 = vector.shape_cast %263 : vector<16xf32> to vector<16x1xf32>
    %cst_201 = arith.constant 3.200000e+01 : f32
    %265 = vector.broadcast %cst_201 : f32 to vector<16x1xf32>
    %266 = arith.divf %264, %265 : vector<16x1xf32>
    %267 = vector.broadcast %266 : vector<16x1xf32> to vector<16x32xf32>
    %268 = arith.subf %258, %267 : vector<16x32xf32>
    %269 = arith.mulf %268, %268 : vector<16x32xf32>
    %cst_202 = arith.constant dense<0.000000e+00> : vector<16xf32>
    %270 = vector.multi_reduction <add>, %269, %cst_202 [1] : vector<16x32xf32> to vector<16xf32>
    %271 = vector.shape_cast %270 : vector<16xf32> to vector<16x1xf32>
    %cst_203 = arith.constant 3.200000e+01 : f32
    %272 = vector.broadcast %cst_203 : f32 to vector<16x1xf32>
    %273 = arith.divf %271, %272 : vector<16x1xf32>
    %274 = vector.broadcast %266 : vector<16x1xf32> to vector<16x32xf32>
    %275 = arith.subf %258, %274 : vector<16x32xf32>
    %cst_204 = arith.constant 9.99999974E-6 : f32
    %276 = vector.broadcast %cst_204 : f32 to vector<16x1xf32>
    %277 = arith.addf %273, %276 : vector<16x1xf32>
    %278 = math.rsqrt %277 : vector<16x1xf32>
    %279 = vector.broadcast %278 : vector<16x1xf32> to vector<16x32xf32>
    %280 = arith.mulf %275, %279 : vector<16x32xf32>
    %281 = vector.broadcast %260 : vector<1x32xf32> to vector<16x32xf32>
    %282 = arith.mulf %280, %281 : vector<16x32xf32>
    %283 = vector.broadcast %262 : vector<1x32xf32> to vector<16x32xf32>
    %284 = arith.addf %282, %283 : vector<16x32xf32>
    %c0_205 = arith.constant 0 : index
    %c0_206 = arith.constant 0 : index
    %c0_207 = arith.constant 0 : index
    %285 = vector.load %arg13[%c0_205, %c0_206, %c0_207] : memref<3x32x128xf32, #tpu.memory_space<vmem>>, vector<1x32x128xf32>
    %286 = vector.shape_cast %285 : vector<1x32x128xf32> to vector<32x128xf32>
    %cst_208 = arith.constant dense<0.000000e+00> : vector<16x128xf32>
    %287 = tpu.matmul %284, %286, %cst_208 {dimension_numbers = #tpu.dot_dimension_numbers<[1], [0], [0], [1], [0, 0, 1, 1], [], []>} : vector<16x32xf32>, vector<32x128xf32>, vector<16x128xf32> -> vector<16x128xf32>
    %c0_209 = arith.constant 0 : index
    %c0_210 = arith.constant 0 : index
    %c0_211 = arith.constant 0 : index
    %288 = vector.load %arg14[%c0_209, %c0_210, %c0_211] : memref<3x1x128xf32, #tpu.memory_space<vmem>>, vector<1x1x128xf32>
    %289 = vector.shape_cast %288 : vector<1x1x128xf32> to vector<1x128xf32>
    %290 = vector.broadcast %289 : vector<1x128xf32> to vector<16x128xf32>
    %291 = arith.addf %287, %290 : vector<16x128xf32>
    %cst_212 = arith.constant 0.000000e+00 : f32
    %292 = vector.broadcast %cst_212 : f32 to vector<16x128xf32>
    %293 = arith.maximumf %291, %292 : vector<16x128xf32>
    %c0_213 = arith.constant 0 : index
    %c0_214 = arith.constant 0 : index
    %c0_215 = arith.constant 0 : index
    %294 = vector.load %arg15[%c0_213, %c0_214, %c0_215] : memref<3x128x32xf32, #tpu.memory_space<vmem>>, vector<1x128x32xf32>
    %295 = vector.shape_cast %294 : vector<1x128x32xf32> to vector<128x32xf32>
    %cst_216 = arith.constant dense<0.000000e+00> : vector<16x32xf32>
    %296 = tpu.matmul %293, %295, %cst_216 {dimension_numbers = #tpu.dot_dimension_numbers<[1], [0], [0], [1], [0, 0, 1, 1], [], []>} : vector<16x128xf32>, vector<128x32xf32>, vector<16x32xf32> -> vector<16x32xf32>
    %c0_217 = arith.constant 0 : index
    %c0_218 = arith.constant 0 : index
    %c0_219 = arith.constant 0 : index
    %297 = vector.load %arg16[%c0_217, %c0_218, %c0_219] : memref<3x1x32xf32, #tpu.memory_space<vmem>>, vector<1x1x32xf32>
    %298 = vector.shape_cast %297 : vector<1x1x32xf32> to vector<1x32xf32>
    %299 = vector.broadcast %298 : vector<1x32xf32> to vector<16x32xf32>
    %300 = arith.addf %296, %299 : vector<16x32xf32>
    %301 = arith.addf %300, %284 : vector<16x32xf32>
    %c0_220 = arith.constant 0 : index
    %c0_221 = arith.constant 0 : index
    %c0_222 = arith.constant 0 : index
    %302 = vector.load %arg17[%c0_220, %c0_221, %c0_222] : memref<3x1x32xf32, #tpu.memory_space<vmem>>, vector<1x1x32xf32>
    %303 = vector.shape_cast %302 : vector<1x1x32xf32> to vector<1x32xf32>
    %c0_223 = arith.constant 0 : index
    %c0_224 = arith.constant 0 : index
    %c0_225 = arith.constant 0 : index
    %304 = vector.load %arg18[%c0_223, %c0_224, %c0_225] : memref<3x1x32xf32, #tpu.memory_space<vmem>>, vector<1x1x32xf32>
    %305 = vector.shape_cast %304 : vector<1x1x32xf32> to vector<1x32xf32>
    %cst_226 = arith.constant dense<0.000000e+00> : vector<16xf32>
    %306 = vector.multi_reduction <add>, %301, %cst_226 [1] : vector<16x32xf32> to vector<16xf32>
    %307 = vector.shape_cast %306 : vector<16xf32> to vector<16x1xf32>
    %cst_227 = arith.constant 3.200000e+01 : f32
    %308 = vector.broadcast %cst_227 : f32 to vector<16x1xf32>
    %309 = arith.divf %307, %308 : vector<16x1xf32>
    %310 = vector.broadcast %309 : vector<16x1xf32> to vector<16x32xf32>
    %311 = arith.subf %301, %310 : vector<16x32xf32>
    %312 = arith.mulf %311, %311 : vector<16x32xf32>
    %cst_228 = arith.constant dense<0.000000e+00> : vector<16xf32>
    %313 = vector.multi_reduction <add>, %312, %cst_228 [1] : vector<16x32xf32> to vector<16xf32>
    %314 = vector.shape_cast %313 : vector<16xf32> to vector<16x1xf32>
    %cst_229 = arith.constant 3.200000e+01 : f32
    %315 = vector.broadcast %cst_229 : f32 to vector<16x1xf32>
    %316 = arith.divf %314, %315 : vector<16x1xf32>
    %317 = vector.broadcast %309 : vector<16x1xf32> to vector<16x32xf32>
    %318 = arith.subf %301, %317 : vector<16x32xf32>
    %cst_230 = arith.constant 9.99999974E-6 : f32
    %319 = vector.broadcast %cst_230 : f32 to vector<16x1xf32>
    %320 = arith.addf %316, %319 : vector<16x1xf32>
    %321 = math.rsqrt %320 : vector<16x1xf32>
    %322 = vector.broadcast %321 : vector<16x1xf32> to vector<16x32xf32>
    %323 = arith.mulf %318, %322 : vector<16x32xf32>
    %324 = vector.broadcast %303 : vector<1x32xf32> to vector<16x32xf32>
    %325 = arith.mulf %323, %324 : vector<16x32xf32>
    %326 = vector.broadcast %305 : vector<1x32xf32> to vector<16x32xf32>
    %327 = arith.addf %325, %326 : vector<16x32xf32>
    %c1_231 = arith.constant 1 : index
    %c0_232 = arith.constant 0 : index
    %c0_233 = arith.constant 0 : index
    %328 = vector.load %arg8[%c1_231, %c0_232, %c0_233] : memref<3x32x32xf32, #tpu.memory_space<vmem>>, vector<1x32x32xf32>
    %329 = vector.shape_cast %328 : vector<1x32x32xf32> to vector<32x32xf32>
    %cst_234 = arith.constant dense<0.000000e+00> : vector<16x32xf32>
    %330 = tpu.matmul %327, %329, %cst_234 {dimension_numbers = #tpu.dot_dimension_numbers<[1], [0], [0], [1], [0, 0, 1, 1], [], []>} : vector<16x32xf32>, vector<32x32xf32>, vector<16x32xf32> -> vector<16x32xf32>
    %c1_235 = arith.constant 1 : index
    %c0_236 = arith.constant 0 : index
    %c0_237 = arith.constant 0 : index
    %331 = vector.load %arg10[%c1_235, %c0_236, %c0_237] : memref<3x1x32xf32, #tpu.memory_space<vmem>>, vector<1x1x32xf32>
    %332 = vector.shape_cast %331 : vector<1x1x32xf32> to vector<1x32xf32>
    %333 = vector.broadcast %332 : vector<1x32xf32> to vector<16x32xf32>
    %334 = arith.addf %330, %333 : vector<16x32xf32>
    %c12_238 = arith.constant 12 : index
    %c0_239 = arith.constant 0 : index
    %c0_240 = arith.constant 0 : index
    %335 = vector.load %arg7[%c12_238, %c0_239, %c0_240] : memref<36x32x8xf32, #tpu.memory_space<vmem>>, vector<1x32x8xf32>
    %336 = vector.shape_cast %335 : vector<1x32x8xf32> to vector<32x8xf32>
    %cst_241 = arith.constant dense<0.000000e+00> : vector<16x8xf32>
    %337 = tpu.matmul %327, %336, %cst_241 {dimension_numbers = #tpu.dot_dimension_numbers<[1], [0], [0], [1], [0, 0, 1, 1], [], []>} : vector<16x32xf32>, vector<32x8xf32>, vector<16x8xf32> -> vector<16x8xf32>
    %338 = vector.shape_cast %337 : vector<16x8xf32> to vector<2x8x8xf32>
    %c13_242 = arith.constant 13 : index
    %c0_243 = arith.constant 0 : index
    %c0_244 = arith.constant 0 : index
    %339 = vector.load %arg7[%c13_242, %c0_243, %c0_244] : memref<36x32x8xf32, #tpu.memory_space<vmem>>, vector<1x32x8xf32>
    %340 = vector.shape_cast %339 : vector<1x32x8xf32> to vector<32x8xf32>
    %cst_245 = arith.constant dense<0.000000e+00> : vector<16x8xf32>
    %341 = tpu.matmul %327, %340, %cst_245 {dimension_numbers = #tpu.dot_dimension_numbers<[1], [0], [0], [1], [0, 0, 1, 1], [], []>} : vector<16x32xf32>, vector<32x8xf32>, vector<16x8xf32> -> vector<16x8xf32>
    %342 = vector.shape_cast %341 : vector<16x8xf32> to vector<2x8x8xf32>
    %c14_246 = arith.constant 14 : index
    %c0_247 = arith.constant 0 : index
    %c0_248 = arith.constant 0 : index
    %343 = vector.load %arg7[%c14_246, %c0_247, %c0_248] : memref<36x32x8xf32, #tpu.memory_space<vmem>>, vector<1x32x8xf32>
    %344 = vector.shape_cast %343 : vector<1x32x8xf32> to vector<32x8xf32>
    %cst_249 = arith.constant dense<0.000000e+00> : vector<16x8xf32>
    %345 = tpu.matmul %327, %344, %cst_249 {dimension_numbers = #tpu.dot_dimension_numbers<[1], [0], [0], [1], [0, 0, 1, 1], [], []>} : vector<16x32xf32>, vector<32x8xf32>, vector<16x8xf32> -> vector<16x8xf32>
    %346 = vector.shape_cast %345 : vector<16x8xf32> to vector<2x8x8xf32>
    "tpu.trace_start"() <{level = 10 : i32, message = "bqd,bkd->bqk"}> : () -> ()
    %cst_250 = arith.constant dense<0.000000e+00> : vector<2x8x8xf32>
    %347 = tpu.matmul %338, %342, %cst_250 {dimension_numbers = #tpu.dot_dimension_numbers<[2], [2], [1], [1], [0, 0, 0, 1, 1, 1], [0], [0]>} : vector<2x8x8xf32>, vector<2x8x8xf32>, vector<2x8x8xf32> -> vector<2x8x8xf32>
    "tpu.trace_stop"() : () -> ()
    %cst_251 = arith.constant dense<0xFF800000> : vector<2x8xf32>
    %348 = vector.multi_reduction <maximumf>, %347, %cst_251 [2] : vector<2x8x8xf32> to vector<2x8xf32>
    %349 = vector.shape_cast %348 : vector<2x8xf32> to vector<2x8x1xf32>
    %350 = vector.broadcast %349 : vector<2x8x1xf32> to vector<2x8x8xf32>
    %351 = arith.subf %347, %350 : vector<2x8x8xf32>
    %352 = math.exp %351 : vector<2x8x8xf32>
    %cst_252 = arith.constant dense<0.000000e+00> : vector<2x8xf32>
    %353 = vector.multi_reduction <add>, %352, %cst_252 [2] : vector<2x8x8xf32> to vector<2x8xf32>
    %354 = vector.shape_cast %353 : vector<2x8xf32> to vector<2x8x1xf32>
    %355 = vector.broadcast %354 : vector<2x8x1xf32> to vector<2x8x8xf32>
    %356 = arith.divf %352, %355 : vector<2x8x8xf32>
    %c4_253 = arith.constant 4 : index
    %c0_254 = arith.constant 0 : index
    %c0_255 = arith.constant 0 : index
    %c0_256 = arith.constant 0 : index
    %357 = vector.load %arg20[%c4_253, %c0_254, %c0_255, %c0_256] : memref<12x2x8x8xf32, #tpu.memory_space<vmem>>, vector<1x2x8x8xf32>
    %358 = vector.shape_cast %357 : vector<1x2x8x8xf32> to vector<2x8x8xf32>
    %359 = vector.shape_cast %356 : vector<2x8x8xf32> to vector<1x2x8x8xf32>
    tpu.vector_store %arg20[%c4_253, %c0_254, %c0_255, %c0_256], %359 {strides = array<i32>} : memref<12x2x8x8xf32, #tpu.memory_space<vmem>>, vector<1x2x8x8xf32>,
    "tpu.trace_start"() <{level = 10 : i32, message = "bqk,bkd->bqd"}> : () -> ()
    %cst_257 = arith.constant dense<0.000000e+00> : vector<2x8x8xf32>
    %360 = tpu.matmul %356, %346, %cst_257 {dimension_numbers = #tpu.dot_dimension_numbers<[2], [1], [1], [2], [0, 0, 0, 1, 1, 2], [0], [0]>} : vector<2x8x8xf32>, vector<2x8x8xf32>, vector<2x8x8xf32> -> vector<2x8x8xf32>
    "tpu.trace_stop"() : () -> ()
    %361 = vector.shape_cast %360 : vector<2x8x8xf32> to vector<16x8xf32>
    %c4_258 = arith.constant 4 : index
    %c0_259 = arith.constant 0 : index
    %c0_260 = arith.constant 0 : index
    %362 = vector.load %arg9[%c4_258, %c0_259, %c0_260] : memref<12x8x32xf32, #tpu.memory_space<vmem>>, vector<1x8x32xf32>
    %363 = vector.shape_cast %362 : vector<1x8x32xf32> to vector<8x32xf32>
    %cst_261 = arith.constant dense<0.000000e+00> : vector<16x32xf32>
    %364 = tpu.matmul %361, %363, %cst_261 {dimension_numbers = #tpu.dot_dimension_numbers<[1], [0], [0], [1], [0, 0, 1, 1], [], []>} : vector<16x8xf32>, vector<8x32xf32>, vector<16x32xf32> -> vector<16x32xf32>
    %365 = arith.addf %334, %364 : vector<16x32xf32>
    %c15 = arith.constant 15 : index
    %c0_262 = arith.constant 0 : index
    %c0_263 = arith.constant 0 : index
    %366 = vector.load %arg7[%c15, %c0_262, %c0_263] : memref<36x32x8xf32, #tpu.memory_space<vmem>>, vector<1x32x8xf32>
    %367 = vector.shape_cast %366 : vector<1x32x8xf32> to vector<32x8xf32>
    %cst_264 = arith.constant dense<0.000000e+00> : vector<16x8xf32>
    %368 = tpu.matmul %327, %367, %cst_264 {dimension_numbers = #tpu.dot_dimension_numbers<[1], [0], [0], [1], [0, 0, 1, 1], [], []>} : vector<16x32xf32>, vector<32x8xf32>, vector<16x8xf32> -> vector<16x8xf32>
    %369 = vector.shape_cast %368 : vector<16x8xf32> to vector<2x8x8xf32>
    %c16 = arith.constant 16 : index
    %c0_265 = arith.constant 0 : index
    %c0_266 = arith.constant 0 : index
    %370 = vector.load %arg7[%c16, %c0_265, %c0_266] : memref<36x32x8xf32, #tpu.memory_space<vmem>>, vector<1x32x8xf32>
    %371 = vector.shape_cast %370 : vector<1x32x8xf32> to vector<32x8xf32>
    %cst_267 = arith.constant dense<0.000000e+00> : vector<16x8xf32>
    %372 = tpu.matmul %327, %371, %cst_267 {dimension_numbers = #tpu.dot_dimension_numbers<[1], [0], [0], [1], [0, 0, 1, 1], [], []>} : vector<16x32xf32>, vector<32x8xf32>, vector<16x8xf32> -> vector<16x8xf32>
    %373 = vector.shape_cast %372 : vector<16x8xf32> to vector<2x8x8xf32>
    %c17 = arith.constant 17 : index
    %c0_268 = arith.constant 0 : index
    %c0_269 = arith.constant 0 : index
    %374 = vector.load %arg7[%c17, %c0_268, %c0_269] : memref<36x32x8xf32, #tpu.memory_space<vmem>>, vector<1x32x8xf32>
    %375 = vector.shape_cast %374 : vector<1x32x8xf32> to vector<32x8xf32>
    %cst_270 = arith.constant dense<0.000000e+00> : vector<16x8xf32>
    %376 = tpu.matmul %327, %375, %cst_270 {dimension_numbers = #tpu.dot_dimension_numbers<[1], [0], [0], [1], [0, 0, 1, 1], [], []>} : vector<16x32xf32>, vector<32x8xf32>, vector<16x8xf32> -> vector<16x8xf32>
    %377 = vector.shape_cast %376 : vector<16x8xf32> to vector<2x8x8xf32>
    "tpu.trace_start"() <{level = 10 : i32, message = "bqd,bkd->bqk"}> : () -> ()
    %cst_271 = arith.constant dense<0.000000e+00> : vector<2x8x8xf32>
    %378 = tpu.matmul %369, %373, %cst_271 {dimension_numbers = #tpu.dot_dimension_numbers<[2], [2], [1], [1], [0, 0, 0, 1, 1, 1], [0], [0]>} : vector<2x8x8xf32>, vector<2x8x8xf32>, vector<2x8x8xf32> -> vector<2x8x8xf32>
    "tpu.trace_stop"() : () -> ()
    %cst_272 = arith.constant dense<0xFF800000> : vector<2x8xf32>
    %379 = vector.multi_reduction <maximumf>, %378, %cst_272 [2] : vector<2x8x8xf32> to vector<2x8xf32>
    %380 = vector.shape_cast %379 : vector<2x8xf32> to vector<2x8x1xf32>
    %381 = vector.broadcast %380 : vector<2x8x1xf32> to vector<2x8x8xf32>
    %382 = arith.subf %378, %381 : vector<2x8x8xf32>
    %383 = math.exp %382 : vector<2x8x8xf32>
    %cst_273 = arith.constant dense<0.000000e+00> : vector<2x8xf32>
    %384 = vector.multi_reduction <add>, %383, %cst_273 [2] : vector<2x8x8xf32> to vector<2x8xf32>
    %385 = vector.shape_cast %384 : vector<2x8xf32> to vector<2x8x1xf32>
    %386 = vector.broadcast %385 : vector<2x8x1xf32> to vector<2x8x8xf32>
    %387 = arith.divf %383, %386 : vector<2x8x8xf32>
    %c5_274 = arith.constant 5 : index
    %c0_275 = arith.constant 0 : index
    %c0_276 = arith.constant 0 : index
    %c0_277 = arith.constant 0 : index
    %388 = vector.load %arg20[%c5_274, %c0_275, %c0_276, %c0_277] : memref<12x2x8x8xf32, #tpu.memory_space<vmem>>, vector<1x2x8x8xf32>
    %389 = vector.shape_cast %388 : vector<1x2x8x8xf32> to vector<2x8x8xf32>
    %390 = vector.shape_cast %387 : vector<2x8x8xf32> to vector<1x2x8x8xf32>
    tpu.vector_store %arg20[%c5_274, %c0_275, %c0_276, %c0_277], %390 {strides = array<i32>} : memref<12x2x8x8xf32, #tpu.memory_space<vmem>>, vector<1x2x8x8xf32>,
    "tpu.trace_start"() <{level = 10 : i32, message = "bqk,bkd->bqd"}> : () -> ()
    %cst_278 = arith.constant dense<0.000000e+00> : vector<2x8x8xf32>
    %391 = tpu.matmul %387, %377, %cst_278 {dimension_numbers = #tpu.dot_dimension_numbers<[2], [1], [1], [2], [0, 0, 0, 1, 1, 2], [0], [0]>} : vector<2x8x8xf32>, vector<2x8x8xf32>, vector<2x8x8xf32> -> vector<2x8x8xf32>
    "tpu.trace_stop"() : () -> ()
    %392 = vector.shape_cast %391 : vector<2x8x8xf32> to vector<16x8xf32>
    %c5_279 = arith.constant 5 : index
    %c0_280 = arith.constant 0 : index
    %c0_281 = arith.constant 0 : index
    %393 = vector.load %arg9[%c5_279, %c0_280, %c0_281] : memref<12x8x32xf32, #tpu.memory_space<vmem>>, vector<1x8x32xf32>
    %394 = vector.shape_cast %393 : vector<1x8x32xf32> to vector<8x32xf32>
    %cst_282 = arith.constant dense<0.000000e+00> : vector<16x32xf32>
    %395 = tpu.matmul %392, %394, %cst_282 {dimension_numbers = #tpu.dot_dimension_numbers<[1], [0], [0], [1], [0, 0, 1, 1], [], []>} : vector<16x8xf32>, vector<8x32xf32>, vector<16x32xf32> -> vector<16x32xf32>
    %396 = arith.addf %365, %395 : vector<16x32xf32>
    %c18 = arith.constant 18 : index
    %c0_283 = arith.constant 0 : index
    %c0_284 = arith.constant 0 : index
    %397 = vector.load %arg7[%c18, %c0_283, %c0_284] : memref<36x32x8xf32, #tpu.memory_space<vmem>>, vector<1x32x8xf32>
    %398 = vector.shape_cast %397 : vector<1x32x8xf32> to vector<32x8xf32>
    %cst_285 = arith.constant dense<0.000000e+00> : vector<16x8xf32>
    %399 = tpu.matmul %327, %398, %cst_285 {dimension_numbers = #tpu.dot_dimension_numbers<[1], [0], [0], [1], [0, 0, 1, 1], [], []>} : vector<16x32xf32>, vector<32x8xf32>, vector<16x8xf32> -> vector<16x8xf32>
    %400 = vector.shape_cast %399 : vector<16x8xf32> to vector<2x8x8xf32>
    %c19 = arith.constant 19 : index
    %c0_286 = arith.constant 0 : index
    %c0_287 = arith.constant 0 : index
    %401 = vector.load %arg7[%c19, %c0_286, %c0_287] : memref<36x32x8xf32, #tpu.memory_space<vmem>>, vector<1x32x8xf32>
    %402 = vector.shape_cast %401 : vector<1x32x8xf32> to vector<32x8xf32>
    %cst_288 = arith.constant dense<0.000000e+00> : vector<16x8xf32>
    %403 = tpu.matmul %327, %402, %cst_288 {dimension_numbers = #tpu.dot_dimension_numbers<[1], [0], [0], [1], [0, 0, 1, 1], [], []>} : vector<16x32xf32>, vector<32x8xf32>, vector<16x8xf32> -> vector<16x8xf32>
    %404 = vector.shape_cast %403 : vector<16x8xf32> to vector<2x8x8xf32>
    %c20 = arith.constant 20 : index
    %c0_289 = arith.constant 0 : index
    %c0_290 = arith.constant 0 : index
    %405 = vector.load %arg7[%c20, %c0_289, %c0_290] : memref<36x32x8xf32, #tpu.memory_space<vmem>>, vector<1x32x8xf32>
    %406 = vector.shape_cast %405 : vector<1x32x8xf32> to vector<32x8xf32>
    %cst_291 = arith.constant dense<0.000000e+00> : vector<16x8xf32>
    %407 = tpu.matmul %327, %406, %cst_291 {dimension_numbers = #tpu.dot_dimension_numbers<[1], [0], [0], [1], [0, 0, 1, 1], [], []>} : vector<16x32xf32>, vector<32x8xf32>, vector<16x8xf32> -> vector<16x8xf32>
    %408 = vector.shape_cast %407 : vector<16x8xf32> to vector<2x8x8xf32>
    "tpu.trace_start"() <{level = 10 : i32, message = "bqd,bkd->bqk"}> : () -> ()
    %cst_292 = arith.constant dense<0.000000e+00> : vector<2x8x8xf32>
    %409 = tpu.matmul %400, %404, %cst_292 {dimension_numbers = #tpu.dot_dimension_numbers<[2], [2], [1], [1], [0, 0, 0, 1, 1, 1], [0], [0]>} : vector<2x8x8xf32>, vector<2x8x8xf32>, vector<2x8x8xf32> -> vector<2x8x8xf32>
    "tpu.trace_stop"() : () -> ()
    %cst_293 = arith.constant dense<0xFF800000> : vector<2x8xf32>
    %410 = vector.multi_reduction <maximumf>, %409, %cst_293 [2] : vector<2x8x8xf32> to vector<2x8xf32>
    %411 = vector.shape_cast %410 : vector<2x8xf32> to vector<2x8x1xf32>
    %412 = vector.broadcast %411 : vector<2x8x1xf32> to vector<2x8x8xf32>
    %413 = arith.subf %409, %412 : vector<2x8x8xf32>
    %414 = math.exp %413 : vector<2x8x8xf32>
    %cst_294 = arith.constant dense<0.000000e+00> : vector<2x8xf32>
    %415 = vector.multi_reduction <add>, %414, %cst_294 [2] : vector<2x8x8xf32> to vector<2x8xf32>
    %416 = vector.shape_cast %415 : vector<2x8xf32> to vector<2x8x1xf32>
    %417 = vector.broadcast %416 : vector<2x8x1xf32> to vector<2x8x8xf32>
    %418 = arith.divf %414, %417 : vector<2x8x8xf32>
    %c6_295 = arith.constant 6 : index
    %c0_296 = arith.constant 0 : index
    %c0_297 = arith.constant 0 : index
    %c0_298 = arith.constant 0 : index
    %419 = vector.load %arg20[%c6_295, %c0_296, %c0_297, %c0_298] : memref<12x2x8x8xf32, #tpu.memory_space<vmem>>, vector<1x2x8x8xf32>
    %420 = vector.shape_cast %419 : vector<1x2x8x8xf32> to vector<2x8x8xf32>
    %421 = vector.shape_cast %418 : vector<2x8x8xf32> to vector<1x2x8x8xf32>
    tpu.vector_store %arg20[%c6_295, %c0_296, %c0_297, %c0_298], %421 {strides = array<i32>} : memref<12x2x8x8xf32, #tpu.memory_space<vmem>>, vector<1x2x8x8xf32>,
    "tpu.trace_start"() <{level = 10 : i32, message = "bqk,bkd->bqd"}> : () -> ()
    %cst_299 = arith.constant dense<0.000000e+00> : vector<2x8x8xf32>
    %422 = tpu.matmul %418, %408, %cst_299 {dimension_numbers = #tpu.dot_dimension_numbers<[2], [1], [1], [2], [0, 0, 0, 1, 1, 2], [0], [0]>} : vector<2x8x8xf32>, vector<2x8x8xf32>, vector<2x8x8xf32> -> vector<2x8x8xf32>
    "tpu.trace_stop"() : () -> ()
    %423 = vector.shape_cast %422 : vector<2x8x8xf32> to vector<16x8xf32>
    %c6_300 = arith.constant 6 : index
    %c0_301 = arith.constant 0 : index
    %c0_302 = arith.constant 0 : index
    %424 = vector.load %arg9[%c6_300, %c0_301, %c0_302] : memref<12x8x32xf32, #tpu.memory_space<vmem>>, vector<1x8x32xf32>
    %425 = vector.shape_cast %424 : vector<1x8x32xf32> to vector<8x32xf32>
    %cst_303 = arith.constant dense<0.000000e+00> : vector<16x32xf32>
    %426 = tpu.matmul %423, %425, %cst_303 {dimension_numbers = #tpu.dot_dimension_numbers<[1], [0], [0], [1], [0, 0, 1, 1], [], []>} : vector<16x8xf32>, vector<8x32xf32>, vector<16x32xf32> -> vector<16x32xf32>
    %427 = arith.addf %396, %426 : vector<16x32xf32>
    %c21 = arith.constant 21 : index
    %c0_304 = arith.constant 0 : index
    %c0_305 = arith.constant 0 : index
    %428 = vector.load %arg7[%c21, %c0_304, %c0_305] : memref<36x32x8xf32, #tpu.memory_space<vmem>>, vector<1x32x8xf32>
    %429 = vector.shape_cast %428 : vector<1x32x8xf32> to vector<32x8xf32>
    %cst_306 = arith.constant dense<0.000000e+00> : vector<16x8xf32>
    %430 = tpu.matmul %327, %429, %cst_306 {dimension_numbers = #tpu.dot_dimension_numbers<[1], [0], [0], [1], [0, 0, 1, 1], [], []>} : vector<16x32xf32>, vector<32x8xf32>, vector<16x8xf32> -> vector<16x8xf32>
    %431 = vector.shape_cast %430 : vector<16x8xf32> to vector<2x8x8xf32>
    %c22 = arith.constant 22 : index
    %c0_307 = arith.constant 0 : index
    %c0_308 = arith.constant 0 : index
    %432 = vector.load %arg7[%c22, %c0_307, %c0_308] : memref<36x32x8xf32, #tpu.memory_space<vmem>>, vector<1x32x8xf32>
    %433 = vector.shape_cast %432 : vector<1x32x8xf32> to vector<32x8xf32>
    %cst_309 = arith.constant dense<0.000000e+00> : vector<16x8xf32>
    %434 = tpu.matmul %327, %433, %cst_309 {dimension_numbers = #tpu.dot_dimension_numbers<[1], [0], [0], [1], [0, 0, 1, 1], [], []>} : vector<16x32xf32>, vector<32x8xf32>, vector<16x8xf32> -> vector<16x8xf32>
    %435 = vector.shape_cast %434 : vector<16x8xf32> to vector<2x8x8xf32>
    %c23 = arith.constant 23 : index
    %c0_310 = arith.constant 0 : index
    %c0_311 = arith.constant 0 : index
    %436 = vector.load %arg7[%c23, %c0_310, %c0_311] : memref<36x32x8xf32, #tpu.memory_space<vmem>>, vector<1x32x8xf32>
    %437 = vector.shape_cast %436 : vector<1x32x8xf32> to vector<32x8xf32>
    %cst_312 = arith.constant dense<0.000000e+00> : vector<16x8xf32>
    %438 = tpu.matmul %327, %437, %cst_312 {dimension_numbers = #tpu.dot_dimension_numbers<[1], [0], [0], [1], [0, 0, 1, 1], [], []>} : vector<16x32xf32>, vector<32x8xf32>, vector<16x8xf32> -> vector<16x8xf32>
    %439 = vector.shape_cast %438 : vector<16x8xf32> to vector<2x8x8xf32>
    "tpu.trace_start"() <{level = 10 : i32, message = "bqd,bkd->bqk"}> : () -> ()
    %cst_313 = arith.constant dense<0.000000e+00> : vector<2x8x8xf32>
    %440 = tpu.matmul %431, %435, %cst_313 {dimension_numbers = #tpu.dot_dimension_numbers<[2], [2], [1], [1], [0, 0, 0, 1, 1, 1], [0], [0]>} : vector<2x8x8xf32>, vector<2x8x8xf32>, vector<2x8x8xf32> -> vector<2x8x8xf32>
    "tpu.trace_stop"() : () -> ()
    %cst_314 = arith.constant dense<0xFF800000> : vector<2x8xf32>
    %441 = vector.multi_reduction <maximumf>, %440, %cst_314 [2] : vector<2x8x8xf32> to vector<2x8xf32>
    %442 = vector.shape_cast %441 : vector<2x8xf32> to vector<2x8x1xf32>
    %443 = vector.broadcast %442 : vector<2x8x1xf32> to vector<2x8x8xf32>
    %444 = arith.subf %440, %443 : vector<2x8x8xf32>
    %445 = math.exp %444 : vector<2x8x8xf32>
    %cst_315 = arith.constant dense<0.000000e+00> : vector<2x8xf32>
    %446 = vector.multi_reduction <add>, %445, %cst_315 [2] : vector<2x8x8xf32> to vector<2x8xf32>
    %447 = vector.shape_cast %446 : vector<2x8xf32> to vector<2x8x1xf32>
    %448 = vector.broadcast %447 : vector<2x8x1xf32> to vector<2x8x8xf32>
    %449 = arith.divf %445, %448 : vector<2x8x8xf32>
    %c7_316 = arith.constant 7 : index
    %c0_317 = arith.constant 0 : index
    %c0_318 = arith.constant 0 : index
    %c0_319 = arith.constant 0 : index
    %450 = vector.load %arg20[%c7_316, %c0_317, %c0_318, %c0_319] : memref<12x2x8x8xf32, #tpu.memory_space<vmem>>, vector<1x2x8x8xf32>
    %451 = vector.shape_cast %450 : vector<1x2x8x8xf32> to vector<2x8x8xf32>
    %452 = vector.shape_cast %449 : vector<2x8x8xf32> to vector<1x2x8x8xf32>
    tpu.vector_store %arg20[%c7_316, %c0_317, %c0_318, %c0_319], %452 {strides = array<i32>} : memref<12x2x8x8xf32, #tpu.memory_space<vmem>>, vector<1x2x8x8xf32>,
    "tpu.trace_start"() <{level = 10 : i32, message = "bqk,bkd->bqd"}> : () -> ()
    %cst_320 = arith.constant dense<0.000000e+00> : vector<2x8x8xf32>
    %453 = tpu.matmul %449, %439, %cst_320 {dimension_numbers = #tpu.dot_dimension_numbers<[2], [1], [1], [2], [0, 0, 0, 1, 1, 2], [0], [0]>} : vector<2x8x8xf32>, vector<2x8x8xf32>, vector<2x8x8xf32> -> vector<2x8x8xf32>
    "tpu.trace_stop"() : () -> ()
    %454 = vector.shape_cast %453 : vector<2x8x8xf32> to vector<16x8xf32>
    %c7_321 = arith.constant 7 : index
    %c0_322 = arith.constant 0 : index
    %c0_323 = arith.constant 0 : index
    %455 = vector.load %arg9[%c7_321, %c0_322, %c0_323] : memref<12x8x32xf32, #tpu.memory_space<vmem>>, vector<1x8x32xf32>
    %456 = vector.shape_cast %455 : vector<1x8x32xf32> to vector<8x32xf32>
    %cst_324 = arith.constant dense<0.000000e+00> : vector<16x32xf32>
    %457 = tpu.matmul %454, %456, %cst_324 {dimension_numbers = #tpu.dot_dimension_numbers<[1], [0], [0], [1], [0, 0, 1, 1], [], []>} : vector<16x8xf32>, vector<8x32xf32>, vector<16x32xf32> -> vector<16x32xf32>
    %458 = arith.addf %427, %457 : vector<16x32xf32>
    %459 = arith.addf %458, %327 : vector<16x32xf32>
    %c1_325 = arith.constant 1 : index
    %c0_326 = arith.constant 0 : index
    %c0_327 = arith.constant 0 : index
    %460 = vector.load %arg11[%c1_325, %c0_326, %c0_327] : memref<3x1x32xf32, #tpu.memory_space<vmem>>, vector<1x1x32xf32>
    %461 = vector.shape_cast %460 : vector<1x1x32xf32> to vector<1x32xf32>
    %c1_328 = arith.constant 1 : index
    %c0_329 = arith.constant 0 : index
    %c0_330 = arith.constant 0 : index
    %462 = vector.load %arg12[%c1_328, %c0_329, %c0_330] : memref<3x1x32xf32, #tpu.memory_space<vmem>>, vector<1x1x32xf32>
    %463 = vector.shape_cast %462 : vector<1x1x32xf32> to vector<1x32xf32>
    %cst_331 = arith.constant dense<0.000000e+00> : vector<16xf32>
    %464 = vector.multi_reduction <add>, %459, %cst_331 [1] : vector<16x32xf32> to vector<16xf32>
    %465 = vector.shape_cast %464 : vector<16xf32> to vector<16x1xf32>
    %cst_332 = arith.constant 3.200000e+01 : f32
    %466 = vector.broadcast %cst_332 : f32 to vector<16x1xf32>
    %467 = arith.divf %465, %466 : vector<16x1xf32>
    %468 = vector.broadcast %467 : vector<16x1xf32> to vector<16x32xf32>
    %469 = arith.subf %459, %468 : vector<16x32xf32>
    %470 = arith.mulf %469, %469 : vector<16x32xf32>
    %cst_333 = arith.constant dense<0.000000e+00> : vector<16xf32>
    %471 = vector.multi_reduction <add>, %470, %cst_333 [1] : vector<16x32xf32> to vector<16xf32>
    %472 = vector.shape_cast %471 : vector<16xf32> to vector<16x1xf32>
    %cst_334 = arith.constant 3.200000e+01 : f32
    %473 = vector.broadcast %cst_334 : f32 to vector<16x1xf32>
    %474 = arith.divf %472, %473 : vector<16x1xf32>
    %475 = vector.broadcast %467 : vector<16x1xf32> to vector<16x32xf32>
    %476 = arith.subf %459, %475 : vector<16x32xf32>
    %cst_335 = arith.constant 9.99999974E-6 : f32
    %477 = vector.broadcast %cst_335 : f32 to vector<16x1xf32>
    %478 = arith.addf %474, %477 : vector<16x1xf32>
    %479 = math.rsqrt %478 : vector<16x1xf32>
    %480 = vector.broadcast %479 : vector<16x1xf32> to vector<16x32xf32>
    %481 = arith.mulf %476, %480 : vector<16x32xf32>
    %482 = vector.broadcast %461 : vector<1x32xf32> to vector<16x32xf32>
    %483 = arith.mulf %481, %482 : vector<16x32xf32>
    %484 = vector.broadcast %463 : vector<1x32xf32> to vector<16x32xf32>
    %485 = arith.addf %483, %484 : vector<16x32xf32>
    %c1_336 = arith.constant 1 : index
    %c0_337 = arith.constant 0 : index
    %c0_338 = arith.constant 0 : index
    %486 = vector.load %arg13[%c1_336, %c0_337, %c0_338] : memref<3x32x128xf32, #tpu.memory_space<vmem>>, vector<1x32x128xf32>
    %487 = vector.shape_cast %486 : vector<1x32x128xf32> to vector<32x128xf32>
    %cst_339 = arith.constant dense<0.000000e+00> : vector<16x128xf32>
    %488 = tpu.matmul %485, %487, %cst_339 {dimension_numbers = #tpu.dot_dimension_numbers<[1], [0], [0], [1], [0, 0, 1, 1], [], []>} : vector<16x32xf32>, vector<32x128xf32>, vector<16x128xf32> -> vector<16x128xf32>
    %c1_340 = arith.constant 1 : index
    %c0_341 = arith.constant 0 : index
    %c0_342 = arith.constant 0 : index
    %489 = vector.load %arg14[%c1_340, %c0_341, %c0_342] : memref<3x1x128xf32, #tpu.memory_space<vmem>>, vector<1x1x128xf32>
    %490 = vector.shape_cast %489 : vector<1x1x128xf32> to vector<1x128xf32>
    %491 = vector.broadcast %490 : vector<1x128xf32> to vector<16x128xf32>
    %492 = arith.addf %488, %491 : vector<16x128xf32>
    %cst_343 = arith.constant 0.000000e+00 : f32
    %493 = vector.broadcast %cst_343 : f32 to vector<16x128xf32>
    %494 = arith.maximumf %492, %493 : vector<16x128xf32>
    %c1_344 = arith.constant 1 : index
    %c0_345 = arith.constant 0 : index
    %c0_346 = arith.constant 0 : index
    %495 = vector.load %arg15[%c1_344, %c0_345, %c0_346] : memref<3x128x32xf32, #tpu.memory_space<vmem>>, vector<1x128x32xf32>
    %496 = vector.shape_cast %495 : vector<1x128x32xf32> to vector<128x32xf32>
    %cst_347 = arith.constant dense<0.000000e+00> : vector<16x32xf32>
    %497 = tpu.matmul %494, %496, %cst_347 {dimension_numbers = #tpu.dot_dimension_numbers<[1], [0], [0], [1], [0, 0, 1, 1], [], []>} : vector<16x128xf32>, vector<128x32xf32>, vector<16x32xf32> -> vector<16x32xf32>
    %c1_348 = arith.constant 1 : index
    %c0_349 = arith.constant 0 : index
    %c0_350 = arith.constant 0 : index
    %498 = vector.load %arg16[%c1_348, %c0_349, %c0_350] : memref<3x1x32xf32, #tpu.memory_space<vmem>>, vector<1x1x32xf32>
    %499 = vector.shape_cast %498 : vector<1x1x32xf32> to vector<1x32xf32>
    %500 = vector.broadcast %499 : vector<1x32xf32> to vector<16x32xf32>
    %501 = arith.addf %497, %500 : vector<16x32xf32>
    %502 = arith.addf %501, %485 : vector<16x32xf32>
    %c1_351 = arith.constant 1 : index
    %c0_352 = arith.constant 0 : index
    %c0_353 = arith.constant 0 : index
    %503 = vector.load %arg17[%c1_351, %c0_352, %c0_353] : memref<3x1x32xf32, #tpu.memory_space<vmem>>, vector<1x1x32xf32>
    %504 = vector.shape_cast %503 : vector<1x1x32xf32> to vector<1x32xf32>
    %c1_354 = arith.constant 1 : index
    %c0_355 = arith.constant 0 : index
    %c0_356 = arith.constant 0 : index
    %505 = vector.load %arg18[%c1_354, %c0_355, %c0_356] : memref<3x1x32xf32, #tpu.memory_space<vmem>>, vector<1x1x32xf32>
    %506 = vector.shape_cast %505 : vector<1x1x32xf32> to vector<1x32xf32>
    %cst_357 = arith.constant dense<0.000000e+00> : vector<16xf32>
    %507 = vector.multi_reduction <add>, %502, %cst_357 [1] : vector<16x32xf32> to vector<16xf32>
    %508 = vector.shape_cast %507 : vector<16xf32> to vector<16x1xf32>
    %cst_358 = arith.constant 3.200000e+01 : f32
    %509 = vector.broadcast %cst_358 : f32 to vector<16x1xf32>
    %510 = arith.divf %508, %509 : vector<16x1xf32>
    %511 = vector.broadcast %510 : vector<16x1xf32> to vector<16x32xf32>
    %512 = arith.subf %502, %511 : vector<16x32xf32>
    %513 = arith.mulf %512, %512 : vector<16x32xf32>
    %cst_359 = arith.constant dense<0.000000e+00> : vector<16xf32>
    %514 = vector.multi_reduction <add>, %513, %cst_359 [1] : vector<16x32xf32> to vector<16xf32>
    %515 = vector.shape_cast %514 : vector<16xf32> to vector<16x1xf32>
    %cst_360 = arith.constant 3.200000e+01 : f32
    %516 = vector.broadcast %cst_360 : f32 to vector<16x1xf32>
    %517 = arith.divf %515, %516 : vector<16x1xf32>
    %518 = vector.broadcast %510 : vector<16x1xf32> to vector<16x32xf32>
    %519 = arith.subf %502, %518 : vector<16x32xf32>
    %cst_361 = arith.constant 9.99999974E-6 : f32
    %520 = vector.broadcast %cst_361 : f32 to vector<16x1xf32>
    %521 = arith.addf %517, %520 : vector<16x1xf32>
    %522 = math.rsqrt %521 : vector<16x1xf32>
    %523 = vector.broadcast %522 : vector<16x1xf32> to vector<16x32xf32>
    %524 = arith.mulf %519, %523 : vector<16x32xf32>
    %525 = vector.broadcast %504 : vector<1x32xf32> to vector<16x32xf32>
    %526 = arith.mulf %524, %525 : vector<16x32xf32>
    %527 = vector.broadcast %506 : vector<1x32xf32> to vector<16x32xf32>
    %528 = arith.addf %526, %527 : vector<16x32xf32>
    %c2_362 = arith.constant 2 : index
    %c0_363 = arith.constant 0 : index
    %c0_364 = arith.constant 0 : index
    %529 = vector.load %arg8[%c2_362, %c0_363, %c0_364] : memref<3x32x32xf32, #tpu.memory_space<vmem>>, vector<1x32x32xf32>
    %530 = vector.shape_cast %529 : vector<1x32x32xf32> to vector<32x32xf32>
    %cst_365 = arith.constant dense<0.000000e+00> : vector<16x32xf32>
    %531 = tpu.matmul %528, %530, %cst_365 {dimension_numbers = #tpu.dot_dimension_numbers<[1], [0], [0], [1], [0, 0, 1, 1], [], []>} : vector<16x32xf32>, vector<32x32xf32>, vector<16x32xf32> -> vector<16x32xf32>
    %c2_366 = arith.constant 2 : index
    %c0_367 = arith.constant 0 : index
    %c0_368 = arith.constant 0 : index
    %532 = vector.load %arg10[%c2_366, %c0_367, %c0_368] : memref<3x1x32xf32, #tpu.memory_space<vmem>>, vector<1x1x32xf32>
    %533 = vector.shape_cast %532 : vector<1x1x32xf32> to vector<1x32xf32>
    %534 = vector.broadcast %533 : vector<1x32xf32> to vector<16x32xf32>
    %535 = arith.addf %531, %534 : vector<16x32xf32>
    %c24 = arith.constant 24 : index
    %c0_369 = arith.constant 0 : index
    %c0_370 = arith.constant 0 : index
    %536 = vector.load %arg7[%c24, %c0_369, %c0_370] : memref<36x32x8xf32, #tpu.memory_space<vmem>>, vector<1x32x8xf32>
    %537 = vector.shape_cast %536 : vector<1x32x8xf32> to vector<32x8xf32>
    %cst_371 = arith.constant dense<0.000000e+00> : vector<16x8xf32>
    %538 = tpu.matmul %528, %537, %cst_371 {dimension_numbers = #tpu.dot_dimension_numbers<[1], [0], [0], [1], [0, 0, 1, 1], [], []>} : vector<16x32xf32>, vector<32x8xf32>, vector<16x8xf32> -> vector<16x8xf32>
    %539 = vector.shape_cast %538 : vector<16x8xf32> to vector<2x8x8xf32>
    %c25 = arith.constant 25 : index
    %c0_372 = arith.constant 0 : index
    %c0_373 = arith.constant 0 : index
    %540 = vector.load %arg7[%c25, %c0_372, %c0_373] : memref<36x32x8xf32, #tpu.memory_space<vmem>>, vector<1x32x8xf32>
    %541 = vector.shape_cast %540 : vector<1x32x8xf32> to vector<32x8xf32>
    %cst_374 = arith.constant dense<0.000000e+00> : vector<16x8xf32>
    %542 = tpu.matmul %528, %541, %cst_374 {dimension_numbers = #tpu.dot_dimension_numbers<[1], [0], [0], [1], [0, 0, 1, 1], [], []>} : vector<16x32xf32>, vector<32x8xf32>, vector<16x8xf32> -> vector<16x8xf32>
    %543 = vector.shape_cast %542 : vector<16x8xf32> to vector<2x8x8xf32>
    %c26 = arith.constant 26 : index
    %c0_375 = arith.constant 0 : index
    %c0_376 = arith.constant 0 : index
    %544 = vector.load %arg7[%c26, %c0_375, %c0_376] : memref<36x32x8xf32, #tpu.memory_space<vmem>>, vector<1x32x8xf32>
    %545 = vector.shape_cast %544 : vector<1x32x8xf32> to vector<32x8xf32>
    %cst_377 = arith.constant dense<0.000000e+00> : vector<16x8xf32>
    %546 = tpu.matmul %528, %545, %cst_377 {dimension_numbers = #tpu.dot_dimension_numbers<[1], [0], [0], [1], [0, 0, 1, 1], [], []>} : vector<16x32xf32>, vector<32x8xf32>, vector<16x8xf32> -> vector<16x8xf32>
    %547 = vector.shape_cast %546 : vector<16x8xf32> to vector<2x8x8xf32>
    "tpu.trace_start"() <{level = 10 : i32, message = "bqd,bkd->bqk"}> : () -> ()
    %cst_378 = arith.constant dense<0.000000e+00> : vector<2x8x8xf32>
    %548 = tpu.matmul %539, %543, %cst_378 {dimension_numbers = #tpu.dot_dimension_numbers<[2], [2], [1], [1], [0, 0, 0, 1, 1, 1], [0], [0]>} : vector<2x8x8xf32>, vector<2x8x8xf32>, vector<2x8x8xf32> -> vector<2x8x8xf32>
    "tpu.trace_stop"() : () -> ()
    %cst_379 = arith.constant dense<0xFF800000> : vector<2x8xf32>
    %549 = vector.multi_reduction <maximumf>, %548, %cst_379 [2] : vector<2x8x8xf32> to vector<2x8xf32>
    %550 = vector.shape_cast %549 : vector<2x8xf32> to vector<2x8x1xf32>
    %551 = vector.broadcast %550 : vector<2x8x1xf32> to vector<2x8x8xf32>
    %552 = arith.subf %548, %551 : vector<2x8x8xf32>
    %553 = math.exp %552 : vector<2x8x8xf32>
    %cst_380 = arith.constant dense<0.000000e+00> : vector<2x8xf32>
    %554 = vector.multi_reduction <add>, %553, %cst_380 [2] : vector<2x8x8xf32> to vector<2x8xf32>
    %555 = vector.shape_cast %554 : vector<2x8xf32> to vector<2x8x1xf32>
    %556 = vector.broadcast %555 : vector<2x8x1xf32> to vector<2x8x8xf32>
    %557 = arith.divf %553, %556 : vector<2x8x8xf32>
    %c8_381 = arith.constant 8 : index
    %c0_382 = arith.constant 0 : index
    %c0_383 = arith.constant 0 : index
    %c0_384 = arith.constant 0 : index
    %558 = vector.load %arg20[%c8_381, %c0_382, %c0_383, %c0_384] : memref<12x2x8x8xf32, #tpu.memory_space<vmem>>, vector<1x2x8x8xf32>
    %559 = vector.shape_cast %558 : vector<1x2x8x8xf32> to vector<2x8x8xf32>
    %560 = vector.shape_cast %557 : vector<2x8x8xf32> to vector<1x2x8x8xf32>
    tpu.vector_store %arg20[%c8_381, %c0_382, %c0_383, %c0_384], %560 {strides = array<i32>} : memref<12x2x8x8xf32, #tpu.memory_space<vmem>>, vector<1x2x8x8xf32>,
    "tpu.trace_start"() <{level = 10 : i32, message = "bqk,bkd->bqd"}> : () -> ()
    %cst_385 = arith.constant dense<0.000000e+00> : vector<2x8x8xf32>
    %561 = tpu.matmul %557, %547, %cst_385 {dimension_numbers = #tpu.dot_dimension_numbers<[2], [1], [1], [2], [0, 0, 0, 1, 1, 2], [0], [0]>} : vector<2x8x8xf32>, vector<2x8x8xf32>, vector<2x8x8xf32> -> vector<2x8x8xf32>
    "tpu.trace_stop"() : () -> ()
    %562 = vector.shape_cast %561 : vector<2x8x8xf32> to vector<16x8xf32>
    %c8_386 = arith.constant 8 : index
    %c0_387 = arith.constant 0 : index
    %c0_388 = arith.constant 0 : index
    %563 = vector.load %arg9[%c8_386, %c0_387, %c0_388] : memref<12x8x32xf32, #tpu.memory_space<vmem>>, vector<1x8x32xf32>
    %564 = vector.shape_cast %563 : vector<1x8x32xf32> to vector<8x32xf32>
    %cst_389 = arith.constant dense<0.000000e+00> : vector<16x32xf32>
    %565 = tpu.matmul %562, %564, %cst_389 {dimension_numbers = #tpu.dot_dimension_numbers<[1], [0], [0], [1], [0, 0, 1, 1], [], []>} : vector<16x8xf32>, vector<8x32xf32>, vector<16x32xf32> -> vector<16x32xf32>
    %566 = arith.addf %535, %565 : vector<16x32xf32>
    %c27 = arith.constant 27 : index
    %c0_390 = arith.constant 0 : index
    %c0_391 = arith.constant 0 : index
    %567 = vector.load %arg7[%c27, %c0_390, %c0_391] : memref<36x32x8xf32, #tpu.memory_space<vmem>>, vector<1x32x8xf32>
    %568 = vector.shape_cast %567 : vector<1x32x8xf32> to vector<32x8xf32>
    %cst_392 = arith.constant dense<0.000000e+00> : vector<16x8xf32>
    %569 = tpu.matmul %528, %568, %cst_392 {dimension_numbers = #tpu.dot_dimension_numbers<[1], [0], [0], [1], [0, 0, 1, 1], [], []>} : vector<16x32xf32>, vector<32x8xf32>, vector<16x8xf32> -> vector<16x8xf32>
    %570 = vector.shape_cast %569 : vector<16x8xf32> to vector<2x8x8xf32>
    %c28 = arith.constant 28 : index
    %c0_393 = arith.constant 0 : index
    %c0_394 = arith.constant 0 : index
    %571 = vector.load %arg7[%c28, %c0_393, %c0_394] : memref<36x32x8xf32, #tpu.memory_space<vmem>>, vector<1x32x8xf32>
    %572 = vector.shape_cast %571 : vector<1x32x8xf32> to vector<32x8xf32>
    %cst_395 = arith.constant dense<0.000000e+00> : vector<16x8xf32>
    %573 = tpu.matmul %528, %572, %cst_395 {dimension_numbers = #tpu.dot_dimension_numbers<[1], [0], [0], [1], [0, 0, 1, 1], [], []>} : vector<16x32xf32>, vector<32x8xf32>, vector<16x8xf32> -> vector<16x8xf32>
    %574 = vector.shape_cast %573 : vector<16x8xf32> to vector<2x8x8xf32>
    %c29 = arith.constant 29 : index
    %c0_396 = arith.constant 0 : index
    %c0_397 = arith.constant 0 : index
    %575 = vector.load %arg7[%c29, %c0_396, %c0_397] : memref<36x32x8xf32, #tpu.memory_space<vmem>>, vector<1x32x8xf32>
    %576 = vector.shape_cast %575 : vector<1x32x8xf32> to vector<32x8xf32>
    %cst_398 = arith.constant dense<0.000000e+00> : vector<16x8xf32>
    %577 = tpu.matmul %528, %576, %cst_398 {dimension_numbers = #tpu.dot_dimension_numbers<[1], [0], [0], [1], [0, 0, 1, 1], [], []>} : vector<16x32xf32>, vector<32x8xf32>, vector<16x8xf32> -> vector<16x8xf32>
    %578 = vector.shape_cast %577 : vector<16x8xf32> to vector<2x8x8xf32>
    "tpu.trace_start"() <{level = 10 : i32, message = "bqd,bkd->bqk"}> : () -> ()
    %cst_399 = arith.constant dense<0.000000e+00> : vector<2x8x8xf32>
    %579 = tpu.matmul %570, %574, %cst_399 {dimension_numbers = #tpu.dot_dimension_numbers<[2], [2], [1], [1], [0, 0, 0, 1, 1, 1], [0], [0]>} : vector<2x8x8xf32>, vector<2x8x8xf32>, vector<2x8x8xf32> -> vector<2x8x8xf32>
    "tpu.trace_stop"() : () -> ()
    %cst_400 = arith.constant dense<0xFF800000> : vector<2x8xf32>
    %580 = vector.multi_reduction <maximumf>, %579, %cst_400 [2] : vector<2x8x8xf32> to vector<2x8xf32>
    %581 = vector.shape_cast %580 : vector<2x8xf32> to vector<2x8x1xf32>
    %582 = vector.broadcast %581 : vector<2x8x1xf32> to vector<2x8x8xf32>
    %583 = arith.subf %579, %582 : vector<2x8x8xf32>
    %584 = math.exp %583 : vector<2x8x8xf32>
    %cst_401 = arith.constant dense<0.000000e+00> : vector<2x8xf32>
    %585 = vector.multi_reduction <add>, %584, %cst_401 [2] : vector<2x8x8xf32> to vector<2x8xf32>
    %586 = vector.shape_cast %585 : vector<2x8xf32> to vector<2x8x1xf32>
    %587 = vector.broadcast %586 : vector<2x8x1xf32> to vector<2x8x8xf32>
    %588 = arith.divf %584, %587 : vector<2x8x8xf32>
    %c9_402 = arith.constant 9 : index
    %c0_403 = arith.constant 0 : index
    %c0_404 = arith.constant 0 : index
    %c0_405 = arith.constant 0 : index
    %589 = vector.load %arg20[%c9_402, %c0_403, %c0_404, %c0_405] : memref<12x2x8x8xf32, #tpu.memory_space<vmem>>, vector<1x2x8x8xf32>
    %590 = vector.shape_cast %589 : vector<1x2x8x8xf32> to vector<2x8x8xf32>
    %591 = vector.shape_cast %588 : vector<2x8x8xf32> to vector<1x2x8x8xf32>
    tpu.vector_store %arg20[%c9_402, %c0_403, %c0_404, %c0_405], %591 {strides = array<i32>} : memref<12x2x8x8xf32, #tpu.memory_space<vmem>>, vector<1x2x8x8xf32>,
    "tpu.trace_start"() <{level = 10 : i32, message = "bqk,bkd->bqd"}> : () -> ()
    %cst_406 = arith.constant dense<0.000000e+00> : vector<2x8x8xf32>
    %592 = tpu.matmul %588, %578, %cst_406 {dimension_numbers = #tpu.dot_dimension_numbers<[2], [1], [1], [2], [0, 0, 0, 1, 1, 2], [0], [0]>} : vector<2x8x8xf32>, vector<2x8x8xf32>, vector<2x8x8xf32> -> vector<2x8x8xf32>
    "tpu.trace_stop"() : () -> ()
    %593 = vector.shape_cast %592 : vector<2x8x8xf32> to vector<16x8xf32>
    %c9_407 = arith.constant 9 : index
    %c0_408 = arith.constant 0 : index
    %c0_409 = arith.constant 0 : index
    %594 = vector.load %arg9[%c9_407, %c0_408, %c0_409] : memref<12x8x32xf32, #tpu.memory_space<vmem>>, vector<1x8x32xf32>
    %595 = vector.shape_cast %594 : vector<1x8x32xf32> to vector<8x32xf32>
    %cst_410 = arith.constant dense<0.000000e+00> : vector<16x32xf32>
    %596 = tpu.matmul %593, %595, %cst_410 {dimension_numbers = #tpu.dot_dimension_numbers<[1], [0], [0], [1], [0, 0, 1, 1], [], []>} : vector<16x8xf32>, vector<8x32xf32>, vector<16x32xf32> -> vector<16x32xf32>
    %597 = arith.addf %566, %596 : vector<16x32xf32>
    %c30 = arith.constant 30 : index
    %c0_411 = arith.constant 0 : index
    %c0_412 = arith.constant 0 : index
    %598 = vector.load %arg7[%c30, %c0_411, %c0_412] : memref<36x32x8xf32, #tpu.memory_space<vmem>>, vector<1x32x8xf32>
    %599 = vector.shape_cast %598 : vector<1x32x8xf32> to vector<32x8xf32>
    %cst_413 = arith.constant dense<0.000000e+00> : vector<16x8xf32>
    %600 = tpu.matmul %528, %599, %cst_413 {dimension_numbers = #tpu.dot_dimension_numbers<[1], [0], [0], [1], [0, 0, 1, 1], [], []>} : vector<16x32xf32>, vector<32x8xf32>, vector<16x8xf32> -> vector<16x8xf32>
    %601 = vector.shape_cast %600 : vector<16x8xf32> to vector<2x8x8xf32>
    %c31 = arith.constant 31 : index
    %c0_414 = arith.constant 0 : index
    %c0_415 = arith.constant 0 : index
    %602 = vector.load %arg7[%c31, %c0_414, %c0_415] : memref<36x32x8xf32, #tpu.memory_space<vmem>>, vector<1x32x8xf32>
    %603 = vector.shape_cast %602 : vector<1x32x8xf32> to vector<32x8xf32>
    %cst_416 = arith.constant dense<0.000000e+00> : vector<16x8xf32>
    %604 = tpu.matmul %528, %603, %cst_416 {dimension_numbers = #tpu.dot_dimension_numbers<[1], [0], [0], [1], [0, 0, 1, 1], [], []>} : vector<16x32xf32>, vector<32x8xf32>, vector<16x8xf32> -> vector<16x8xf32>
    %605 = vector.shape_cast %604 : vector<16x8xf32> to vector<2x8x8xf32>
    %c32 = arith.constant 32 : index
    %c0_417 = arith.constant 0 : index
    %c0_418 = arith.constant 0 : index
    %606 = vector.load %arg7[%c32, %c0_417, %c0_418] : memref<36x32x8xf32, #tpu.memory_space<vmem>>, vector<1x32x8xf32>
    %607 = vector.shape_cast %606 : vector<1x32x8xf32> to vector<32x8xf32>
    %cst_419 = arith.constant dense<0.000000e+00> : vector<16x8xf32>
    %608 = tpu.matmul %528, %607, %cst_419 {dimension_numbers = #tpu.dot_dimension_numbers<[1], [0], [0], [1], [0, 0, 1, 1], [], []>} : vector<16x32xf32>, vector<32x8xf32>, vector<16x8xf32> -> vector<16x8xf32>
    %609 = vector.shape_cast %608 : vector<16x8xf32> to vector<2x8x8xf32>
    "tpu.trace_start"() <{level = 10 : i32, message = "bqd,bkd->bqk"}> : () -> ()
    %cst_420 = arith.constant dense<0.000000e+00> : vector<2x8x8xf32>
    %610 = tpu.matmul %601, %605, %cst_420 {dimension_numbers = #tpu.dot_dimension_numbers<[2], [2], [1], [1], [0, 0, 0, 1, 1, 1], [0], [0]>} : vector<2x8x8xf32>, vector<2x8x8xf32>, vector<2x8x8xf32> -> vector<2x8x8xf32>
    "tpu.trace_stop"() : () -> ()
    %cst_421 = arith.constant dense<0xFF800000> : vector<2x8xf32>
    %611 = vector.multi_reduction <maximumf>, %610, %cst_421 [2] : vector<2x8x8xf32> to vector<2x8xf32>
    %612 = vector.shape_cast %611 : vector<2x8xf32> to vector<2x8x1xf32>
    %613 = vector.broadcast %612 : vector<2x8x1xf32> to vector<2x8x8xf32>
    %614 = arith.subf %610, %613 : vector<2x8x8xf32>
    %615 = math.exp %614 : vector<2x8x8xf32>
    %cst_422 = arith.constant dense<0.000000e+00> : vector<2x8xf32>
    %616 = vector.multi_reduction <add>, %615, %cst_422 [2] : vector<2x8x8xf32> to vector<2x8xf32>
    %617 = vector.shape_cast %616 : vector<2x8xf32> to vector<2x8x1xf32>
    %618 = vector.broadcast %617 : vector<2x8x1xf32> to vector<2x8x8xf32>
    %619 = arith.divf %615, %618 : vector<2x8x8xf32>
    %c10_423 = arith.constant 10 : index
    %c0_424 = arith.constant 0 : index
    %c0_425 = arith.constant 0 : index
    %c0_426 = arith.constant 0 : index
    %620 = vector.load %arg20[%c10_423, %c0_424, %c0_425, %c0_426] : memref<12x2x8x8xf32, #tpu.memory_space<vmem>>, vector<1x2x8x8xf32>
    %621 = vector.shape_cast %620 : vector<1x2x8x8xf32> to vector<2x8x8xf32>
    %622 = vector.shape_cast %619 : vector<2x8x8xf32> to vector<1x2x8x8xf32>
    tpu.vector_store %arg20[%c10_423, %c0_424, %c0_425, %c0_426], %622 {strides = array<i32>} : memref<12x2x8x8xf32, #tpu.memory_space<vmem>>, vector<1x2x8x8xf32>,
    "tpu.trace_start"() <{level = 10 : i32, message = "bqk,bkd->bqd"}> : () -> ()
    %cst_427 = arith.constant dense<0.000000e+00> : vector<2x8x8xf32>
    %623 = tpu.matmul %619, %609, %cst_427 {dimension_numbers = #tpu.dot_dimension_numbers<[2], [1], [1], [2], [0, 0, 0, 1, 1, 2], [0], [0]>} : vector<2x8x8xf32>, vector<2x8x8xf32>, vector<2x8x8xf32> -> vector<2x8x8xf32>
    "tpu.trace_stop"() : () -> ()
    %624 = vector.shape_cast %623 : vector<2x8x8xf32> to vector<16x8xf32>
    %c10_428 = arith.constant 10 : index
    %c0_429 = arith.constant 0 : index
    %c0_430 = arith.constant 0 : index
    %625 = vector.load %arg9[%c10_428, %c0_429, %c0_430] : memref<12x8x32xf32, #tpu.memory_space<vmem>>, vector<1x8x32xf32>
    %626 = vector.shape_cast %625 : vector<1x8x32xf32> to vector<8x32xf32>
    %cst_431 = arith.constant dense<0.000000e+00> : vector<16x32xf32>
    %627 = tpu.matmul %624, %626, %cst_431 {dimension_numbers = #tpu.dot_dimension_numbers<[1], [0], [0], [1], [0, 0, 1, 1], [], []>} : vector<16x8xf32>, vector<8x32xf32>, vector<16x32xf32> -> vector<16x32xf32>
    %628 = arith.addf %597, %627 : vector<16x32xf32>
    %c33 = arith.constant 33 : index
    %c0_432 = arith.constant 0 : index
    %c0_433 = arith.constant 0 : index
    %629 = vector.load %arg7[%c33, %c0_432, %c0_433] : memref<36x32x8xf32, #tpu.memory_space<vmem>>, vector<1x32x8xf32>
    %630 = vector.shape_cast %629 : vector<1x32x8xf32> to vector<32x8xf32>
    %cst_434 = arith.constant dense<0.000000e+00> : vector<16x8xf32>
    %631 = tpu.matmul %528, %630, %cst_434 {dimension_numbers = #tpu.dot_dimension_numbers<[1], [0], [0], [1], [0, 0, 1, 1], [], []>} : vector<16x32xf32>, vector<32x8xf32>, vector<16x8xf32> -> vector<16x8xf32>
    %632 = vector.shape_cast %631 : vector<16x8xf32> to vector<2x8x8xf32>
    %c34 = arith.constant 34 : index
    %c0_435 = arith.constant 0 : index
    %c0_436 = arith.constant 0 : index
    %633 = vector.load %arg7[%c34, %c0_435, %c0_436] : memref<36x32x8xf32, #tpu.memory_space<vmem>>, vector<1x32x8xf32>
    %634 = vector.shape_cast %633 : vector<1x32x8xf32> to vector<32x8xf32>
    %cst_437 = arith.constant dense<0.000000e+00> : vector<16x8xf32>
    %635 = tpu.matmul %528, %634, %cst_437 {dimension_numbers = #tpu.dot_dimension_numbers<[1], [0], [0], [1], [0, 0, 1, 1], [], []>} : vector<16x32xf32>, vector<32x8xf32>, vector<16x8xf32> -> vector<16x8xf32>
    %636 = vector.shape_cast %635 : vector<16x8xf32> to vector<2x8x8xf32>
    %c35 = arith.constant 35 : index
    %c0_438 = arith.constant 0 : index
    %c0_439 = arith.constant 0 : index
    %637 = vector.load %arg7[%c35, %c0_438, %c0_439] : memref<36x32x8xf32, #tpu.memory_space<vmem>>, vector<1x32x8xf32>
    %638 = vector.shape_cast %637 : vector<1x32x8xf32> to vector<32x8xf32>
    %cst_440 = arith.constant dense<0.000000e+00> : vector<16x8xf32>
    %639 = tpu.matmul %528, %638, %cst_440 {dimension_numbers = #tpu.dot_dimension_numbers<[1], [0], [0], [1], [0, 0, 1, 1], [], []>} : vector<16x32xf32>, vector<32x8xf32>, vector<16x8xf32> -> vector<16x8xf32>
    %640 = vector.shape_cast %639 : vector<16x8xf32> to vector<2x8x8xf32>
    "tpu.trace_start"() <{level = 10 : i32, message = "bqd,bkd->bqk"}> : () -> ()
    %cst_441 = arith.constant dense<0.000000e+00> : vector<2x8x8xf32>
    %641 = tpu.matmul %632, %636, %cst_441 {dimension_numbers = #tpu.dot_dimension_numbers<[2], [2], [1], [1], [0, 0, 0, 1, 1, 1], [0], [0]>} : vector<2x8x8xf32>, vector<2x8x8xf32>, vector<2x8x8xf32> -> vector<2x8x8xf32>
    "tpu.trace_stop"() : () -> ()
    %cst_442 = arith.constant dense<0xFF800000> : vector<2x8xf32>
    %642 = vector.multi_reduction <maximumf>, %641, %cst_442 [2] : vector<2x8x8xf32> to vector<2x8xf32>
    %643 = vector.shape_cast %642 : vector<2x8xf32> to vector<2x8x1xf32>
    %644 = vector.broadcast %643 : vector<2x8x1xf32> to vector<2x8x8xf32>
    %645 = arith.subf %641, %644 : vector<2x8x8xf32>
    %646 = math.exp %645 : vector<2x8x8xf32>
    %cst_443 = arith.constant dense<0.000000e+00> : vector<2x8xf32>
    %647 = vector.multi_reduction <add>, %646, %cst_443 [2] : vector<2x8x8xf32> to vector<2x8xf32>
    %648 = vector.shape_cast %647 : vector<2x8xf32> to vector<2x8x1xf32>
    %649 = vector.broadcast %648 : vector<2x8x1xf32> to vector<2x8x8xf32>
    %650 = arith.divf %646, %649 : vector<2x8x8xf32>
    %c11_444 = arith.constant 11 : index
    %c0_445 = arith.constant 0 : index
    %c0_446 = arith.constant 0 : index
    %c0_447 = arith.constant 0 : index
    %651 = vector.load %arg20[%c11_444, %c0_445, %c0_446, %c0_447] : memref<12x2x8x8xf32, #tpu.memory_space<vmem>>, vector<1x2x8x8xf32>
    %652 = vector.shape_cast %651 : vector<1x2x8x8xf32> to vector<2x8x8xf32>
    %653 = vector.shape_cast %650 : vector<2x8x8xf32> to vector<1x2x8x8xf32>
    tpu.vector_store %arg20[%c11_444, %c0_445, %c0_446, %c0_447], %653 {strides = array<i32>} : memref<12x2x8x8xf32, #tpu.memory_space<vmem>>, vector<1x2x8x8xf32>,
    "tpu.trace_start"() <{level = 10 : i32, message = "bqk,bkd->bqd"}> : () -> ()
    %cst_448 = arith.constant dense<0.000000e+00> : vector<2x8x8xf32>
    %654 = tpu.matmul %650, %640, %cst_448 {dimension_numbers = #tpu.dot_dimension_numbers<[2], [1], [1], [2], [0, 0, 0, 1, 1, 2], [0], [0]>} : vector<2x8x8xf32>, vector<2x8x8xf32>, vector<2x8x8xf32> -> vector<2x8x8xf32>
    "tpu.trace_stop"() : () -> ()
    %655 = vector.shape_cast %654 : vector<2x8x8xf32> to vector<16x8xf32>
    %c11_449 = arith.constant 11 : index
    %c0_450 = arith.constant 0 : index
    %c0_451 = arith.constant 0 : index
    %656 = vector.load %arg9[%c11_449, %c0_450, %c0_451] : memref<12x8x32xf32, #tpu.memory_space<vmem>>, vector<1x8x32xf32>
    %657 = vector.shape_cast %656 : vector<1x8x32xf32> to vector<8x32xf32>
    %cst_452 = arith.constant dense<0.000000e+00> : vector<16x32xf32>
    %658 = tpu.matmul %655, %657, %cst_452 {dimension_numbers = #tpu.dot_dimension_numbers<[1], [0], [0], [1], [0, 0, 1, 1], [], []>} : vector<16x8xf32>, vector<8x32xf32>, vector<16x32xf32> -> vector<16x32xf32>
    %659 = arith.addf %628, %658 : vector<16x32xf32>
    %660 = arith.addf %659, %528 : vector<16x32xf32>
    %c2_453 = arith.constant 2 : index
    %c0_454 = arith.constant 0 : index
    %c0_455 = arith.constant 0 : index
    %661 = vector.load %arg11[%c2_453, %c0_454, %c0_455] : memref<3x1x32xf32, #tpu.memory_space<vmem>>, vector<1x1x32xf32>
    %662 = vector.shape_cast %661 : vector<1x1x32xf32> to vector<1x32xf32>
    %c2_456 = arith.constant 2 : index
    %c0_457 = arith.constant 0 : index
    %c0_458 = arith.constant 0 : index
    %663 = vector.load %arg12[%c2_456, %c0_457, %c0_458] : memref<3x1x32xf32, #tpu.memory_space<vmem>>, vector<1x1x32xf32>
    %664 = vector.shape_cast %663 : vector<1x1x32xf32> to vector<1x32xf32>
    %cst_459 = arith.constant dense<0.000000e+00> : vector<16xf32>
    %665 = vector.multi_reduction <add>, %660, %cst_459 [1] : vector<16x32xf32> to vector<16xf32>
    %666 = vector.shape_cast %665 : vector<16xf32> to vector<16x1xf32>
    %cst_460 = arith.constant 3.200000e+01 : f32
    %667 = vector.broadcast %cst_460 : f32 to vector<16x1xf32>
    %668 = arith.divf %666, %667 : vector<16x1xf32>
    %669 = vector.broadcast %668 : vector<16x1xf32> to vector<16x32xf32>
    %670 = arith.subf %660, %669 : vector<16x32xf32>
    %671 = arith.mulf %670, %670 : vector<16x32xf32>
    %cst_461 = arith.constant dense<0.000000e+00> : vector<16xf32>
    %672 = vector.multi_reduction <add>, %671, %cst_461 [1] : vector<16x32xf32> to vector<16xf32>
    %673 = vector.shape_cast %672 : vector<16xf32> to vector<16x1xf32>
    %cst_462 = arith.constant 3.200000e+01 : f32
    %674 = vector.broadcast %cst_462 : f32 to vector<16x1xf32>
    %675 = arith.divf %673, %674 : vector<16x1xf32>
    %676 = vector.broadcast %668 : vector<16x1xf32> to vector<16x32xf32>
    %677 = arith.subf %660, %676 : vector<16x32xf32>
    %cst_463 = arith.constant 9.99999974E-6 : f32
    %678 = vector.broadcast %cst_463 : f32 to vector<16x1xf32>
    %679 = arith.addf %675, %678 : vector<16x1xf32>
    %680 = math.rsqrt %679 : vector<16x1xf32>
    %681 = vector.broadcast %680 : vector<16x1xf32> to vector<16x32xf32>
    %682 = arith.mulf %677, %681 : vector<16x32xf32>
    %683 = vector.broadcast %662 : vector<1x32xf32> to vector<16x32xf32>
    %684 = arith.mulf %682, %683 : vector<16x32xf32>
    %685 = vector.broadcast %664 : vector<1x32xf32> to vector<16x32xf32>
    %686 = arith.addf %684, %685 : vector<16x32xf32>
    %c2_464 = arith.constant 2 : index
    %c0_465 = arith.constant 0 : index
    %c0_466 = arith.constant 0 : index
    %687 = vector.load %arg13[%c2_464, %c0_465, %c0_466] : memref<3x32x128xf32, #tpu.memory_space<vmem>>, vector<1x32x128xf32>
    %688 = vector.shape_cast %687 : vector<1x32x128xf32> to vector<32x128xf32>
    %cst_467 = arith.constant dense<0.000000e+00> : vector<16x128xf32>
    %689 = tpu.matmul %686, %688, %cst_467 {dimension_numbers = #tpu.dot_dimension_numbers<[1], [0], [0], [1], [0, 0, 1, 1], [], []>} : vector<16x32xf32>, vector<32x128xf32>, vector<16x128xf32> -> vector<16x128xf32>
    %c2_468 = arith.constant 2 : index
    %c0_469 = arith.constant 0 : index
    %c0_470 = arith.constant 0 : index
    %690 = vector.load %arg14[%c2_468, %c0_469, %c0_470] : memref<3x1x128xf32, #tpu.memory_space<vmem>>, vector<1x1x128xf32>
    %691 = vector.shape_cast %690 : vector<1x1x128xf32> to vector<1x128xf32>
    %692 = vector.broadcast %691 : vector<1x128xf32> to vector<16x128xf32>
    %693 = arith.addf %689, %692 : vector<16x128xf32>
    %cst_471 = arith.constant 0.000000e+00 : f32
    %694 = vector.broadcast %cst_471 : f32 to vector<16x128xf32>
    %695 = arith.maximumf %693, %694 : vector<16x128xf32>
    %c2_472 = arith.constant 2 : index
    %c0_473 = arith.constant 0 : index
    %c0_474 = arith.constant 0 : index
    %696 = vector.load %arg15[%c2_472, %c0_473, %c0_474] : memref<3x128x32xf32, #tpu.memory_space<vmem>>, vector<1x128x32xf32>
    %697 = vector.shape_cast %696 : vector<1x128x32xf32> to vector<128x32xf32>
    %cst_475 = arith.constant dense<0.000000e+00> : vector<16x32xf32>
    %698 = tpu.matmul %695, %697, %cst_475 {dimension_numbers = #tpu.dot_dimension_numbers<[1], [0], [0], [1], [0, 0, 1, 1], [], []>} : vector<16x128xf32>, vector<128x32xf32>, vector<16x32xf32> -> vector<16x32xf32>
    %c2_476 = arith.constant 2 : index
    %c0_477 = arith.constant 0 : index
    %c0_478 = arith.constant 0 : index
    %699 = vector.load %arg16[%c2_476, %c0_477, %c0_478] : memref<3x1x32xf32, #tpu.memory_space<vmem>>, vector<1x1x32xf32>
    %700 = vector.shape_cast %699 : vector<1x1x32xf32> to vector<1x32xf32>
    %701 = vector.broadcast %700 : vector<1x32xf32> to vector<16x32xf32>
    %702 = arith.addf %698, %701 : vector<16x32xf32>
    %703 = arith.addf %702, %686 : vector<16x32xf32>
    %c2_479 = arith.constant 2 : index
    %c0_480 = arith.constant 0 : index
    %c0_481 = arith.constant 0 : index
    %704 = vector.load %arg17[%c2_479, %c0_480, %c0_481] : memref<3x1x32xf32, #tpu.memory_space<vmem>>, vector<1x1x32xf32>
    %705 = vector.shape_cast %704 : vector<1x1x32xf32> to vector<1x32xf32>
    %c2_482 = arith.constant 2 : index
    %c0_483 = arith.constant 0 : index
    %c0_484 = arith.constant 0 : index
    %706 = vector.load %arg18[%c2_482, %c0_483, %c0_484] : memref<3x1x32xf32, #tpu.memory_space<vmem>>, vector<1x1x32xf32>
    %707 = vector.shape_cast %706 : vector<1x1x32xf32> to vector<1x32xf32>
    %cst_485 = arith.constant dense<0.000000e+00> : vector<16xf32>
    %708 = vector.multi_reduction <add>, %703, %cst_485 [1] : vector<16x32xf32> to vector<16xf32>
    %709 = vector.shape_cast %708 : vector<16xf32> to vector<16x1xf32>
    %cst_486 = arith.constant 3.200000e+01 : f32
    %710 = vector.broadcast %cst_486 : f32 to vector<16x1xf32>
    %711 = arith.divf %709, %710 : vector<16x1xf32>
    %712 = vector.broadcast %711 : vector<16x1xf32> to vector<16x32xf32>
    %713 = arith.subf %703, %712 : vector<16x32xf32>
    %714 = arith.mulf %713, %713 : vector<16x32xf32>
    %cst_487 = arith.constant dense<0.000000e+00> : vector<16xf32>
    %715 = vector.multi_reduction <add>, %714, %cst_487 [1] : vector<16x32xf32> to vector<16xf32>
    %716 = vector.shape_cast %715 : vector<16xf32> to vector<16x1xf32>
    %cst_488 = arith.constant 3.200000e+01 : f32
    %717 = vector.broadcast %cst_488 : f32 to vector<16x1xf32>
    %718 = arith.divf %716, %717 : vector<16x1xf32>
    %719 = vector.broadcast %711 : vector<16x1xf32> to vector<16x32xf32>
    %720 = arith.subf %703, %719 : vector<16x32xf32>
    %cst_489 = arith.constant 9.99999974E-6 : f32
    %721 = vector.broadcast %cst_489 : f32 to vector<16x1xf32>
    %722 = arith.addf %718, %721 : vector<16x1xf32>
    %723 = math.rsqrt %722 : vector<16x1xf32>
    %724 = vector.broadcast %723 : vector<16x1xf32> to vector<16x32xf32>
    %725 = arith.mulf %720, %724 : vector<16x32xf32>
    %726 = vector.broadcast %705 : vector<1x32xf32> to vector<16x32xf32>
    %727 = arith.mulf %725, %726 : vector<16x32xf32>
    %728 = vector.broadcast %707 : vector<1x32xf32> to vector<16x32xf32>
    %729 = arith.addf %727, %728 : vector<16x32xf32>
    %730 = vector.shape_cast %729 : vector<16x32xf32> to vector<2x8x32xf32>
    %c0_490 = arith.constant 0 : index
    %c0_491 = arith.constant 0 : index
    %c0_492 = arith.constant 0 : index
    %731 = vector.load %arg19[%c0_490, %c0_491, %c0_492] : memref<2x8x32xf32, #tpu.memory_space<vmem>>, vector<2x8x32xf32>
    tpu.vector_store %arg19[%c0_490, %c0_491, %c0_492], %730 {strides = array<i32>} : memref<2x8x32xf32, #tpu.memory_space<vmem>>, vector<2x8x32xf32>,
    return
  }
}

</mosaic_0001>

<bundles_post_ra>
// kernel: encoder_forward.1
= control target key start
LH: loop header
LB: loop body
LE: loop exit
PB: predicated region body
PF: predicated region fallthrough
CT: control target
= control target key end

     0   :  { %s7105_s0 = inlined_call_operand.vmem [shape: f32[2,8,32], index: 0, kind: input, shape index: {}]   ;;  %s7106_s1 = inlined_call_operand.vmem [shape: f32[2,8,32], index: 1, kind: input, shape index: {}]   ;;  %s7107_s2 = inlined_call_operand.<no memory space> [shape: f32[1,1], index: 2, kind: input, shape index: {}]   ;;  %s7108_s3 = inlined_call_operand.vmem [shape: f32[15,32,32], index: 3, kind: input, shape index: {}]   ;;  %s7109_s4 = inlined_call_operand.vmem [shape: f32[3,1,32], index: 4, kind: input, shape index: {}]   ;;  %s7110_s5 = inlined_call_operand.vmem [shape: f32[32,32], index: 5, kind: input, shape index: {}]   ;;  %s7111_s6 = inlined_call_operand.vmem [shape: f32[1,32], index: 6, kind: input, shape index: {}]   ;;  %s7112_s7 = inlined_call_operand.vmem [shape: f32[36,32,8], index: 7, kind: input, shape index: {}]   ;;  %s7113_s8 = inlined_call_operand.vmem [shape: f32[3,32,32], index: 8, kind: input, shape index: {}]   ;;  %s7114_s9 = inlined_call_operand.vmem [shape: f32[12,8,32], index: 9, kind: input, shape index: {}]   ;;  %s7115_s10 = inlined_call_operand.vmem [shape: f32[3,1,32], index: 10, kind: input, shape index: {}]   ;;  %s7116_s11 = inlined_call_operand.vmem [shape: f32[3,1,32], index: 11, kind: input, shape index: {}]   ;;  %s7117_s12 = inlined_call_operand.vmem [shape: f32[3,1,32], index: 12, kind: input, shape index: {}]   ;;  %s7118_s13 = inlined_call_operand.vmem [shape: f32[3,32,128], index: 13, kind: input, shape index: {}]   ;;  %s7119_s14 = inlined_call_operand.vmem [shape: f32[3,1,128], index: 14, kind: input, shape index: {}]   ;;  %s7120_s15 = inlined_call_operand.vmem [shape: f32[3,128,32], index: 15, kind: input, shape index: {}]   ;;  %s7121_s16 = inlined_call_operand.vmem [shape: f32[3,1,32], index: 16, kind: input, shape index: {}]   ;;  %s7122_s17 = inlined_call_operand.vmem [shape: f32[3,1,32], index: 17, kind: input, shape index: {}]   ;;  %s7123_s18 = inlined_call_operand.vmem [shape: f32[3,1,32], index: 18, kind: input, shape index: {}]   ;;  %s7124_s19 = inlined_call_operand.hbm [shape: f32[2,8,32], index: 19, kind: output, shape index: {0}]   ;;  %s7125_s20 = inlined_call_operand.vmem [shape: f32[12,2,8,8], index: 20, kind: output, shape index: {1}]  }
   0x1   :  { %7130 = sst [smem:[#allocation7_spill]] %s7105_s0 }
   0x2   :  { %7131 = sst [smem:[#allocation8_spill]] %s7106_s1 }
   0x3   :  { %7132 = sst [smem:[#allocation9_spill]] %s7107_s2 }
   0x4   :  { %7133 = sst [smem:[#allocation10_spill]] %s7108_s3 }
   0x5   :  { %7134 = sst [smem:[#allocation11_spill]] %s7109_s4 }
   0x6   :  { %s7135_s23 = sld [smem:[#allocation10_spill]]  ;;  %vm66_vm0 = vcmask 261120   ;;  %vm68_vm1 = vcmask 257024   ;;  %v5381_v2 = vmov 0.0   ;;  %vm88_vm2 = vcmask 1046528  }
   0x7   :  { %67 = vst.msk [vmem:[#allocation2] sm:$0xff] %vm66_vm0, %v5381_v2  ;;  %s7136_s26 = sld [smem:[#allocation7_spill]]  ;;  %vm154_vm3 = vcmask 1045504   ;;  %vm195_vm4 = vcmask 1044480   ;;  %vm236_vm5 = vcmask 1043456  }
   0x8   :  { %69 = vst.msk [vmem:[#allocation2 + $0x8] sm:$0xf] %vm68_vm1, %v5381_v2 }
   0x9   :  { %70 = vst.msk [vmem:[#allocation2 + $0x10] sm:$0xff] %vm66_vm0, %v5381_v2 }
   0xa   :  { %71 = vst.msk [vmem:[#allocation2 + $0x18] sm:$0xf] %vm68_vm1, %v5381_v2 }
   0xc   :  { %v4697_v0 = vld [vmem:[%s7135_s23 + $0x38] sm:$0xff]  ;;  %v4696_v1 = vld [vmem:[%s7135_s23 + $0x30] sm:$0xff]  ;;  %v4695_v5 = vld [vmem:[%s7135_s23 + $0x28] sm:$0xff] }
   0xd   :  { %116 = vmatpush.msra.mxu1 %v4697_v0  ;;  %v72_v3 = vld [vmem:[%s7136_s26] sm:$0xff]  ;;  %v4705_v4 = vld [vmem:[%s7135_s23 + $0x58] sm:$0xff]  ;;  %v4704_v6 = vld [vmem:[%s7135_s23 + $0x50] sm:$0xff] }
   0xe   :  { %182 = vmatpush.msra.mxu2 %v4705_v4  ;;  %74 = vst.msk [vmem:[#allocation2 + $0x2] sm:$0xff] %vm66_vm0, %v72_v3  ;;  %v4703_v7 = vld [vmem:[%s7135_s23 + $0x48] sm:$0xff]  ;;  %v4711_v8 = vld [vmem:[%s7135_s23 + $0x78] sm:$0xff]  ;;  %v4694_v10 = vld [vmem:[%s7135_s23 + $0x20] sm:$0xff] }
   0xf   :  { %117 = vmatpush.msra.mxu1 %v4696_v1  ;;  %v73_v9 = vld [vmem:[%s7136_s26 + $0x8] sm:$0xff]  ;;  %v4702_v11 = vld [vmem:[%s7135_s23 + $0x40] sm:$0xff]  ;;  %223 = vmatpush.msra.mxu3 %v4711_v8  ;;  %v4710_v12 = vld [vmem:[%s7135_s23 + $0x70] sm:$0xff] }
  0x10   :  { %183 = vmatpush.msra.mxu2 %v4704_v6  ;;  %v83_v13 = vld [vmem:[%s7135_s23 + $0x18] sm:$0xff]  ;;  %v82_v14 = vld [vmem:[%s7135_s23 + $0x10] sm:$0xff]  ;;  %v4709_v15 = vld [vmem:[%s7135_s23 + $0x68] sm:$0xff]  ;;  %75 = vst.msk [vmem:[#allocation2 + $0x12] sm:$0xff] %vm66_vm0, %v73_v9 }
  0x11   :  { %118 = vmatpush.msra.mxu1 %v4695_v5  ;;  %224 = vmatpush.msra.mxu3 %v4710_v12  ;;  %v4708_v16 = vld [vmem:[%s7135_s23 + $0x60] sm:$0xff]  ;;  %v4717_v17 = vld [vmem:[%s7135_s23 + $0x98] sm:$0xff]  ;;  %v4716_v18 = vld [vmem:[%s7135_s23 + $0x90] sm:$0xff] }
  0x12   :  { %184 = vmatpush.msra.mxu2 %v4703_v7  ;;  %v81_v19 = vld [vmem:[%s7135_s23 + $0x8] sm:$0xff]  ;;  %264 = vmatpush.msra.mxu0 %v4717_v17  ;;  %v80_v23 = vld [vmem:[%s7135_s23] sm:$0xff] }
  0x13   :  { %119 = vmatpush.msra.mxu1 %v4694_v10  ;;  %v4715_v20 = vld [vmem:[%s7135_s23 + $0x88] sm:$0xff]  ;;  %225 = vmatpush.msra.mxu3 %v4709_v15  ;;  %v4714_v28 = vld [vmem:[%s7135_s23 + $0x80] sm:$0xff] }
  0x14   :  { %185 = vmatpush.msra.mxu2 %v4702_v11  ;;  %265 = vmatpush.msra.mxu0 %v4716_v18 }
  0x15   :  { %143 = vmatpush.msrb.mxu1 %v83_v13  ;;  %v76_v21 = vld [vmem:[#allocation2] sm:$0xff]  ;;  %v77_v22 = vld [vmem:[#allocation2 + $0x8] sm:$0xf]  ;;  %226 = vmatpush.msra.mxu3 %v4708_v16 }
  0x16   :  { %5199 = vmatpush.msrb.mxu2 %v4717_v17  ;;  %v89_v24 = vrot.slane %v76_v21, 1  ;;  %v90_v25 = vrot.slane %v77_v22, 1  ;;  %v155_v26 = vrot.slane %v76_v21, 2  ;;  %v156_v27 = vrot.slane %v77_v22, 2  ;;  %266 = vmatpush.msra.mxu0 %v4715_v20 }
  0x17   :  { %144 = vmatpush.msrb.mxu1 %v82_v14  ;;  %v196_v29 = vrot.slane %v76_v21, 3  ;;  %v197_v30 = vrot.slane %v77_v22, 3  ;;  %v237_v31 = vrot.slane %v76_v21, 4  ;;  %v238_v32 = vrot.slane %v77_v22, 4  ;;  %v78_v34 = vld [vmem:[#allocation2 + $0x10] sm:$0xff] }
  0x18   :  { %5200 = vmatpush.msrb.mxu2 %v4716_v18  ;;  %v91_v33 = vsel %vm88_vm2, %v89_v24, %v90_v25  ;;  %v79_v35 = vld [vmem:[#allocation2 + $0x18] sm:$0xf]  ;;  %v157_v36 = vsel %vm154_vm3, %v155_v26, %v156_v27  ;;  %v92_v37 = vrot.slane %v78_v34, 1  ;;  %v158_v40 = vrot.slane %v78_v34, 2  ;;  %267 = vmatpush.msra.mxu0 %v4714_v28 }
  0x19   :  { %145 = vmatpush.msrb.mxu1 %v81_v19  ;;  %4706 = vmatmul.msk.f32.vlgmr.msra.gmra.mxu2 %vm66_vm0, %v157_v36  ;;  %v198_v38 = vsel %vm195_vm4, %v196_v29, %v197_v30  ;;  %v93_v39 = vrot.slane %v79_v35, 1  ;;  %v159_v41 = vrot.slane %v79_v35, 2  ;;  %v239_v42 = vsel %vm236_vm5, %v237_v31, %v238_v32 }
  0x1a   :  { %5201 = vmatpush.msrb.mxu2 %v4715_v20  ;;  %4698 = vmatmul.msk.f32.vlgmr.msra.gmra.mxu1 %vm66_vm0, %v91_v33  ;;  %v199_v43 = vrot.slane %v78_v34, 3  ;;  %v200_v44 = vrot.slane %v79_v35, 3 }
  0x1b   :  { %4712 = vmatmul.msk.f32.vlgmr.msra.gmra.mxu3 %vm66_vm0, %v198_v38  ;;  %146 = vmatpush.msrb.mxu1 %v80_v23  ;;  %v94_v45 = vsel %vm88_vm2, %v92_v37, %v93_v39  ;;  %v160_v46 = vsel %vm154_vm3, %v158_v40, %v159_v41 }
  0x1c   :  { %5202 = vmatpush.msrb.mxu2 %v4714_v28  ;;  %4718 = vmatmul.msk.f32.vlgmr.msra.gmra.mxu0 %vm66_vm0, %v239_v42 }
  0x1d   :  { %27 = vsyncpa [#allocation5], 0  ;;  %v201_v47 = vsel %vm195_vm4, %v199_v43, %v200_v44  ;;  %v240_v48 = vrot.slane %v78_v34, 4  ;;  %v241_v49 = vrot.slane %v79_v35, 4  ;;  %v4723_v51 = vld [vmem:[%s7135_s23 + $0xb8] sm:$0xff]  ;;  %v4722_v52 = vld [vmem:[%s7135_s23 + $0xb0] sm:$0xff] }
  0x1e   :  { %354 = vmatpush.msra.mxu2 %v4723_v51  ;;  %v4727_v54 = vld [vmem:[%s7135_s23 + $0xd8] sm:$0xff]  ;;  %v4721_v57 = vld [vmem:[%s7135_s23 + $0xa8] sm:$0xff]  ;;  %v4726_v58 = vld [vmem:[%s7135_s23 + $0xd0] sm:$0xff]  ;;  %s7137_s22 = sld [smem:[#allocation11_spill]]  ;;  %vm868_vm6 = vcmask 64512  }
  0x1f   :  { %v242_v50 = vsel %vm236_vm5, %v240_v48, %v241_v49  ;;  %v4735_v55 = vld [vmem:[%s7135_s23 + $0xf8] sm:$0xff]  ;;  %327 = vmatpush.msra.mxu1 %v4727_v54  ;;  %v4734_v59 = vld [vmem:[%s7135_s23 + $0xf0] sm:$0xff]  ;;  %v4720_v61 = vld [vmem:[%s7135_s23 + $0xa0] sm:$0xff]  ;;  %s7138_s3 = sld [smem:[#allocation8_spill]] }
  0x20   :  { %355 = vmatpush.msra.mxu2 %v4722_v52  ;;  %v4741_v56 = vld [vmem:[%s7135_s23 + $0x118] sm:$0xff]  ;;  %392 = vmatpush.msrb.mxu3 %v4735_v55  ;;  %v4740_v60 = vld [vmem:[%s7135_s23 + $0x110] sm:$0xff]  ;;  %v4725_v62 = vld [vmem:[%s7135_s23 + $0xc8] sm:$0xff]  ;;  %s7139_s28 = sld [smem:[#allocation9_spill]] }
  0x21   :  { %4707 = vmatmul.msk.f32.gmra.mxu2 %vm66_vm0, %v160_v46  ;;  %432 = vmatpush.msrb.mxu0 %v4741_v56  ;;  %v4733_v63 = vld [vmem:[%s7135_s23 + $0xe8] sm:$0xff]  ;;  %v4724_v1 = vld [vmem:[%s7135_s23 + $0xc0] sm:$0xff]  ;;  %v4747_v9 = vld [vmem:[%s7135_s23 + $0x138] sm:$0xff] }
  0x22   :  { %4699 = vmatmul.msk.f32.gmra.mxu1 %vm66_vm0, %v94_v45  ;;  %356 = vmatpush.msra.mxu2 %v4721_v57  ;;  %v4739_v0 = vld [vmem:[%s7135_s23 + $0x108] sm:$0xff]  ;;  %v4732_v2 = vld [vmem:[%s7135_s23 + $0xe0] sm:$0xff]  ;;  %v4746_v10 = vld [vmem:[%s7135_s23 + $0x130] sm:$0xff] }
  0x23   :  { %4713 = vmatmul.msk.f32.gmra.mxu3 %vm66_vm0, %v201_v47  ;;  %328 = vmatpush.msra.mxu1 %v4726_v58  ;;  %v4738_v3 = vld [vmem:[%s7135_s23 + $0x100] sm:$0xff]  ;;  %v4745_v13 = vld [vmem:[%s7135_s23 + $0x128] sm:$0xff]  ;;  %v4754_v58 = vld [vmem:[%s7135_s23 + $0x158] sm:$0xff] }
  0x24   :  { %393 = vmatpush.msrb.mxu3 %v4734_v59  ;;  %433 = vmatpush.msrb.mxu0 %v4740_v60  ;;  %v5208_v16 = vld [vmem:[%s7137_s22] ss:$0 sm:$0xff]  ;;  %v4753_v59 = vld [vmem:[%s7135_s23 + $0x150] sm:$0xff]  ;;  %v4758_v60 = vld [vmem:[%s7135_s23 + $0x178] sm:$0xff] }
  0x25   :  { %357 = vmatpush.msra.mxu2 %v4720_v61  ;;  %329 = vmatpush.msra.mxu1 %v4725_v62  ;;  %v4744_v17 = vld [vmem:[%s7135_s23 + $0x120] sm:$0xff]  ;;  %v4766_v61 = vld [vmem:[%s7135_s23 + $0x198] sm:$0xff] }
  0x26   :  { %394 = vmatpush.msrb.mxu3 %v4733_v63  ;;  %434 = vmatpush.msrb.mxu0 %v4739_v0  ;;  %v4772_v62 = vld [vmem:[%s7135_s23 + $0x1b8] sm:$0xff]  ;;  %v4752_v63 = vld [vmem:[%s7135_s23 + $0x148] sm:$0xff]  ;;  %v4757_v0 = vld [vmem:[%s7135_s23 + $0x170] sm:$0xff] }
  0x27   :  { %330 = vmatpush.msra.mxu1 %v4724_v1  ;;  %v4765_v1 = vld [vmem:[%s7135_s23 + $0x190] sm:$0xff] }
  0x28   :  { %395 = vmatpush.msrb.mxu3 %v4732_v2  ;;  %435 = vmatpush.msrb.mxu0 %v4738_v3  ;;  %v4771_v2 = vld [vmem:[%s7135_s23 + $0x1b0] sm:$0xff]  ;;  %v4751_v3 = vld [vmem:[%s7135_s23 + $0x140] sm:$0xff] }
  0x29   :  { %4719 = vmatmul.msk.f32.vlgmr.msrb.gmra.mxu2 %vm66_vm0, %v242_v50 }
  0x2a   :  { %4700 = vmatmul.msk.f32.vlgmr.msrb.gmra.mxu1 %vm66_vm0, %v76_v21  ;;  %563 = vmatpush.msra.mxu3 %v4754_v58 }
  0x2b   :  { %472 = vmatpush.msrb.mxu1 %v4747_v9  ;;  %536 = vmatpush.msrb.mxu2 %v4758_v60  ;;  %v4763_v9 = vld [vmem:[%s7135_s23 + $0x180] sm:$0xff] }
  0x2c   :  { %564 = vmatpush.msra.mxu3 %v4753_v59  ;;  %601 = vmatpush.msra.mxu0 %v4766_v61 }
  0x2d   :  { %473 = vmatpush.msrb.mxu1 %v4746_v10  ;;  %537 = vmatpush.msrb.mxu2 %v4757_v0  ;;  %v4769_v10 = vld [vmem:[%s7135_s23 + $0x1a0] sm:$0xff] }
  0x2e   :  { %565 = vmatpush.msra.mxu3 %v4752_v63  ;;  %602 = vmatpush.msra.mxu0 %v4765_v1  ;;  %v706_v1 = vld [vmem:[%s7110_s5 + $0x18] sm:$0xff] }
  0x2f   :  { %474 = vmatpush.msrb.mxu1 %v4745_v13 }
  0x30   :  { %566 = vmatpush.msra.mxu3 %v4751_v3  ;;  %v704_v3 = vld [vmem:[%s7110_s5 + $0x8] sm:$0xff] }
  0x31   :  { %475 = vmatpush.msrb.mxu1 %v4744_v17  ;;  %v4777_v17 = vld [vmem:[%s7135_s23 + $0x1d0] sm:$0xff] }
  0x32   :  { %4701 = vmatmul.msk.f32.gmra.mxu1 %vm66_vm0, %v78_v34 }
  0x97   :  { %v121_v53 = vpop.f32.mrf.mxu1 }
  0x99   :  { %v269_v14 = vpop.f32.mrf.mxu0 }
  0x9c   :  { %v187_v5 = vpop.f32.mrf.mxu2 }
  0x9e   :  { %v228_v7 = vpop.f32.mrf.mxu3 }
  0x9f   :  { %v124_v4 = vpop.f32.mrf.mxu1 }
  0xa4   :  { %v190_v11 = vpop.f32.mrf.mxu2 }
  0xa6   :  { %v231_v22 = vpop.f32.mrf.mxu3 }
  0xa7   :  { %v148_v6 = vpop.f32.mrf.mxu1 }
  0xa8   :  { %v149_v8 = vadd.f32 %v148_v6, %v121_v53  ;;  %v4770_v6 = vld [vmem:[%s7135_s23 + $0x1a8] sm:$0xff] }
  0xaa   :  { %v193_v12 = vadd.f32 %v187_v5, %v149_v8  ;;  %v4764_v5 = vld [vmem:[%s7135_s23 + $0x188] sm:$0xff]  ;;  %v4755_v8 = vld [vmem:[%s7135_s23 + $0x160] sm:$0xff] }
  0xab   :  { %603 = vmatpush.msra.mxu0 %v4764_v5  ;;  %v751_v5 = vld [vmem:[%s7113_s8 + $0x18] sm:$0xff] }
  0xac   :  { %v234_v15 = vadd.f32 %v228_v7, %v193_v12  ;;  %v272_v25 = vpop.f32.mrf.mxu2 }
  0xad   :  { %604 = vmatpush.msra.mxu0 %v4763_v9  ;;  %v4797_v9 = vld [vmem:[%s7112_s7 + $0x58] sm:$0xff] }
  0xae   :  { %v275_v18 = vadd.f32 %v269_v14, %v234_v15 }
  0xaf   :  { %v151_v19 = vpop.f32.mrf.mxu1 }
  0xb0   :  { %v281_v20 = vadd.f32 %v5208_v16, %v275_v18  ;;  %v152_v21 = vadd.f32 %v151_v19, %v124_v4  ;;  %v4756_v4 = vld [vmem:[%s7135_s23 + $0x168] sm:$0xff] }
  0xb1   :  { %538 = vmatpush.msrb.mxu2 %v4756_v4  ;;  %v703_v4 = vld [vmem:[%s7110_s5] sm:$0xff] }
  0xb2   :  { %v283_v23 = vmax.f32 %v281_v20, 0.0  ;;  %v194_v24 = vadd.f32 %v190_v11, %v152_v21  ;;  %v4776_v20 = vld [vmem:[%s7135_s23 + $0x1c8] sm:$0xff] }
  0xb3   :  { %539 = vmatpush.msrb.mxu2 %v4755_v8 }
  0xb4   :  { %285 = vst.msk [vmem:[#allocation2 + $0x2] sm:$0xff] %vm66_vm0, %v283_v23  ;;  %v235_v26 = vadd.f32 %v231_v22, %v194_v24  ;;  %v5209_v23 = vld [vmem:[%s7137_s22 + $0x1] ss:$0 sm:$0xff] }
  0xb5   :  { %v4775_v24 = vld [vmem:[%s7135_s23 + $0x1c0] sm:$0xff] }
  0xb6   :  { %v276_v27 = vadd.f32 %v272_v25, %v235_v26 }
  0xb8   :  { %v282_v28 = vadd.f32 %v5208_v16, %v276_v27  ;;  %v4778_v16 = vld [vmem:[%s7135_s23 + $0x1d8] sm:$0xff]  ;;  %s4678_s23 = sshll.u32 %s7124_s19, 4  ;;  %s4679_s23 = int_to_ptr.hbm [resolvable:$true] %s4678_s23 }
  0xba   :  { %v284_v29 = vmax.f32 %v282_v28, 0.0 }
  0xbb   :  { %v287_v30 = vld [vmem:[#allocation2] sm:$0xff]  ;;  %v288_v31 = vld [vmem:[#allocation2 + $0x8] sm:$0xf] }
  0xbc   :  { %286 = vst.msk [vmem:[#allocation2 + $0x12] sm:$0xff] %vm66_vm0, %v284_v29  ;;  %4730 = vmatmul.msk.f32.vlgmr.msra.gmra.mxu2 %vm66_vm0, %v287_v30  ;;  %v300_v32 = vrot.slane %v287_v30, 1  ;;  %v301_v33 = vrot.slane %v288_v31, 1  ;;  %v365_v34 = vrot.slane %v287_v30, 2  ;;  %v366_v35 = vrot.slane %v288_v31, 2 }
  0xbd   :  { %v405_v36 = vrot.slane %v287_v30, 3  ;;  %v406_v37 = vrot.slane %v288_v31, 3  ;;  %v445_v52 = vrot.slane %v287_v30, 4  ;;  %v446_v53 = vrot.slane %v288_v31, 4  ;;  %681 = vmatpush.msra.mxu2 %v4778_v16 }
  0xbe   :  { %v302_v38 = vsel %vm88_vm2, %v300_v32, %v301_v33  ;;  %v367_v39 = vsel %vm154_vm3, %v365_v34, %v366_v35 }
  0xbf   :  { %4728 = vmatmul.msk.f32.vlgmr.msra.gmra.mxu1 %vm66_vm0, %v302_v38  ;;  %4736 = vmatmul.msk.f32.vlgmr.msrb.gmra.mxu3 %vm66_vm0, %v367_v39  ;;  %v407_v40 = vsel %vm195_vm4, %v405_v36, %v406_v37  ;;  %v447_v54 = vsel %vm236_vm5, %v445_v52, %v446_v53 }
  0xc0   :  { %4742 = vmatmul.msk.f32.vlgmr.msrb.gmra.mxu0 %vm66_vm0, %v407_v40  ;;  %641 = vmatpush.msra.mxu1 %v4772_v62 }
  0xc1   :  { %682 = vmatpush.msra.mxu2 %v4777_v17  ;;  %729 = vmatpush.msrb.mxu3 %v706_v1  ;;  %v4808_v1 = vld [vmem:[%s7112_s7 + $0x60] sm:$0xff] }
  0xc2   :  { %642 = vmatpush.msra.mxu1 %v4771_v2  ;;  %v705_v2 = vld [vmem:[%s7110_s5 + $0x10] sm:$0xff]  ;;  %774 = vmatpush.msrb.mxu0 %v751_v5 }
  0xc3   :  { %v289_v41 = vld [vmem:[#allocation2 + $0x10] sm:$0xff]  ;;  %v290_v42 = vld [vmem:[#allocation2 + $0x18] sm:$0xf]  ;;  %683 = vmatpush.msra.mxu2 %v4776_v20  ;;  %730 = vmatpush.msrb.mxu3 %v705_v2 }
  0xc4   :  { %4731 = vmatmul.msk.f32.gmra.mxu2 %vm66_vm0, %v289_v41  ;;  %v303_v43 = vrot.slane %v289_v41, 1  ;;  %v304_v44 = vrot.slane %v290_v42, 1  ;;  %v368_v45 = vrot.slane %v289_v41, 2  ;;  %v369_v46 = vrot.slane %v290_v42, 2  ;;  %643 = vmatpush.msra.mxu1 %v4770_v6  ;;  %v788_v6 = vld [vmem:[%s7112_s7 + $0x18] sm:$0xff] }
  0xc5   :  { %v408_v47 = vrot.slane %v289_v41, 3  ;;  %v409_v48 = vrot.slane %v290_v42, 3  ;;  %v448_v55 = vrot.slane %v289_v41, 4  ;;  %v449_v56 = vrot.slane %v290_v42, 4  ;;  %684 = vmatpush.msra.mxu2 %v4775_v24  ;;  %731 = vmatpush.msrb.mxu3 %v704_v3 }
  0xc6   :  { %v305_v49 = vsel %vm88_vm2, %v303_v43, %v304_v44  ;;  %v370_v50 = vsel %vm154_vm3, %v368_v45, %v369_v46  ;;  %644 = vmatpush.msra.mxu1 %v4769_v10 }
  0xc7   :  { %4729 = vmatmul.msk.f32.gmra.mxu1 %vm66_vm0, %v305_v49  ;;  %4737 = vmatmul.msk.f32.gmra.mxu3 %vm66_vm0, %v370_v50  ;;  %v410_v51 = vsel %vm195_vm4, %v408_v47, %v409_v48  ;;  %v450_v57 = vsel %vm236_vm5, %v448_v55, %v449_v56 }
  0xc8   :  { %4743 = vmatmul.msk.f32.gmra.mxu0 %vm66_vm0, %v410_v51  ;;  %732 = vmatpush.msrb.mxu3 %v703_v4 }
  0xcf   :  { %4748 = vmatmul.msk.f32.vlgmr.msrb.gmra.mxu1 %vm66_vm0, %v447_v54 }
  0xd0   :  { %801 = vmatpush.msrb.mxu1 %v788_v6 }
  0xd7   :  { %4749 = vmatmul.msk.f32.gmra.mxu1 %vm66_vm0, %v450_v57 }
 0x13c   :  { %v332_v7 = vpop.f32.mrf.mxu1 }
 0x13d   :  { %v437_v18 = vpop.f32.mrf.mxu0 }
 0x13f   :  { %v359_v11 = vpop.f32.mrf.mxu2 }
 0x140   :  { %v360_v13 = vadd.f32 %v359_v11, %v332_v7  ;;  %v4791_v7 = vld [vmem:[%s7112_s7 + $0x38] sm:$0xff] }
 0x142   :  { %v397_v12 = vpop.f32.mrf.mxu3 }
 0x143   :  { %v403_v15 = vadd.f32 %v397_v12, %v360_v13 }
 0x144   :  { %v335_v14 = vpop.f32.mrf.mxu1 }
 0x145   :  { %v443_v22 = vadd.f32 %v437_v18, %v403_v15  ;;  %v440_v31 = vpop.f32.mrf.mxu0 }
 0x147   :  { %v362_v19 = vpop.f32.mrf.mxu2 }
 0x148   :  { %v363_v21 = vadd.f32 %v362_v19, %v335_v14  ;;  %v5210_v19 = vld [vmem:[%s7137_s22 + $0x2] ss:$0 sm:$0xff] }
 0x14a   :  { %v400_v25 = vpop.f32.mrf.mxu3 }
 0x14b   :  { %v404_v28 = vadd.f32 %v400_v25, %v363_v21 }
 0x14c   :  { %v477_v26 = vpop.f32.mrf.mxu1 }
 0x14d   :  { %v483_v27 = vadd.f32 %v477_v26, %v443_v22  ;;  %v444_v32 = vadd.f32 %v440_v31, %v404_v28 }
 0x14f   :  { %v490_v29 = vadd.f32 %v5209_v23, %v483_v27 }
 0x151   :  { %v492_v30 = vmax.f32 %v490_v29, 0.0 }
 0x153   :  { %494 = vst.msk [vmem:[#allocation2 + $0x2] sm:$0xff] %vm66_vm0, %v492_v30 }
 0x154   :  { %v480_v33 = vpop.f32.mrf.mxu1 }
 0x155   :  { %v484_v34 = vadd.f32 %v480_v33, %v444_v32  ;;  %v750_v32 = vld [vmem:[%s7113_s8 + $0x10] sm:$0xff] }
 0x156   :  { %v787_v33 = vld [vmem:[%s7112_s7 + $0x10] sm:$0xff]  ;;  %775 = vmatpush.msrb.mxu0 %v750_v32 }
 0x157   :  { %v491_v35 = vadd.f32 %v5209_v23, %v484_v34  ;;  %v4790_v34 = vld [vmem:[%s7112_s7 + $0x30] sm:$0xff]  ;;  %802 = vmatpush.msrb.mxu1 %v787_v33 }
 0x159   :  { %v493_v36 = vmax.f32 %v491_v35, 0.0  ;;  %v4796_v35 = vld [vmem:[%s7112_s7 + $0x50] sm:$0xff] }
 0x15a   :  { %v496_v37 = vld [vmem:[#allocation2] sm:$0xff]  ;;  %v497_v38 = vld [vmem:[#allocation2 + $0x8] sm:$0xf] }
 0x15b   :  { %495 = vst.msk [vmem:[#allocation2 + $0x12] sm:$0xff] %vm66_vm0, %v493_v36  ;;  %4761 = vmatmul.msk.f32.vlgmr.msra.gmra.mxu3 %vm66_vm0, %v496_v37  ;;  %v509_v39 = vrot.slane %v496_v37, 1  ;;  %v510_v40 = vrot.slane %v497_v38, 1  ;;  %v574_v41 = vrot.slane %v496_v37, 2  ;;  %v575_v42 = vrot.slane %v497_v38, 2  ;;  %v749_v36 = vld [vmem:[%s7113_s8 + $0x8] sm:$0xff] }
 0x15c   :  { %v614_v43 = vrot.slane %v496_v37, 3  ;;  %v615_v44 = vrot.slane %v497_v38, 3  ;;  %v654_v59 = vrot.slane %v496_v37, 4  ;;  %v655_v60 = vrot.slane %v497_v38, 4  ;;  %857 = vmatpush.msra.mxu3 %v4797_v9  ;;  %v786_v37 = vld [vmem:[%s7112_s7 + $0x8] sm:$0xff]  ;;  %776 = vmatpush.msrb.mxu0 %v749_v36 }
 0x15d   :  { %v511_v45 = vsel %vm88_vm2, %v509_v39, %v510_v40  ;;  %v576_v46 = vsel %vm154_vm3, %v574_v41, %v575_v42  ;;  %v4789_v38 = vld [vmem:[%s7112_s7 + $0x28] sm:$0xff]  ;;  %803 = vmatpush.msrb.mxu1 %v786_v37  ;;  %v748_v40 = vld [vmem:[%s7113_s8] sm:$0xff] }
 0x15e   :  { %4759 = vmatmul.msk.f32.vlgmr.msrb.gmra.mxu2 %vm66_vm0, %v511_v45  ;;  %4767 = vmatmul.msk.f32.vlgmr.msra.gmra.mxu0 %vm66_vm0, %v576_v46  ;;  %v616_v47 = vsel %vm195_vm4, %v614_v43, %v615_v44  ;;  %v656_v61 = vsel %vm236_vm5, %v654_v59, %v655_v60  ;;  %v4795_v39 = vld [vmem:[%s7112_s7 + $0x48] sm:$0xff]  ;;  %v785_v41 = vld [vmem:[%s7112_s7] sm:$0xff]  ;;  %v743_v45 = vstv %s7139_s28  ;;  %v4811_v59 = vld [vmem:[%s7112_s7 + $0x78] sm:$0xff]  ;;  %s5385_s28 = smov 8  }
 0x15f   :  { %4773 = vmatmul.msk.f32.vlgmr.msra.gmra.mxu1 %vm66_vm0, %v616_v47  ;;  %829 = vmatpush.msrb.mxu2 %v4791_v7  ;;  %v4788_v42 = vld [vmem:[%s7112_s7 + $0x20] sm:$0xff] }
 0x160   :  { %858 = vmatpush.msra.mxu3 %v4796_v35  ;;  %v4794_v43 = vld [vmem:[%s7112_s7 + $0x40] sm:$0xff]  ;;  %777 = vmatpush.msrb.mxu0 %v748_v40 }
 0x161   :  { %830 = vmatpush.msrb.mxu2 %v4790_v34  ;;  %804 = vmatpush.msrb.mxu1 %v785_v41  ;;  %v740_v44 = vld [vmem:[%s7138_s3] sm:$0xff] }
 0x162   :  { %v498_v48 = vld [vmem:[#allocation2 + $0x10] sm:$0xff]  ;;  %v499_v49 = vld [vmem:[#allocation2 + $0x18] sm:$0xf]  ;;  %859 = vmatpush.msra.mxu3 %v4795_v39  ;;  %v5211_v46 = vld [vmem:[%s7111_s6] ss:$0 sm:$0xff]  ;;  %v744_v47 = vmul.f32 %v743_v45, %v740_v44 }
 0x163   :  { %4762 = vmatmul.msk.f32.gmra.mxu3 %vm66_vm0, %v498_v48  ;;  %v512_v50 = vrot.slane %v498_v48, 1  ;;  %v513_v51 = vrot.slane %v499_v49, 1  ;;  %v577_v52 = vrot.slane %v498_v48, 2  ;;  %v578_v53 = vrot.slane %v499_v49, 2  ;;  %831 = vmatpush.msrb.mxu2 %v4789_v38 }
 0x164   :  { %v617_v54 = vrot.slane %v498_v48, 3  ;;  %v618_v55 = vrot.slane %v499_v49, 3  ;;  %v657_v62 = vrot.slane %v498_v48, 4  ;;  %v658_v63 = vrot.slane %v499_v49, 4  ;;  %860 = vmatpush.msra.mxu3 %v4794_v43 }
 0x165   :  { %v514_v56 = vsel %vm88_vm2, %v512_v50, %v513_v51  ;;  %v579_v57 = vsel %vm154_vm3, %v577_v52, %v578_v53  ;;  %832 = vmatpush.msrb.mxu2 %v4788_v42  ;;  %v741_v51 = vld [vmem:[%s7138_s3 + $0x8] sm:$0xff] }
 0x166   :  { %4760 = vmatmul.msk.f32.gmra.mxu2 %vm66_vm0, %v514_v56  ;;  %4768 = vmatmul.msk.f32.gmra.mxu0 %vm66_vm0, %v579_v57  ;;  %v619_v58 = vsel %vm195_vm4, %v617_v54, %v618_v55  ;;  %v659_v0 = vsel %vm236_vm5, %v657_v62, %v658_v63  ;;  %v745_v52 = vmul.f32 %v743_v45, %v741_v51  ;;  %v4810_v62 = vld [vmem:[%s7112_s7 + $0x70] sm:$0xff]  ;;  %v1017_v51 = vld [vmem:[%s7114_s9] sm:$0xff] }
 0x167   :  { %4774 = vmatmul.msk.f32.gmra.mxu1 %vm66_vm0, %v619_v58 }
 0x16e   :  { %4779 = vmatmul.msk.f32.vlgmr.msra.gmra.mxu2 %vm66_vm0, %v656_v61 }
 0x176   :  { %4780 = vmatmul.msk.f32.gmra.mxu2 %vm66_vm0, %v659_v0  ;;  %v4809_v0 = vld [vmem:[%s7112_s7 + $0x68] sm:$0xff] }
 0x1db   :  { %v606_v12 = vpop.f32.mrf.mxu0 }
 0x1dc   :  { %v646_v15 = vpop.f32.mrf.mxu1 }
 0x1de   :  { %v568_v10 = vpop.f32.mrf.mxu3 }
 0x1e1   :  { %v541_v8 = vpop.f32.mrf.mxu2 }
 0x1e2   :  { %v569_v11 = vadd.f32 %v568_v10, %v541_v8 }
 0x1e3   :  { %v609_v22 = vpop.f32.mrf.mxu0 }
 0x1e4   :  { %v612_v14 = vadd.f32 %v606_v12, %v569_v11  ;;  %v649_v26 = vpop.f32.mrf.mxu1 }
 0x1e6   :  { %v571_v16 = vpop.f32.mrf.mxu3  ;;  %v652_v18 = vadd.f32 %v646_v15, %v612_v14 }
 0x1e9   :  { %v544_v13 = vpop.f32.mrf.mxu2 }
 0x1ea   :  { %v572_v17 = vadd.f32 %v571_v16, %v544_v13 }
 0x1ec   :  { %v613_v23 = vadd.f32 %v609_v22, %v572_v17  ;;  %v4823_v22 = vld [vmem:[%s7112_s7 + $0xb8] sm:$0xff] }
 0x1ee   :  { %v653_v27 = vadd.f32 %v649_v26, %v613_v23  ;;  %v4822_v23 = vld [vmem:[%s7112_s7 + $0xb0] sm:$0xff]  ;;  %v4820_v26 = vld [vmem:[%s7112_s7 + $0xa0] sm:$0xff] }
 0x1f1   :  { %v686_v20 = vpop.f32.mrf.mxu2 }
 0x1f2   :  { %v692_v21 = vadd.f32 %v686_v20, %v652_v18  ;;  %v4817_v18 = vld [vmem:[%s7112_s7 + $0x98] sm:$0xff]  ;;  %v4815_v20 = vld [vmem:[%s7112_s7 + $0x88] sm:$0xff] }
 0x1f4   :  { %v699_v24 = vadd.f32 %v5210_v19, %v692_v21  ;;  %v4814_v21 = vld [vmem:[%s7112_s7 + $0x80] sm:$0xff] }
 0x1f6   :  { %v701_v25 = vmax.f32 %v699_v24, 0.0  ;;  %v4821_v24 = vld [vmem:[%s7112_s7 + $0xa8] sm:$0xff] }
 0x1f8   :  { %4782 = vmatmul.msk.f32.vlgmr.msrb.gmra.mxu3 %vm66_vm0, %v701_v25 }
 0x1f9   :  { %v689_v28 = vpop.f32.mrf.mxu2 }
 0x1fa   :  { %v693_v29 = vadd.f32 %v689_v28, %v653_v27 }
 0x1fc   :  { %v700_v30 = vadd.f32 %v5210_v19, %v693_v29  ;;  %v4816_v19 = vld [vmem:[%s7112_s7 + $0x90] sm:$0xff] }
 0x1fe   :  { %v702_v31 = vmax.f32 %v700_v30, 0.0 }
 0x200   :  { %4783 = vmatmul.msk.f32.gmra.mxu3 %vm66_vm0, %v702_v31 }
 0x27b   :  { %v734_v48 = vpop.f32.mrf.mxu3 }
 0x27c   :  { %v735_v49 = vadd.f32 %v5211_v46, %v734_v48 }
 0x27e   :  { %v5821_v50 = vadd.f32 %v744_v47, %v735_v49 }
 0x280   :  { %4784 = vmatmul.msk.f32.vlgmr.msrb.gmra.mxu0 %vm66_vm0, %v5821_v50  ;;  %4786 = vmatmul.msk.f32.vlgmr.msrb.gmra.mxu1 %vm66_vm0, %v5821_v50 }
 0x281   :  { %4792 = vmatmul.msk.f32.vlgmr.msrb.gmra.mxu2 %vm66_vm0, %v5821_v50  ;;  %4798 = vmatmul.msk.f32.vlgmr.msra.gmra.mxu3 %vm66_vm0, %v5821_v50 }
 0x283   :  { %v737_v53 = vpop.f32.mrf.mxu3 }
 0x284   :  { %v738_v54 = vadd.f32 %v5211_v46, %v737_v53 }
 0x286   :  { %v5834_v55 = vadd.f32 %v745_v52, %v738_v54 }
 0x288   :  { %4785 = vmatmul.msk.f32.gmra.mxu0 %vm66_vm0, %v5834_v55  ;;  %4787 = vmatmul.msk.f32.gmra.mxu1 %vm66_vm0, %v5834_v55 }
 0x289   :  { %4793 = vmatmul.msk.f32.gmra.mxu2 %vm66_vm0, %v5834_v55  ;;  %4799 = vmatmul.msk.f32.gmra.mxu3 %vm66_vm0, %v5834_v55 }
 0x2fd   :  { %v806_v58 = vpop.f32.mrf.mxu1  ;;  %v5864_v2 = vpop.f32.mrf.mxu0 }
 0x304   :  { %v834_v56 = vpop.f32.mrf.mxu2  ;;  %v862_v57 = vpop.f32.mrf.mxu3 }
 0x305   :  { %4800 = vmatpush.xpose.msk.msra.mxu0 %vm868_vm6, %v834_v56  ;;  %989 = vmatpush.msra.mxu2 %v862_v57  ;;  %v809_v63 = vpop.f32.mrf.mxu1  ;;  %v5866_v3 = vpop.f32.mrf.mxu0  ;;  %v4840_v57 = vld [vmem:[%s7112_s7 + $0xd8] sm:$0xff] }
 0x307   :  { %1094 = vmatpush.msrb.mxu2 %v4817_v18 }
 0x308   :  { %4801 = vmatmul.msk.f32.vlgmr.msra.gmra.mxu0 %vm868_vm6, %v806_v58 }
 0x309   :  { %1095 = vmatpush.msrb.mxu2 %v4816_v19  ;;  %1039 = vmatpush.msrb.mxu0 %v1017_v51  ;;  %v4846_v19 = vld [vmem:[%s7112_s7 + $0xf8] sm:$0xff] }
 0x30b   :  { %1096 = vmatpush.msrb.mxu2 %v4815_v20  ;;  %v4845_v20 = vld [vmem:[%s7112_s7 + $0xf0] sm:$0xff] }
 0x30c   :  { %v837_v60 = vpop.f32.mrf.mxu2  ;;  %v865_v61 = vpop.f32.mrf.mxu3 }
 0x30d   :  { %4802 = vmatpush.xpose.msk.msra.mxu1 %vm868_vm6, %v837_v60  ;;  %1012 = vmatpush.msrb.mxu3 %v865_v61  ;;  %v4839_v60 = vld [vmem:[%s7112_s7 + $0xd0] sm:$0xff] }
 0x30e   :  { %1097 = vmatpush.msrb.mxu2 %v4814_v21  ;;  %v4844_v21 = vld [vmem:[%s7112_s7 + $0xe8] sm:$0xff] }
 0x30f   :  { %1122 = vmatpush.msra.mxu3 %v4823_v22  ;;  %v4843_v22 = vld [vmem:[%s7112_s7 + $0xe0] sm:$0xff] }
 0x310   :  { %4803 = vmatmul.msk.f32.vlgmr.msra.gmra.mxu1 %vm868_vm6, %v809_v63  ;;  %v4837_v63 = vld [vmem:[%s7112_s7 + $0xc0] sm:$0xff] }
 0x311   :  { %1066 = vmatpush.msrb.mxu1 %v4811_v59  ;;  %1123 = vmatpush.msra.mxu3 %v4822_v23  ;;  %v4852_v23 = vld [vmem:[%s7112_s7 + $0x118] sm:$0xff] }
 0x313   :  { %1067 = vmatpush.msrb.mxu1 %v4810_v62  ;;  %1124 = vmatpush.msra.mxu3 %v4821_v24  ;;  %v4838_v62 = vld [vmem:[%s7112_s7 + $0xc8] sm:$0xff]  ;;  %v4851_v24 = vld [vmem:[%s7112_s7 + $0x110] sm:$0xff] }
 0x315   :  { %1068 = vmatpush.msrb.mxu1 %v4809_v0  ;;  %1125 = vmatpush.msra.mxu3 %v4820_v26 }
 0x317   :  { %1069 = vmatpush.msrb.mxu1 %v4808_v1 }
 0x318   :  { %4812 = vmatmul.msk.f32.vlgmr.msrb.gmra.mxu1 %vm66_vm0, %v5821_v50 }
 0x320   :  { %4813 = vmatmul.msk.f32.gmra.mxu1 %vm66_vm0, %v5834_v55 }
 0x385   :  { %v892_v4 = vpop.f32.mrf.mxu0 }
 0x386   :  { %v921_v5 = vsel %vm868_vm6, %v892_v4, -inf }
 0x387   :  { %922 = vmax.xlane.f32.xlu0 %v921_v5 }
 0x38d   :  { %v918_v6 = vpop.f32.mrf.mxu1 }
 0x38e   :  { %v924_v7 = vsel %vm868_vm6, %v918_v6, -inf }
 0x38f   :  { %925 = vmax.xlane.f32.xlu0 %v924_v7 }
 0x395   :  { %v1071_v56 = vpop.f32.mrf.mxu1 }
 0x39d   :  { %v1074_v61 = vpop.f32.mrf.mxu1 }
 0x3fa   :  { %v923_v8 = vpop.xlane.xlu0 %922 }
 0x3fb   :  { %v927_v9 = vsub.f32 %v892_v4, %v923_v8 }
 0x3fd   :  { %v929_v10 = vmul.f32 1.442695, %v927_v9 }
 0x3ff   :  { %5233 = vpow2.f32 %v929_v10 }
 0x402   :  { %v926_v11 = vpop.xlane.xlu0 %925 }
 0x403   :  { %v928_v12 = vsub.f32 %v918_v6, %v926_v11 }
 0x405   :  { %v5234_v13 = vpop.eup %5233  ;;  %v931_v14 = vmul.f32 1.442695, %v928_v12 }
 0x406   :  { %v933_v15 = vsel %vm868_vm6, %v5234_v13, 0.0 }
 0x407   :  { %5235 = vpow2.f32 %v931_v14  ;;  %934 = vadd.xlane.f32.xlu1 %v933_v15 }
 0x40d   :  { %v5236_v16 = vpop.eup %5235 }
 0x40e   :  { %v936_v17 = vsel %vm868_vm6, %v5236_v16, 0.0 }
 0x40f   :  { %937 = vadd.xlane.f32.xlu1 %v936_v17 }
 0x47a   :  { %v935_v25 = vpop.xlane.xlu1 %934 }
 0x47b   :  { %5237 = vrcp.f32 %v935_v25  ;;  %v950_v31 = vand.u32 2147483648, %v935_v25  ;;  %v948_v33 = vand.u32 2147483647, %v935_v25  ;;  %vm944_vm8 = vweird.f32 %v935_v25 }
 0x47d   :  { %v951_v36 = vor.u32 1.1754944e-38, %v950_v31  ;;  %vm949_vm10 = vcmp.eq.f32.partialorder %v948_v33, 8.507059e+37 }
 0x481   :  { %v5238_v27 = vpop.eup %5237 }
 0x482   :  { %v940_v28 = vmul.f32 %v5238_v27, %v935_v25  ;;  %v938_v29 = vpop.xlane.xlu1 %937  ;;  %vm945_vm7 = vweird.f32 %v5238_v27  ;;  %v4850_v25 = vld [vmem:[%s7112_s7 + $0x108] sm:$0xff] }
 0x483   :  { %5239 = vrcp.f32 %v938_v29  ;;  %vm946_vm9 = vmor %vm944_vm8, %vm945_vm7  ;;  %v965_v42 = vand.u32 2147483648, %v938_v29  ;;  %v963_v44 = vand.u32 2147483647, %v938_v29  ;;  %vm959_vm12 = vweird.f32 %v938_v29 }
 0x484   :  { %v941_v30 = vsub.f32 1.0, %v940_v28 }
 0x485   :  { %v966_v46 = vor.u32 1.1754944e-38, %v965_v42  ;;  %vm964_vm14 = vcmp.eq.f32.partialorder %v963_v44, 8.507059e+37 }
 0x486   :  { %v942_v32 = vmul.f32 %v5238_v27, %v941_v30 }
 0x488   :  { %v943_v34 = vadd.f32 %v5238_v27, %v942_v32 }
 0x489   :  { %v5240_v35 = vpop.eup %5239 }
 0x48a   :  { %v947_v37 = vsel %vm946_vm9, %v5238_v27, %v943_v34  ;;  %v955_v38 = vmul.f32 %v5240_v35, %v938_v29  ;;  %vm960_vm11 = vweird.f32 %v5240_v35  ;;  %v4849_v27 = vld [vmem:[%s7112_s7 + $0x100] sm:$0xff] }
 0x48b   :  { %v952_v39 = vsel %vm949_vm10, %v951_v36, %v947_v37  ;;  %vm961_vm13 = vmor %vm959_vm12, %vm960_vm11 }
 0x48c   :  { %v956_v40 = vsub.f32 1.0, %v955_v38  ;;  %v953_v41 = vmul.f32 %v5234_v13, %v952_v39 }
 0x48e   :  { %v957_v43 = vmul.f32 %v5240_v35, %v956_v40  ;;  %969 = vst.msk [vmem:[%s7125_s20] sm:$0xff] %vm868_vm6, %v953_v41  ;;  %4804 = vmatmul.msk.f32.vlgmr.msra.gmra.mxu2 %vm868_vm6, %v953_v41 }
 0x490   :  { %v958_v45 = vadd.f32 %v5240_v35, %v957_v43 }
 0x492   :  { %v962_v47 = vsel %vm961_vm13, %v5240_v35, %v958_v45 }
 0x493   :  { %v967_v48 = vsel %vm964_vm14, %v966_v46, %v962_v47 }
 0x494   :  { %v968_v49 = vmul.f32 %v5236_v16, %v967_v48 }
 0x496   :  { %970 = vst.msk [vmem:[%s7125_s20 + $0x8] sm:$0xff] %vm868_vm6, %v968_v49  ;;  %4805 = vmatmul.msk.f32.vlgmr.msrb.gmra.mxu3 %vm868_vm6, %v968_v49  ;;  %4818 = vmatmul.msk.f32.vlgmr.msrb.gmra.mxu2 %vm66_vm0, %v5821_v50 }
 0x49e   :  { %4819 = vmatmul.msk.f32.gmra.mxu2 %vm66_vm0, %v5834_v55  ;;  %4824 = vmatmul.msk.f32.vlgmr.msra.gmra.mxu3 %vm66_vm0, %v5821_v50 }
 0x4a6   :  { %4825 = vmatmul.msk.f32.gmra.mxu3 %vm66_vm0, %v5834_v55 }
 0x511   :  { %v991_v52 = vpop.f32.mrf.mxu2 }
 0x512   :  { %4806 = vmatmul.msk.f32.vlgmr.msrb.gmra.mxu0 %vm868_vm6, %v991_v52  ;;  %v4834_v52 = vld [vmem:[%s7114_s9 + $0x8] sm:$0xff] }
 0x519   :  { %v1014_v53 = vpop.f32.mrf.mxu3  ;;  %v1099_v54 = vpop.f32.mrf.mxu2 }
 0x51a   :  { %4807 = vmatmul.msk.f32.gmra.mxu0 %vm868_vm6, %v1014_v53 }
 0x51b   :  { %4826 = vmatpush.xpose.msk.msra.mxu0 %vm868_vm6, %v1099_v54 }
 0x51f   :  { %1305 = vmatpush.msrb.mxu0 %v4834_v52 }
 0x521   :  { %v1102_v58 = vpop.f32.mrf.mxu2  ;;  %v1127_v59 = vpop.f32.mrf.mxu3 }
 0x522   :  { %4827 = vmatmul.msk.f32.vlgmr.msra.gmra.mxu0 %vm868_vm6, %v1071_v56  ;;  %4828 = vmatpush.xpose.msk.msra.mxu1 %vm868_vm6, %v1102_v58  ;;  %v4869_v58 = vld [vmem:[%s7112_s7 + $0x138] sm:$0xff] }
 0x523   :  { %1254 = vmatpush.msra.mxu2 %v1127_v59 }
 0x525   :  { %4829 = vmatmul.msk.f32.vlgmr.msra.gmra.mxu1 %vm868_vm6, %v1074_v61  ;;  %1360 = vmatpush.msrb.mxu2 %v4846_v19  ;;  %v4868_v61 = vld [vmem:[%s7112_s7 + $0x130] sm:$0xff] }
 0x526   :  { %1332 = vmatpush.msrb.mxu1 %v4840_v57 }
 0x527   :  { %1361 = vmatpush.msrb.mxu2 %v4845_v20 }
 0x528   :  { %1333 = vmatpush.msrb.mxu1 %v4839_v60 }
 0x529   :  { %v1130_v0 = vpop.f32.mrf.mxu3  ;;  %1362 = vmatpush.msrb.mxu2 %v4844_v21 }
 0x52a   :  { %1334 = vmatpush.msrb.mxu1 %v4838_v62  ;;  %1277 = vmatpush.msrb.mxu3 %v1130_v0  ;;  %v4866_v0 = vld [vmem:[%s7112_s7 + $0x120] sm:$0xff] }
 0x52b   :  { %1363 = vmatpush.msrb.mxu2 %v4843_v22  ;;  %v4875_v22 = vld [vmem:[%s7112_s7 + $0x158] sm:$0xff] }
 0x52c   :  { %1335 = vmatpush.msrb.mxu1 %v4837_v63  ;;  %1388 = vmatpush.msra.mxu3 %v4852_v23  ;;  %v4867_v63 = vld [vmem:[%s7112_s7 + $0x128] sm:$0xff]  ;;  %v4874_v23 = vld [vmem:[%s7112_s7 + $0x150] sm:$0xff] }
 0x52d   :  { %4841 = vmatmul.msk.f32.vlgmr.msrb.gmra.mxu1 %vm66_vm0, %v5821_v50 }
 0x52e   :  { %1389 = vmatpush.msra.mxu3 %v4851_v24  ;;  %v4881_v24 = vld [vmem:[%s7112_s7 + $0x178] sm:$0xff] }
 0x530   :  { %1390 = vmatpush.msra.mxu3 %v4850_v25  ;;  %v4873_v25 = vld [vmem:[%s7112_s7 + $0x148] sm:$0xff] }
 0x532   :  { %1391 = vmatpush.msra.mxu3 %v4849_v27  ;;  %v4872_v27 = vld [vmem:[%s7112_s7 + $0x140] sm:$0xff] }
 0x535   :  { %4842 = vmatmul.msk.f32.gmra.mxu1 %vm66_vm0, %v5834_v55 }
 0x58f   :  { %v5939_v1 = vpop.f32.mrf.mxu0 }
 0x597   :  { %v5941_v4 = vpop.f32.mrf.mxu0 }
 0x59f   :  { %v1156_v5 = vpop.f32.mrf.mxu0 }
 0x5a0   :  { %v1185_v6 = vsel %vm868_vm6, %v1156_v5, -inf }
 0x5a1   :  { %1186 = vmax.xlane.f32.xlu2 %v1185_v6 }
 0x5a2   :  { %v1182_v7 = vpop.f32.mrf.mxu1 }
 0x5a3   :  { %v1188_v8 = vsel %vm868_vm6, %v1182_v7, -inf }
 0x5a9   :  { %1189 = vmax.xlane.f32.xlu2 %v1188_v8 }
 0x5aa   :  { %v1337_v57 = vpop.f32.mrf.mxu1 }
 0x5b2   :  { %v1340_v62 = vpop.f32.mrf.mxu1 }
 0x614   :  { %v1187_v9 = vpop.xlane.xlu2 %1186 }
 0x615   :  { %v1191_v10 = vsub.f32 %v1156_v5, %v1187_v9 }
 0x617   :  { %v1193_v11 = vmul.f32 1.442695, %v1191_v10 }
 0x619   :  { %5241 = vpow2.f32 %v1193_v11 }
 0x61c   :  { %v1190_v12 = vpop.xlane.xlu2 %1189 }
 0x61d   :  { %v1192_v13 = vsub.f32 %v1182_v7, %v1190_v12 }
 0x61f   :  { %v5242_v14 = vpop.eup %5241  ;;  %v1195_v15 = vmul.f32 1.442695, %v1192_v13 }
 0x620   :  { %v1197_v16 = vsel %vm868_vm6, %v5242_v14, 0.0 }
 0x621   :  { %5243 = vpow2.f32 %v1195_v15  ;;  %1198 = vadd.xlane.f32.xlu0 %v1197_v16 }
 0x627   :  { %v5244_v17 = vpop.eup %5243 }
 0x628   :  { %v1200_v18 = vsel %vm868_vm6, %v5244_v17, 0.0 }
 0x629   :  { %1201 = vadd.xlane.f32.xlu1 %v1200_v18 }
 0x694   :  { %v1199_v26 = vpop.xlane.xlu0 %1198 }
 0x695   :  { %5245 = vrcp.f32 %v1199_v26  ;;  %v1214_v32 = vand.u32 2147483648, %v1199_v26  ;;  %v1212_v34 = vand.u32 2147483647, %v1199_v26  ;;  %vm1208_vm1 = vweird.f32 %v1199_v26 }
 0x697   :  { %v1215_v37 = vor.u32 1.1754944e-38, %v1214_v32  ;;  %vm1213_vm3 = vcmp.eq.f32.partialorder %v1212_v34, 8.507059e+37 }
 0x69b   :  { %v5246_v28 = vpop.eup %5245 }
 0x69c   :  { %v1204_v29 = vmul.f32 %v5246_v28, %v1199_v26  ;;  %v1202_v30 = vpop.xlane.xlu1 %1201  ;;  %vm1209_vm15 = vweird.f32 %v5246_v28  ;;  %v4880_v26 = vld [vmem:[%s7112_s7 + $0x170] sm:$0xff] }
 0x69d   :  { %5247 = vrcp.f32 %v1202_v30  ;;  %vm1210_vm2 = vmor %vm1208_vm1, %vm1209_vm15  ;;  %v1229_v43 = vand.u32 2147483648, %v1202_v30  ;;  %v1227_v45 = vand.u32 2147483647, %v1202_v30  ;;  %vm1223_vm5 = vweird.f32 %v1202_v30 }
 0x69e   :  { %v1205_v31 = vsub.f32 1.0, %v1204_v29  ;;  %v4878_v29 = vld [vmem:[%s7112_s7 + $0x160] sm:$0xff] }
 0x69f   :  { %v1230_v47 = vor.u32 1.1754944e-38, %v1229_v43  ;;  %vm1228_vm8 = vcmp.eq.f32.partialorder %v1227_v45, 8.507059e+37 }
 0x6a0   :  { %v1206_v33 = vmul.f32 %v5246_v28, %v1205_v31 }
 0x6a2   :  { %v1207_v35 = vadd.f32 %v5246_v28, %v1206_v33 }
 0x6a3   :  { %v5248_v36 = vpop.eup %5247 }
 0x6a4   :  { %v1211_v38 = vsel %vm1210_vm2, %v5246_v28, %v1207_v35  ;;  %v1219_v39 = vmul.f32 %v5248_v36, %v1202_v30  ;;  %vm1224_vm4 = vweird.f32 %v5248_v36  ;;  %v4879_v28 = vld [vmem:[%s7112_s7 + $0x168] sm:$0xff] }
 0x6a5   :  { %v1216_v40 = vsel %vm1213_vm3, %v1215_v37, %v1211_v38  ;;  %vm1225_vm7 = vmor %vm1223_vm5, %vm1224_vm4 }
 0x6a6   :  { %v1220_v41 = vsub.f32 1.0, %v1219_v39  ;;  %v1217_v42 = vmul.f32 %v5242_v14, %v1216_v40 }
 0x6a8   :  { %v1221_v44 = vmul.f32 %v5248_v36, %v1220_v41  ;;  %4830 = vst.msk [vmem:[%s7125_s20 + $0x10] sm:$0xff] %vm868_vm6, %v1217_v42  ;;  %4832 = vmatmul.msk.f32.vlgmr.msra.gmra.mxu2 %vm868_vm6, %v1217_v42 }
 0x6aa   :  { %v1222_v46 = vadd.f32 %v5248_v36, %v1221_v44 }
 0x6ac   :  { %v1226_v48 = vsel %vm1225_vm7, %v5248_v36, %v1222_v46 }
 0x6ad   :  { %v1231_v49 = vsel %vm1228_vm8, %v1230_v47, %v1226_v48 }
 0x6ae   :  { %v1232_v51 = vmul.f32 %v5244_v17, %v1231_v49 }
 0x6b0   :  { %4831 = vst.msk [vmem:[%s7125_s20 + $0x18] sm:$0xff] %vm868_vm6, %v1232_v51  ;;  %4833 = vmatmul.msk.f32.vlgmr.msrb.gmra.mxu3 %vm868_vm6, %v1232_v51  ;;  %4847 = vmatmul.msk.f32.vlgmr.msrb.gmra.mxu2 %vm66_vm0, %v5821_v50 }
 0x6b8   :  { %4848 = vmatmul.msk.f32.gmra.mxu2 %vm66_vm0, %v5834_v55  ;;  %4853 = vmatmul.msk.f32.vlgmr.msra.gmra.mxu3 %vm66_vm0, %v5821_v50 }
 0x6c0   :  { %4854 = vmatmul.msk.f32.gmra.mxu3 %vm66_vm0, %v5834_v55 }
 0x72b   :  { %v1256_v53 = vpop.f32.mrf.mxu2 }
 0x72c   :  { %4835 = vmatmul.msk.f32.vlgmr.msrb.gmra.mxu0 %vm868_vm6, %v1256_v53 }
 0x733   :  { %v1279_v54 = vpop.f32.mrf.mxu3  ;;  %v1365_v56 = vpop.f32.mrf.mxu2 }
 0x734   :  { %4836 = vmatmul.msk.f32.gmra.mxu0 %vm868_vm6, %v1279_v54 }
 0x735   :  { %4855 = vmatpush.xpose.msk.msra.mxu0 %vm868_vm6, %v1365_v56  ;;  %v4863_v56 = vld [vmem:[%s7114_s9 + $0x10] sm:$0xff] }
 0x739   :  { %1571 = vmatpush.msrb.mxu0 %v4863_v56 }
 0x73b   :  { %v1368_v59 = vpop.f32.mrf.mxu2  ;;  %v1393_v60 = vpop.f32.mrf.mxu3 }
 0x73c   :  { %4856 = vmatmul.msk.f32.vlgmr.msra.gmra.mxu0 %vm868_vm6, %v1337_v57  ;;  %4857 = vmatpush.xpose.msk.msra.mxu1 %vm868_vm6, %v1368_v59 }
 0x73d   :  { %1520 = vmatpush.msra.mxu2 %v1393_v60 }
 0x73f   :  { %4858 = vmatmul.msk.f32.vlgmr.msra.gmra.mxu1 %vm868_vm6, %v1340_v62  ;;  %1626 = vmatpush.msrb.mxu2 %v4875_v22 }
 0x740   :  { %1598 = vmatpush.msrb.mxu1 %v4869_v58 }
 0x741   :  { %1627 = vmatpush.msrb.mxu2 %v4874_v23 }
 0x742   :  { %1599 = vmatpush.msrb.mxu1 %v4868_v61 }
 0x743   :  { %v1396_v5 = vpop.f32.mrf.mxu3  ;;  %1628 = vmatpush.msrb.mxu2 %v4873_v25 }
 0x744   :  { %1600 = vmatpush.msrb.mxu1 %v4867_v63  ;;  %1543 = vmatpush.msrb.mxu3 %v1396_v5 }
 0x745   :  { %1629 = vmatpush.msrb.mxu2 %v4872_v27 }
 0x746   :  { %1601 = vmatpush.msrb.mxu1 %v4866_v0  ;;  %1654 = vmatpush.msra.mxu3 %v4881_v24 }
 0x747   :  { %4870 = vmatmul.msk.f32.vlgmr.msrb.gmra.mxu1 %vm66_vm0, %v5821_v50 }
 0x748   :  { %1655 = vmatpush.msra.mxu3 %v4880_v26 }
 0x74a   :  { %1656 = vmatpush.msra.mxu3 %v4879_v28 }
 0x74c   :  { %1657 = vmatpush.msra.mxu3 %v4878_v29 }
 0x74f   :  { %4871 = vmatmul.msk.f32.gmra.mxu1 %vm66_vm0, %v5834_v55 }
 0x7a9   :  { %v6014_v6 = vpop.f32.mrf.mxu0 }
 0x7b1   :  { %v6016_v7 = vpop.f32.mrf.mxu0 }
 0x7b9   :  { %v1422_v8 = vpop.f32.mrf.mxu0 }
 0x7ba   :  { %v1451_v9 = vsel %vm868_vm6, %v1422_v8, -inf }
 0x7bb   :  { %1452 = vmax.xlane.f32.xlu2 %v1451_v9 }
 0x7bc   :  { %v1448_v10 = vpop.f32.mrf.mxu1 }
 0x7bd   :  { %v1454_v11 = vsel %vm868_vm6, %v1448_v10, -inf }
 0x7be   :  { %1455 = vmax.xlane.f32.xlu0 %v1454_v11 }
 0x7c4   :  { %v1603_v60 = vpop.f32.mrf.mxu1 }
 0x7cc   :  { %v1606_v63 = vpop.f32.mrf.mxu1 }
 0x82e   :  { %v1453_v12 = vpop.xlane.xlu2 %1452 }
 0x82f   :  { %v1457_v13 = vsub.f32 %v1422_v8, %v1453_v12 }
 0x831   :  { %v1459_v14 = vmul.f32 1.442695, %v1457_v13  ;;  %v1456_v15 = vpop.xlane.xlu0 %1455 }
 0x832   :  { %v1458_v16 = vsub.f32 %v1448_v10, %v1456_v15 }
 0x833   :  { %5249 = vpow2.f32 %v1459_v14 }
 0x834   :  { %v1461_v17 = vmul.f32 1.442695, %v1458_v16 }
 0x836   :  { %5251 = vpow2.f32 %v1461_v17 }
 0x839   :  { %v5250_v18 = vpop.eup %5249 }
 0x83a   :  { %v1463_v19 = vsel %vm868_vm6, %v5250_v18, 0.0 }
 0x83b   :  { %1464 = vadd.xlane.f32.xlu1 %v1463_v19 }
 0x83c   :  { %v5252_v20 = vpop.eup %5251 }
 0x83d   :  { %v1466_v21 = vsel %vm868_vm6, %v5252_v20, 0.0 }
 0x83e   :  { %1467 = vadd.xlane.f32.xlu2 %v1466_v21 }
 0x8ae   :  { %v1465_v30 = vpop.xlane.xlu1 %1464 }
 0x8af   :  { %5253 = vrcp.f32 %v1465_v30  ;;  %v1480_v36 = vand.u32 2147483648, %v1465_v30  ;;  %v1478_v39 = vand.u32 2147483647, %v1465_v30  ;;  %vm1474_vm10 = vweird.f32 %v1465_v30 }
 0x8b1   :  { %v1468_v31 = vpop.xlane.xlu2 %1467  ;;  %v1481_v43 = vor.u32 1.1754944e-38, %v1480_v36  ;;  %vm1479_vm13 = vcmp.eq.f32.partialorder %v1478_v39, 8.507059e+37 }
 0x8b2   :  { %5255 = vrcp.f32 %v1468_v31  ;;  %v1495_v42 = vand.u32 2147483648, %v1468_v31  ;;  %v1493_v45 = vand.u32 2147483647, %v1468_v31  ;;  %vm1489_vm14 = vweird.f32 %v1468_v31 }
 0x8b4   :  { %v1496_v49 = vor.u32 1.1754944e-38, %v1495_v42  ;;  %vm1494_vm1 = vcmp.eq.f32.partialorder %v1493_v45, 8.507059e+37 }
 0x8b5   :  { %v5254_v32 = vpop.eup %5253 }
 0x8b6   :  { %v1470_v33 = vmul.f32 %v5254_v32, %v1465_v30  ;;  %vm1475_vm9 = vweird.f32 %v5254_v32 }
 0x8b7   :  { %vm1476_vm11 = vmor %vm1474_vm10, %vm1475_vm9 }
 0x8b8   :  { %v5256_v34 = vpop.eup %5255  ;;  %v1471_v35 = vsub.f32 1.0, %v1470_v33 }
 0x8b9   :  { %v1485_v37 = vmul.f32 %v5256_v34, %v1468_v31  ;;  %vm1490_vm12 = vweird.f32 %v5256_v34 }
 0x8ba   :  { %v1472_v38 = vmul.f32 %v5254_v32, %v1471_v35  ;;  %vm1491_vm15 = vmor %vm1489_vm14, %vm1490_vm12 }
 0x8bb   :  { %v1486_v40 = vsub.f32 1.0, %v1485_v37 }
 0x8bc   :  { %v1473_v41 = vadd.f32 %v5254_v32, %v1472_v38 }
 0x8bd   :  { %v1487_v44 = vmul.f32 %v5256_v34, %v1486_v40 }
 0x8be   :  { %v1477_v46 = vsel %vm1476_vm11, %v5254_v32, %v1473_v41 }
 0x8bf   :  { %v1482_v47 = vsel %vm1479_vm13, %v1481_v43, %v1477_v46  ;;  %v1488_v48 = vadd.f32 %v5256_v34, %v1487_v44 }
 0x8c0   :  { %v1483_v51 = vmul.f32 %v5250_v18, %v1482_v47  ;;  %v4892_v47 = vld [vmem:[%s7114_s9 + $0x18] sm:$0xff] }
 0x8c1   :  { %v1492_v52 = vsel %vm1491_vm15, %v5256_v34, %v1488_v48 }
 0x8c2   :  { %v1497_v53 = vsel %vm1494_vm1, %v1496_v49, %v1492_v52  ;;  %4859 = vst.msk [vmem:[%s7125_s20 + $0x20] sm:$0xff] %vm868_vm6, %v1483_v51  ;;  %4861 = vmatmul.msk.f32.vlgmr.msra.gmra.mxu2 %vm868_vm6, %v1483_v51  ;;  %v5212_v51 = vld [vmem:[%s7115_s10] ss:$0 sm:$0xff] }
 0x8c3   :  { %v1498_v54 = vmul.f32 %v5252_v20, %v1497_v53  ;;  %v780_v52 = vadd.f32 %v5212_v51, %v5864_v2 }
 0x8c5   :  { %4860 = vst.msk [vmem:[%s7125_s20 + $0x28] sm:$0xff] %vm868_vm6, %v1498_v54  ;;  %4862 = vmatmul.msk.f32.vlgmr.msrb.gmra.mxu3 %vm868_vm6, %v1498_v54  ;;  %v1047_v53 = vadd.f32 %v5939_v1, %v780_v52 }
 0x8c7   :  { %v1313_v54 = vadd.f32 %v6014_v6, %v1047_v53  ;;  %v5214_v53 = vld [vmem:[%s7117_s12] ss:$0 sm:$0xff] }
 0x8ca   :  { %4876 = vmatmul.msk.f32.vlgmr.msrb.gmra.mxu2 %vm66_vm0, %v5821_v50 }
 0x8cd   :  { %4882 = vmatmul.msk.f32.vlgmr.msra.gmra.mxu3 %vm66_vm0, %v5821_v50 }
 0x8d2   :  { %4877 = vmatmul.msk.f32.gmra.mxu2 %vm66_vm0, %v5834_v55 }
 0x8d5   :  { %4883 = vmatmul.msk.f32.gmra.mxu3 %vm66_vm0, %v5834_v55 }
 0x945   :  { %v1522_v57 = vpop.f32.mrf.mxu2 }
 0x946   :  { %4864 = vmatmul.msk.f32.vlgmr.msrb.gmra.mxu0 %vm868_vm6, %v1522_v57 }
 0x948   :  { %v1545_v58 = vpop.f32.mrf.mxu3 }
 0x94d   :  { %v1631_v59 = vpop.f32.mrf.mxu2 }
 0x94e   :  { %4865 = vmatmul.msk.f32.gmra.mxu0 %vm868_vm6, %v1545_v58  ;;  %v783_v58 = vadd.f32 %v5212_v51, %v5866_v3  ;;  %v5382_v3 = vmov 32.0  }
 0x94f   :  { %4884 = vmatpush.xpose.msk.msra.mxu0 %vm868_vm6, %v1631_v59 }
 0x950   :  { %v1659_v61 = vpop.f32.mrf.mxu3 }
 0x951   :  { %1786 = vmatpush.msra.mxu2 %v1659_v61 }
 0x953   :  { %1837 = vmatpush.msrb.mxu0 %v4892_v47  ;;  %v5213_v47 = vld [vmem:[%s7116_s11] ss:$0 sm:$0xff] }
 0x955   :  { %v1634_v62 = vpop.f32.mrf.mxu2 }
 0x956   :  { %4885 = vmatmul.msk.f32.vlgmr.msra.gmra.mxu0 %vm868_vm6, %v1603_v60  ;;  %4886 = vmatpush.xpose.msk.msra.mxu1 %vm868_vm6, %v1634_v62  ;;  %v1048_v60 = vadd.f32 %v5941_v4, %v783_v58  ;;  %v1955_v58 = vld [vmem:[%s7120_s15 + $0x20] sm:$0xff] }
 0x958   :  { %v1662_v0 = vpop.f32.mrf.mxu3  ;;  %v1314_v62 = vadd.f32 %v6016_v7, %v1048_v60 }
 0x959   :  { %4887 = vmatmul.msk.f32.vlgmr.msra.gmra.mxu1 %vm868_vm6, %v1606_v63  ;;  %1809 = vmatpush.msrb.mxu3 %v1662_v0 }
 0x9c3   :  { %v6073_v5 = vpop.f32.mrf.mxu0 }
 0x9c4   :  { %v1579_v56 = vadd.f32 %v6073_v5, %v1313_v54  ;;  %v1956_v54 = vld [vmem:[%s7120_s15 + $0x28] sm:$0xff] }
 0x9cb   :  { %v6075_v8 = vpop.f32.mrf.mxu0 }
 0x9cc   :  { %v1580_v2 = vadd.f32 %v6075_v8, %v1314_v62 }
 0x9d3   :  { %v1688_v9 = vpop.f32.mrf.mxu0 }
 0x9d4   :  { %v1717_v10 = vsel %vm868_vm6, %v1688_v9, -inf }
 0x9d5   :  { %1718 = vmax.xlane.f32.xlu0 %v1717_v10 }
 0x9d6   :  { %v1714_v11 = vpop.f32.mrf.mxu1 }
 0x9d7   :  { %v1720_v12 = vsel %vm868_vm6, %v1714_v11, -inf }
 0x9d8   :  { %1721 = vmax.xlane.f32.xlu1 %v1720_v12 }
 0xa48   :  { %v1719_v13 = vpop.xlane.xlu0 %1718 }
 0xa49   :  { %v1723_v14 = vsub.f32 %v1688_v9, %v1719_v13 }
 0xa4b   :  { %v1725_v15 = vmul.f32 1.442695, %v1723_v14  ;;  %v1722_v16 = vpop.xlane.xlu1 %1721 }
 0xa4c   :  { %v1724_v17 = vsub.f32 %v1714_v11, %v1722_v16 }
 0xa4d   :  { %5257 = vpow2.f32 %v1725_v15 }
 0xa4e   :  { %v1727_v18 = vmul.f32 1.442695, %v1724_v17 }
 0xa50   :  { %5259 = vpow2.f32 %v1727_v18 }
 0xa53   :  { %v5258_v19 = vpop.eup %5257 }
 0xa54   :  { %v1729_v20 = vsel %vm868_vm6, %v5258_v19, 0.0 }
 0xa55   :  { %1730 = vadd.xlane.f32.xlu2 %v1729_v20  ;;  %v1915_v20 = vld [vmem:[%s7118_s13 + $0x18] sm:$0xff] }
 0xa56   :  { %v5260_v21 = vpop.eup %5259  ;;  %1938 = vmatpush.msrb.mxu1 %v1915_v20 }
 0xa57   :  { %v1732_v22 = vsel %vm868_vm6, %v5260_v21, 0.0 }
 0xa58   :  { %1733 = vadd.xlane.f32.xlu0 %v1732_v22  ;;  %v1913_v22 = vld [vmem:[%s7118_s13 + $0x8] sm:$0xff] }
 0xac8   :  { %v1731_v23 = vpop.xlane.xlu2 %1730 }
 0xac9   :  { %5261 = vrcp.f32 %v1731_v23  ;;  %v1746_v29 = vand.u32 2147483648, %v1731_v23  ;;  %v1744_v32 = vand.u32 2147483647, %v1731_v23  ;;  %vm1740_vm3 = vweird.f32 %v1731_v23 }
 0xacb   :  { %v1734_v24 = vpop.xlane.xlu0 %1733  ;;  %v1747_v36 = vor.u32 1.1754944e-38, %v1746_v29  ;;  %vm1745_vm7 = vcmp.eq.f32.partialorder %v1744_v32, 8.507059e+37  ;;  %v1964_v29 = vld [vmem:[%s7120_s15 + $0x68] sm:$0xff]  ;;  %v1963_v32 = vld [vmem:[%s7120_s15 + $0x60] sm:$0xff] }
 0xacc   :  { %5263 = vrcp.f32 %v1734_v24  ;;  %v1761_v35 = vand.u32 2147483648, %v1734_v24  ;;  %v1759_v38 = vand.u32 2147483647, %v1734_v24  ;;  %vm1755_vm8 = vweird.f32 %v1734_v24 }
 0xacd   :  { %5265 = vrcp.f32 %v5382_v3  ;;  %v1951_v3 = vld [vmem:[%s7120_s15] sm:$0xff] }
 0xace   :  { %v1762_v42 = vor.u32 1.1754944e-38, %v1761_v35  ;;  %vm1760_vm10 = vcmp.eq.f32.partialorder %v1759_v38, 8.507059e+37  ;;  %v1962_v35 = vld [vmem:[%s7120_s15 + $0x58] sm:$0xff] }
 0xacf   :  { %v5262_v25 = vpop.eup %5261 }
 0xad0   :  { %v1736_v26 = vmul.f32 %v5262_v25, %v1731_v23  ;;  %vm1741_vm2 = vweird.f32 %v5262_v25  ;;  %v1912_v23 = vld [vmem:[%s7118_s13] sm:$0xff] }
 0xad1   :  { %vm1742_vm4 = vmor %vm1740_vm3, %vm1741_vm2 }
 0xad2   :  { %v5264_v27 = vpop.eup %5263  ;;  %v1737_v28 = vsub.f32 1.0, %v1736_v26 }
 0xad3   :  { %v1751_v30 = vmul.f32 %v5264_v27, %v1734_v24  ;;  %vm1756_vm5 = vweird.f32 %v5264_v27  ;;  %v5266_v9 = vpop.eup %5265 }
 0xad4   :  { %v1738_v31 = vmul.f32 %v5262_v25, %v1737_v28  ;;  %vm1757_vm9 = vmor %vm1755_vm8, %vm1756_vm5  ;;  %v1858_v4 = vmul.f32 32.0, %v5266_v9  ;;  %vm1862_vm11 = vweird.f32 %v5266_v9  ;;  %v1965_v28 = vld [vmem:[%s7120_s15 + $0x70] sm:$0xff] }
 0xad5   :  { %v1752_v33 = vsub.f32 1.0, %v1751_v30 }
 0xad6   :  { %v1739_v34 = vadd.f32 %v5262_v25, %v1738_v31  ;;  %v1859_v10 = vsub.f32 1.0, %v1858_v4 }
 0xad7   :  { %v1753_v37 = vmul.f32 %v5264_v27, %v1752_v33 }
 0xad8   :  { %v1743_v39 = vsel %vm1742_vm4, %v5262_v25, %v1739_v34 }
 0xad9   :  { %v1748_v40 = vsel %vm1745_vm7, %v1747_v36, %v1743_v39  ;;  %v1754_v41 = vadd.f32 %v5264_v27, %v1753_v37  ;;  %v1961_v37 = vld [vmem:[%s7120_s15 + $0x50] sm:$0xff]  ;;  %v1960_v39 = vld [vmem:[%s7120_s15 + $0x48] sm:$0xff] }
 0xada   :  { %v1749_v43 = vmul.f32 %v5258_v19, %v1748_v40 }
 0xadb   :  { %v1758_v44 = vsel %vm1757_vm9, %v5264_v27, %v1754_v41  ;;  %v1966_v27 = vld [vmem:[%s7120_s15 + $0x78] sm:$0xff]  ;;  %v1959_v41 = vld [vmem:[%s7120_s15 + $0x40] sm:$0xff] }
 0xadc   :  { %v1763_v45 = vsel %vm1760_vm10, %v1762_v42, %v1758_v44  ;;  %4888 = vst.msk [vmem:[%s7125_s20 + $0x30] sm:$0xff] %vm868_vm6, %v1749_v43  ;;  %4890 = vmatmul.msk.f32.vlgmr.msra.gmra.mxu2 %vm868_vm6, %v1749_v43  ;;  %v1958_v44 = vld [vmem:[%s7120_s15 + $0x38] sm:$0xff] }
 0xadd   :  { %v1764_v46 = vmul.f32 %v5260_v21, %v1763_v45  ;;  %v1914_v21 = vld [vmem:[%s7118_s13 + $0x10] sm:$0xff]  ;;  %1971 = vmatpush.msrb.mxu2 %v1966_v27 }
 0xade   :  { %1939 = vmatpush.msrb.mxu1 %v1914_v21 }
 0xadf   :  { %4889 = vst.msk [vmem:[%s7125_s20 + $0x38] sm:$0xff] %vm868_vm6, %v1764_v46  ;;  %4891 = vmatmul.msk.f32.vlgmr.msrb.gmra.mxu3 %vm868_vm6, %v1764_v46  ;;  %1972 = vmatpush.msrb.mxu2 %v1965_v28 }
 0xae0   :  { %1940 = vmatpush.msrb.mxu1 %v1913_v22 }
 0xae1   :  { %1973 = vmatpush.msrb.mxu2 %v1964_v29 }
 0xae2   :  { %1941 = vmatpush.msrb.mxu1 %v1912_v23 }
 0xae3   :  { %1974 = vmatpush.msrb.mxu2 %v1963_v32  ;;  %v4907_v32 = vld [vmem:[%s7112_s7 + $0x198] sm:$0xff] }
 0xae4   :  { %2108 = vmatpush.msra.mxu0 %v4907_v32 }
 0xae5   :  { %1975 = vmatpush.msrb.mxu2 %v1962_v35  ;;  %v4899_v35 = vld [vmem:[%s7113_s8 + $0x30] sm:$0xff] }
 0xae7   :  { %1976 = vmatpush.msrb.mxu2 %v1961_v37  ;;  %v4912_v37 = vld [vmem:[%s7112_s7 + $0x1b0] sm:$0xff] }
 0xae9   :  { %1977 = vmatpush.msrb.mxu2 %v1960_v39  ;;  %v4898_v39 = vld [vmem:[%s7113_s8 + $0x28] sm:$0xff] }
 0xaeb   :  { %1978 = vmatpush.msrb.mxu2 %v1959_v41  ;;  %v4911_v41 = vld [vmem:[%s7112_s7 + $0x1a8] sm:$0xff] }
 0xaed   :  { %1979 = vmatpush.msrb.mxu2 %v1958_v44  ;;  %v4904_v44 = vld [vmem:[%s7112_s7 + $0x180] sm:$0xff] }
 0xb5f   :  { %v1788_v48 = vpop.f32.mrf.mxu2 }
 0xb60   :  { %4893 = vmatmul.msk.f32.vlgmr.msrb.gmra.mxu0 %vm868_vm6, %v1788_v48  ;;  %v1957_v48 = vld [vmem:[%s7120_s15 + $0x30] sm:$0xff] }
 0xb61   :  { %1980 = vmatpush.msrb.mxu2 %v1957_v48 }
 0xb62   :  { %v1811_v49 = vpop.f32.mrf.mxu3 }
 0xb63   :  { %1981 = vmatpush.msrb.mxu2 %v1956_v54  ;;  %v4917_v54 = vld [vmem:[%s7112_s7 + $0x1c8] sm:$0xff] }
 0xb65   :  { %1982 = vmatpush.msrb.mxu2 %v1955_v58 }
 0xb68   :  { %4894 = vmatmul.msk.f32.gmra.mxu0 %vm868_vm6, %v1811_v49 }
 0xbdd   :  { %v1839_v57 = vpop.f32.mrf.mxu0 }
 0xbde   :  { %v1845_v59 = vadd.f32 %v1839_v57, %v1579_v56 }
 0xbe0   :  { %v1847_v61 = vadd.f32 %v1845_v59, %v5821_v50  ;;  %v1860_v50 = vmul.f32 %v5266_v9, %v1859_v10 }
 0xbe2   :  { %v1851_v63 = vsel %vm66_vm0, %v1847_v61, 0.0  ;;  %v1861_v11 = vadd.f32 %v5266_v9, %v1860_v50 }
 0xbe3   :  { %1852 = vadd.xlane.f32.xlu1 %v1851_v63 }
 0xbe4   :  { %v6111_v7 = vsel %vm1862_vm11, %v5266_v9, %v1861_v11  ;;  %v5215_v9 = vld [vmem:[%s7119_s14] ss:$0 sm:$0xff] }
 0xbe5   :  { %v1842_v1 = vpop.f32.mrf.mxu0 }
 0xbe6   :  { %v1846_v0 = vadd.f32 %v1842_v1, %v1580_v2 }
 0xbe8   :  { %v1848_v6 = vadd.f32 %v1846_v0, %v5834_v55 }
 0xbea   :  { %v1854_v5 = vsel %vm66_vm0, %v1848_v6, 0.0 }
 0xbeb   :  { %1855 = vadd.xlane.f32.xlu2 %v1854_v5  ;;  %v1952_v5 = vld [vmem:[%s7120_s15 + $0x8] sm:$0xff] }
 0xc56   :  { %v1853_v12 = vpop.xlane.xlu1 %1852 }
 0xc57   :  { %v1864_v8 = vmul.f32 %v6111_v7, %v1853_v12 }
 0xc59   :  { %v1866_v13 = vsub.f32 %v1847_v61, %v1864_v8  ;;  %v1954_v61 = vld [vmem:[%s7120_s15 + $0x18] sm:$0xff] }
 0xc5a   :  { %1983 = vmatpush.msrb.mxu2 %v1954_v61 }
 0xc5b   :  { %v1868_v14 = vmul.f32 %v1866_v13, %v1866_v13 }
 0xc5d   :  { %v1870_v55 = vsel %vm66_vm0, %v1868_v14, 0.0 }
 0xc5e   :  { %1871 = vadd.xlane.f32.xlu0 %v1870_v55  ;;  %v1856_v15 = vpop.xlane.xlu2 %1855 }
 0xc5f   :  { %v1865_v16 = vmul.f32 %v6111_v7, %v1856_v15 }
 0xc61   :  { %v6116_v17 = vsub.f32 %v1848_v6, %v1865_v16  ;;  %v1953_v6 = vld [vmem:[%s7120_s15 + $0x10] sm:$0xff] }
 0xc62   :  { %1984 = vmatpush.msrb.mxu2 %v1953_v6  ;;  %v5217_v6 = vld [vmem:[%s7122_s17] ss:$0 sm:$0xff] }
 0xc63   :  { %v1869_v18 = vmul.f32 %v6116_v17, %v6116_v17 }
 0xc64   :  { %1985 = vmatpush.msrb.mxu2 %v1952_v5 }
 0xc65   :  { %v1873_v19 = vsel %vm66_vm0, %v1869_v18, 0.0 }
 0xc66   :  { %1874 = vadd.xlane.f32.xlu1 %v1873_v19  ;;  %1986 = vmatpush.msrb.mxu2 %v1951_v3 }
 0xcd1   :  { %v1872_v24 = vpop.xlane.xlu0 %1871 }
 0xcd2   :  { %v1876_v25 = vmul.f32 %v1872_v24, %v6111_v7 }
 0xcd4   :  { %v1878_v26 = vadd.f32 1e-05, %v1876_v25 }
 0xcd6   :  { %5267 = vrsqrt.f32 %v1878_v26  ;;  %vm1886_vm13 = vweird.f32 %v1878_v26 }
 0xcd9   :  { %v1875_v30 = vpop.xlane.xlu1 %1874 }
 0xcda   :  { %v1877_v31 = vmul.f32 %v1875_v30, %v6111_v7 }
 0xcdc   :  { %v5268_v33 = vpop.eup %5267  ;;  %v1879_v34 = vadd.f32 1e-05, %v1877_v31  ;;  %v4900_v31 = vld [vmem:[%s7113_s8 + $0x38] sm:$0xff] }
 0xcdd   :  { %v1881_v36 = vmul.f32 %v5268_v33, %v1878_v26  ;;  %vm1887_vm12 = vweird.f32 %v5268_v33  ;;  %2080 = vmatpush.msra.mxu3 %v4900_v31 }
 0xcde   :  { %5269 = vrsqrt.f32 %v1879_v34  ;;  %vm1888_vm14 = vmor %vm1886_vm13, %vm1887_vm12  ;;  %vm1896_vm1 = vweird.f32 %v1879_v34 }
 0xcdf   :  { %v1882_v38 = vmul.f32 %v5268_v33, %v1881_v36  ;;  %v4906_v36 = vld [vmem:[%s7112_s7 + $0x190] sm:$0xff]  ;;  %2081 = vmatpush.msra.mxu3 %v4899_v35 }
 0xce0   :  { %2109 = vmatpush.msra.mxu0 %v4906_v36 }
 0xce1   :  { %v1883_v40 = vmul.f32 0.5, %v1882_v38  ;;  %v4935_v38 = vld [vmem:[%s7112_s7 + $0x1f0] sm:$0xff]  ;;  %2082 = vmatpush.msra.mxu3 %v4898_v39 }
 0xce2   :  { %v4941_v39 = vld [vmem:[%s7112_s7 + $0x210] sm:$0xff] }
 0xce3   :  { %v1884_v42 = vsub.f32 1.5, %v1883_v40  ;;  %v4905_v40 = vld [vmem:[%s7112_s7 + $0x188] sm:$0xff] }
 0xce4   :  { %v5270_v43 = vpop.eup %5269  ;;  %2110 = vmatpush.msra.mxu0 %v4905_v40  ;;  %v4940_v40 = vld [vmem:[%s7112_s7 + $0x208] sm:$0xff] }
 0xce5   :  { %v1885_v45 = vmul.f32 %v5268_v33, %v1884_v42  ;;  %v1891_v46 = vmul.f32 %v5270_v43, %v1879_v34  ;;  %vm1897_vm15 = vweird.f32 %v5270_v43  ;;  %v4936_v34 = vld [vmem:[%s7112_s7 + $0x1f8] sm:$0xff]  ;;  %v4934_v42 = vld [vmem:[%s7112_s7 + $0x1e8] sm:$0xff] }
 0xce6   :  { %vm1898_vm2 = vmor %vm1896_vm1, %vm1897_vm15  ;;  %2374 = vmatpush.msra.mxu2 %v4936_v34  ;;  %2111 = vmatpush.msra.mxu0 %v4904_v44  ;;  %v4946_v44 = vld [vmem:[%s7112_s7 + $0x228] sm:$0xff] }
 0xce7   :  { %v1889_v49 = vsel %vm1888_vm14, %v5268_v33, %v1885_v45  ;;  %v1892_v51 = vmul.f32 %v5270_v43, %v1891_v46  ;;  %v4913_v33 = vld [vmem:[%s7112_s7 + $0x1b8] sm:$0xff]  ;;  %v4910_v45 = vld [vmem:[%s7112_s7 + $0x1a0] sm:$0xff] }
 0xce8   :  { %v1900_v52 = vmul.f32 %v1889_v49, %v1866_v13  ;;  %v5216_v13 = vld [vmem:[%s7121_s16] ss:$0 sm:$0xff]  ;;  %2136 = vmatpush.msra.mxu1 %v4913_v33  ;;  %2375 = vmatpush.msra.mxu2 %v4935_v38  ;;  %v4942_v38 = vld [vmem:[%s7112_s7 + $0x218] sm:$0xff] }
 0xce9   :  { %v1893_v56 = vmul.f32 0.5, %v1892_v51  ;;  %v4933_v46 = vld [vmem:[%s7112_s7 + $0x1e0] sm:$0xff]  ;;  %v4919_v51 = vld [vmem:[%s7112_s7 + $0x1d8] sm:$0xff] }
 0xcea   :  { %v1905_v57 = vmul.f32 %v5213_v47, %v1900_v52  ;;  %2137 = vmatpush.msra.mxu1 %v4912_v37  ;;  %2376 = vmatpush.msra.mxu2 %v4934_v42  ;;  %v4918_v52 = vld [vmem:[%s7112_s7 + $0x1d0] sm:$0xff]  ;;  %v4948_v42 = vld [vmem:[%s7112_s7 + $0x238] sm:$0xff] }
 0xceb   :  { %v1894_v59 = vsub.f32 1.5, %v1893_v56 }
 0xcec   :  { %v1910_v60 = vadd.f32 %v5214_v53, %v1905_v57  ;;  %2138 = vmatpush.msra.mxu1 %v4911_v41  ;;  %2377 = vmatpush.msra.mxu2 %v4933_v46  ;;  %v4916_v57 = vld [vmem:[%s7112_s7 + $0x1c0] sm:$0xff] }
 0xced   :  { %v1895_v62 = vmul.f32 %v5270_v43, %v1894_v59  ;;  %v4939_v41 = vld [vmem:[%s7112_s7 + $0x200] sm:$0xff] }
 0xcee   :  { %4895 = vmatmul.msk.f32.vlgmr.msrb.gmra.mxu1 %vm66_vm0, %v1910_v60  ;;  %v4945_v46 = vld [vmem:[%s7112_s7 + $0x220] sm:$0xff] }
 0xcef   :  { %v1899_v63 = vsel %vm1898_vm2, %v5270_v43, %v1895_v62  ;;  %v4897_v43 = vld [vmem:[%s7113_s8 + $0x20] sm:$0xff]  ;;  %2139 = vmatpush.msra.mxu1 %v4910_v45 }
 0xcf0   :  { %v1901_v2 = vmul.f32 %v1899_v63, %v6116_v17  ;;  %2083 = vmatpush.msra.mxu3 %v4897_v43  ;;  %v4947_v43 = vld [vmem:[%s7112_s7 + $0x230] sm:$0xff] }
 0xcf2   :  { %v1906_v1 = vmul.f32 %v5213_v47, %v1901_v2  ;;  %2164 = vmatpush.msrb.mxu3 %v4919_v51 }
 0xcf4   :  { %v1911_v0 = vadd.f32 %v5214_v53, %v1906_v1  ;;  %2165 = vmatpush.msrb.mxu3 %v4918_v52 }
 0xcf6   :  { %4896 = vmatmul.msk.f32.gmra.mxu1 %vm66_vm0, %v1911_v0  ;;  %2166 = vmatpush.msrb.mxu3 %v4917_v54 }
 0xcf8   :  { %2167 = vmatpush.msrb.mxu3 %v4916_v57 }
 0xd6b   :  { %v1943_v4 = vpop.f32.mrf.mxu1 }
 0xd6c   :  { %v1944_v10 = vadd.f32 %v5215_v9, %v1943_v4 }
 0xd6e   :  { %v1949_v50 = vmax.f32 %v1944_v10, 0.0 }
 0xd70   :  { %1987 = vmatmul.f32.vlgmr.msrb.gmra.mxu2 %v1949_v50 }
 0xd73   :  { %v1946_v11 = vpop.f32.mrf.mxu1 }
 0xd74   :  { %v1947_v12 = vadd.f32 %v5215_v9, %v1946_v11  ;;  %v5218_v9 = vld [vmem:[%s7123_s18] ss:$0 sm:$0xff] }
 0xd76   :  { %v1950_v8 = vmax.f32 %v1947_v12, 0.0 }
 0xd78   :  { %1990 = vmatmul.f32.gmra.mxu2 %v1950_v8 }
 0xdf3   :  { %v1988_v14 = vpop.f32.mrf.mxu2 }
 0xdf4   :  { %v1989_v55 = vadd.f32 %v5216_v13, %v1988_v14 }
 0xdf6   :  { %v1994_v15 = vadd.f32 %v1989_v55, %v1910_v60 }
 0xdf8   :  { %v1998_v16 = vsel %vm66_vm0, %v1994_v15, 0.0 }
 0xdf9   :  { %1999 = vadd.xlane.f32.xlu2 %v1998_v16 }
 0xdfb   :  { %v1991_v17 = vpop.f32.mrf.mxu2 }
 0xdfc   :  { %v1992_v18 = vadd.f32 %v5216_v13, %v1991_v17 }
 0xdfe   :  { %v1995_v19 = vadd.f32 %v1992_v18, %v1911_v0 }
 0xe00   :  { %v2001_v20 = vsel %vm66_vm0, %v1995_v19, 0.0 }
 0xe01   :  { %2002 = vadd.xlane.f32.xlu0 %v2001_v20 }
 0xe6c   :  { %v2000_v21 = vpop.xlane.xlu2 %1999 }
 0xe6d   :  { %v2004_v22 = vmul.f32 %v2000_v21, %v6111_v7 }
 0xe6f   :  { %v6201_v23 = vsub.f32 %v1994_v15, %v2004_v22 }
 0xe71   :  { %v2008_v24 = vmul.f32 %v6201_v23, %v6201_v23 }
 0xe73   :  { %v2010_v25 = vsel %vm66_vm0, %v2008_v24, 0.0 }
 0xe74   :  { %v2003_v26 = vpop.xlane.xlu0 %2002  ;;  %2011 = vadd.xlane.f32.xlu1 %v2010_v25 }
 0xe75   :  { %v2005_v27 = vmul.f32 %v2003_v26, %v6111_v7 }
 0xe77   :  { %v6207_v28 = vsub.f32 %v1995_v19, %v2005_v27 }
 0xe79   :  { %v2009_v29 = vmul.f32 %v6207_v28, %v6207_v28 }
 0xe7b   :  { %v2013_v30 = vsel %vm66_vm0, %v2009_v29, 0.0 }
 0xe7c   :  { %2014 = vadd.xlane.f32.xlu2 %v2013_v30 }
 0xee7   :  { %v2012_v47 = vpop.xlane.xlu1 %2011 }
 0xee8   :  { %v2016_v48 = vmul.f32 %v2012_v47, %v6111_v7 }
 0xeea   :  { %v2018_v49 = vadd.f32 1e-05, %v2016_v48 }
 0xeec   :  { %5271 = vrsqrt.f32 %v2018_v49  ;;  %vm2026_vm4 = vweird.f32 %v2018_v49 }
 0xeef   :  { %v2015_v53 = vpop.xlane.xlu2 %2014 }
 0xef0   :  { %v2017_v56 = vmul.f32 %v2015_v53, %v6111_v7 }
 0xef2   :  { %v5272_v58 = vpop.eup %5271  ;;  %v2019_v59 = vadd.f32 1e-05, %v2017_v56 }
 0xef3   :  { %v2021_v60 = vmul.f32 %v5272_v58, %v2018_v49  ;;  %vm2027_vm3 = vweird.f32 %v5272_v58 }
 0xef4   :  { %5273 = vrsqrt.f32 %v2019_v59  ;;  %vm2028_vm5 = vmor %vm2026_vm4, %vm2027_vm3  ;;  %vm2036_vm8 = vweird.f32 %v2019_v59 }
 0xef5   :  { %v2022_v61 = vmul.f32 %v5272_v58, %v2021_v60 }
 0xef7   :  { %v2023_v62 = vmul.f32 0.5, %v2022_v61 }
 0xef9   :  { %v2024_v63 = vsub.f32 1.5, %v2023_v62 }
 0xefa   :  { %v5274_v2 = vpop.eup %5273 }
 0xefb   :  { %v2025_v1 = vmul.f32 %v5272_v58, %v2024_v63  ;;  %v2031_v0 = vmul.f32 %v5274_v2, %v2019_v59  ;;  %vm2037_vm7 = vweird.f32 %v5274_v2 }
 0xefc   :  { %vm2038_vm9 = vmor %vm2036_vm8, %vm2037_vm7 }
 0xefd   :  { %v2029_v5 = vsel %vm2028_vm5, %v5272_v58, %v2025_v1  ;;  %v2032_v3 = vmul.f32 %v5274_v2, %v2031_v0 }
 0xefe   :  { %v2040_v4 = vmul.f32 %v2029_v5, %v6201_v23 }
 0xeff   :  { %v2033_v10 = vmul.f32 0.5, %v2032_v3 }
 0xf00   :  { %v2045_v50 = vmul.f32 %v5217_v6, %v2040_v4 }
 0xf01   :  { %v2034_v11 = vsub.f32 1.5, %v2033_v10  ;;  %v4930_v10 = vld [vmem:[%s7114_s9 + $0x20] sm:$0xff] }
 0xf02   :  { %v6281_v12 = vadd.f32 %v5218_v9, %v2045_v50 }
 0xf03   :  { %v2035_v8 = vmul.f32 %v5274_v2, %v2034_v11 }
 0xf04   :  { %4902 = vmatmul.msk.f32.vlgmr.msra.gmra.mxu3 %vm66_vm0, %v6281_v12  ;;  %4908 = vmatmul.msk.f32.vlgmr.msra.gmra.mxu0 %vm66_vm0, %v6281_v12 }
 0xf05   :  { %v2039_v13 = vsel %vm2038_vm9, %v5274_v2, %v2035_v8  ;;  %4914 = vmatmul.msk.f32.vlgmr.msra.gmra.mxu1 %vm66_vm0, %v6281_v12  ;;  %4937 = vmatmul.msk.f32.vlgmr.msra.gmra.mxu2 %vm66_vm0, %v6281_v12 }
 0xf06   :  { %v2041_v14 = vmul.f32 %v2039_v13, %v6207_v28 }
 0xf08   :  { %v2046_v55 = vmul.f32 %v5217_v6, %v2041_v14 }
 0xf0a   :  { %v6292_v15 = vadd.f32 %v5218_v9, %v2046_v55  ;;  %v4965_v55 = vld [vmem:[%s7112_s7 + $0x258] sm:$0xff] }
 0xf0c   :  { %4903 = vmatmul.msk.f32.gmra.mxu3 %vm66_vm0, %v6292_v15  ;;  %4909 = vmatmul.msk.f32.gmra.mxu0 %vm66_vm0, %v6292_v15 }
 0xf0d   :  { %4915 = vmatmul.msk.f32.gmra.mxu1 %vm66_vm0, %v6292_v15  ;;  %4938 = vmatmul.msk.f32.gmra.mxu2 %vm66_vm0, %v6292_v15 }
 0xf14   :  { %4920 = vmatmul.msk.f32.vlgmr.msrb.gmra.mxu3 %vm66_vm0, %v6281_v12 }
 0xf1c   :  { %4921 = vmatmul.msk.f32.gmra.mxu3 %vm66_vm0, %v6292_v15 }
 0xf81   :  { %v2113_v17 = vpop.f32.mrf.mxu0 }
 0xf82   :  { %v2141_v16 = vpop.f32.mrf.mxu1 }
 0xf83   :  { %4922 = vmatpush.xpose.msk.msrb.mxu0 %vm868_vm6, %v2141_v16 }
 0xf86   :  { %4923 = vmatmul.msk.f32.vlgmr.msrb.gmra.mxu0 %vm868_vm6, %v2113_v17 }
 0xf87   :  { %v6308_v18 = vpop.f32.mrf.mxu3 }
 0xf88   :  { %v2379_v13 = vpop.f32.mrf.mxu2 }
 0xf89   :  { %v2116_v20 = vpop.f32.mrf.mxu0 }
 0xf8a   :  { %v2144_v19 = vpop.f32.mrf.mxu1 }
 0xf8b   :  { %4924 = vmatpush.xpose.msk.msrb.mxu1 %vm868_vm6, %v2144_v19  ;;  %v4964_v19 = vld [vmem:[%s7112_s7 + $0x250] sm:$0xff] }
 0xf8e   :  { %4925 = vmatmul.msk.f32.vlgmr.msrb.gmra.mxu1 %vm868_vm6, %v2116_v20 }
 0xf8f   :  { %v6312_v21 = vpop.f32.mrf.mxu3  ;;  %2347 = vmatpush.msra.mxu1 %v4930_v10 }
 0xf90   :  { %v2382_v20 = vpop.f32.mrf.mxu2 }
 0xf97   :  { %v2169_v22 = vpop.f32.mrf.mxu3 }
 0xf98   :  { %2296 = vmatpush.msra.mxu3 %v2169_v22  ;;  %v4963_v22 = vld [vmem:[%s7112_s7 + $0x248] sm:$0xff] }
 0xf9a   :  { %2402 = vmatpush.msrb.mxu3 %v4942_v38 }
 0xf9c   :  { %2403 = vmatpush.msrb.mxu3 %v4941_v39 }
 0xf9e   :  { %2404 = vmatpush.msrb.mxu3 %v4940_v40  ;;  %v4971_v40 = vld [vmem:[%s7112_s7 + $0x278] sm:$0xff] }
 0xf9f   :  { %v2172_v23 = vpop.f32.mrf.mxu3 }
 0xfa0   :  { %2319 = vmatpush.msra.mxu0 %v2172_v23  ;;  %2405 = vmatpush.msrb.mxu3 %v4939_v41  ;;  %v4962_v23 = vld [vmem:[%s7112_s7 + $0x240] sm:$0xff]  ;;  %v4970_v41 = vld [vmem:[%s7112_s7 + $0x270] sm:$0xff] }
 0xfa2   :  { %2430 = vmatpush.msrb.mxu0 %v4948_v42  ;;  %v4969_v42 = vld [vmem:[%s7112_s7 + $0x268] sm:$0xff] }
 0xfa4   :  { %2431 = vmatpush.msrb.mxu0 %v4947_v43  ;;  %v4968_v43 = vld [vmem:[%s7112_s7 + $0x260] sm:$0xff] }
 0xfa6   :  { %2432 = vmatpush.msrb.mxu0 %v4946_v44  ;;  %v4977_v44 = vld [vmem:[%s7112_s7 + $0x298] sm:$0xff] }
 0xfa8   :  { %2433 = vmatpush.msrb.mxu0 %v4945_v46  ;;  %v4975_v46 = vld [vmem:[%s7112_s7 + $0x288] sm:$0xff] }
0x1003   :  { %v2198_v24 = vpop.f32.mrf.mxu0 }
0x1004   :  { %v2227_v25 = vsel %vm868_vm6, %v2198_v24, -inf }
0x1005   :  { %2228 = vmax.xlane.f32.xlu0 %v2227_v25 }
0x100b   :  { %v2224_v26 = vpop.f32.mrf.mxu1 }
0x100c   :  { %v2230_v27 = vsel %vm868_vm6, %v2224_v26, -inf }
0x100d   :  { %2231 = vmax.xlane.f32.xlu1 %v2230_v27 }
0x1078   :  { %v2229_v28 = vpop.xlane.xlu0 %2228 }
0x1079   :  { %v2233_v29 = vsub.f32 %v2198_v24, %v2229_v28 }
0x107b   :  { %v2235_v30 = vmul.f32 1.442695, %v2233_v29 }
0x107d   :  { %5275 = vpow2.f32 %v2235_v30 }
0x1080   :  { %v2232_v31 = vpop.xlane.xlu1 %2231 }
0x1081   :  { %v2234_v32 = vsub.f32 %v2224_v26, %v2232_v31 }
0x1083   :  { %v5276_v33 = vpop.eup %5275  ;;  %v2237_v34 = vmul.f32 1.442695, %v2234_v32 }
0x1084   :  { %v2239_v35 = vsel %vm868_vm6, %v5276_v33, 0.0 }
0x1085   :  { %5277 = vpow2.f32 %v2237_v34  ;;  %2240 = vadd.xlane.f32.xlu2 %v2239_v35 }
0x108b   :  { %v5278_v36 = vpop.eup %5277 }
0x108c   :  { %v2242_v37 = vsel %vm868_vm6, %v5278_v36, 0.0 }
0x108d   :  { %2243 = vadd.xlane.f32.xlu0 %v2242_v37 }
0x10f8   :  { %v2241_v45 = vpop.xlane.xlu2 %2240 }
0x10f9   :  { %5279 = vrcp.f32 %v2241_v45  ;;  %v2256_v52 = vand.u32 2147483648, %v2241_v45  ;;  %v2254_v54 = vand.u32 2147483647, %v2241_v45  ;;  %vm2250_vm11 = vweird.f32 %v2241_v45 }
0x10fb   :  { %v2257_v58 = vor.u32 1.1754944e-38, %v2256_v52  ;;  %vm2255_vm13 = vcmp.eq.f32.partialorder %v2254_v54, 8.507059e+37 }
0x10ff   :  { %v5280_v47 = vpop.eup %5279 }
0x1100   :  { %v2246_v48 = vmul.f32 %v5280_v47, %v2241_v45  ;;  %v2244_v49 = vpop.xlane.xlu0 %2243  ;;  %vm2251_vm10 = vweird.f32 %v5280_v47  ;;  %v4976_v45 = vld [vmem:[%s7112_s7 + $0x290] sm:$0xff] }
0x1101   :  { %5281 = vrcp.f32 %v2244_v49  ;;  %vm2252_vm12 = vmor %vm2250_vm11, %vm2251_vm10  ;;  %v2271_v2 = vand.u32 2147483648, %v2244_v49  ;;  %v2269_v0 = vand.u32 2147483647, %v2244_v49  ;;  %vm2265_vm15 = vweird.f32 %v2244_v49 }
0x1102   :  { %v2247_v51 = vsub.f32 1.0, %v2246_v48  ;;  %v4974_v48 = vld [vmem:[%s7112_s7 + $0x280] sm:$0xff] }
0x1103   :  { %v2272_v5 = vor.u32 1.1754944e-38, %v2271_v2  ;;  %vm2270_vm2 = vcmp.eq.f32.partialorder %v2269_v0, 8.507059e+37 }
0x1104   :  { %v2248_v53 = vmul.f32 %v5280_v47, %v2247_v51 }
0x1106   :  { %v2249_v56 = vadd.f32 %v5280_v47, %v2248_v53 }
0x1107   :  { %v5282_v57 = vpop.eup %5281 }
0x1108   :  { %v2253_v59 = vsel %vm2252_vm12, %v5280_v47, %v2249_v56  ;;  %v2261_v60 = vmul.f32 %v5282_v57, %v2244_v49  ;;  %vm2266_vm14 = vweird.f32 %v5282_v57 }
0x1109   :  { %v2258_v61 = vsel %vm2255_vm13, %v2257_v58, %v2253_v59  ;;  %vm2267_vm1 = vmor %vm2265_vm15, %vm2266_vm14 }
0x110a   :  { %v2259_v62 = vmul.f32 %v5276_v33, %v2258_v61  ;;  %v2262_v63 = vsub.f32 1.0, %v2261_v60 }
0x110c   :  { %4926 = vst.msk [vmem:[%s7125_s20 + $0x40] sm:$0xff] %vm868_vm6, %v2259_v62  ;;  %v2263_v1 = vmul.f32 %v5282_v57, %v2262_v63  ;;  %4928 = vmatmul.msk.f32.vlgmr.msra.gmra.mxu3 %vm868_vm6, %v2259_v62 }
0x110e   :  { %v2264_v6 = vadd.f32 %v5282_v57, %v2263_v1 }
0x1110   :  { %v2268_v3 = vsel %vm2267_vm1, %v5282_v57, %v2264_v6 }
0x1111   :  { %v2273_v9 = vsel %vm2270_vm2, %v2272_v5, %v2268_v3 }
0x1112   :  { %v2274_v4 = vmul.f32 %v5278_v36, %v2273_v9 }
0x1114   :  { %4927 = vst.msk [vmem:[%s7125_s20 + $0x48] sm:$0xff] %vm868_vm6, %v2274_v4  ;;  %4929 = vmatmul.msk.f32.vlgmr.msra.gmra.mxu0 %vm868_vm6, %v2274_v4  ;;  %4943 = vmatmul.msk.f32.vlgmr.msrb.gmra.mxu3 %vm66_vm0, %v6281_v12 }
0x111c   :  { %4944 = vmatmul.msk.f32.gmra.mxu3 %vm66_vm0, %v6292_v15  ;;  %4949 = vmatmul.msk.f32.vlgmr.msrb.gmra.mxu0 %vm66_vm0, %v6281_v12 }
0x1124   :  { %4950 = vmatmul.msk.f32.gmra.mxu0 %vm66_vm0, %v6292_v15 }
0x118f   :  { %v2298_v50 = vpop.f32.mrf.mxu3 }
0x1190   :  { %4931 = vmatmul.msk.f32.vlgmr.msra.gmra.mxu1 %vm868_vm6, %v2298_v50 }
0x1191   :  { %v2321_v11 = vpop.f32.mrf.mxu0 }
0x1197   :  { %v2407_v8 = vpop.f32.mrf.mxu3 }
0x1198   :  { %4932 = vmatmul.msk.f32.gmra.mxu1 %vm868_vm6, %v2321_v11  ;;  %v4959_v11 = vld [vmem:[%s7114_s9 + $0x28] sm:$0xff] }
0x1199   :  { %4951 = vmatpush.xpose.msk.msrb.mxu1 %vm868_vm6, %v2407_v8  ;;  %v2435_v14 = vpop.f32.mrf.mxu0 }
0x119a   :  { %2562 = vmatpush.msra.mxu3 %v2435_v14 }
0x119c   :  { %2668 = vmatpush.msrb.mxu3 %v4971_v40 }
0x119d   :  { %2613 = vmatpush.msra.mxu1 %v4959_v11 }
0x119e   :  { %2669 = vmatpush.msrb.mxu3 %v4970_v41 }
0x119f   :  { %v2410_v16 = vpop.f32.mrf.mxu3 }
0x11a0   :  { %4952 = vmatmul.msk.f32.vlgmr.msrb.gmra.mxu1 %vm868_vm6, %v2379_v13  ;;  %4953 = vmatpush.xpose.msk.msrb.mxu2 %vm868_vm6, %v2410_v16 }
0x11a1   :  { %v2438_v17 = vpop.f32.mrf.mxu0  ;;  %2670 = vmatpush.msrb.mxu3 %v4969_v42 }
0x11a2   :  { %2585 = vmatpush.msra.mxu0 %v2438_v17  ;;  %v4994_v17 = vld [vmem:[%s7112_s7 + $0x2b8] sm:$0xff] }
0x11a3   :  { %4954 = vmatmul.msk.f32.vlgmr.msrb.gmra.mxu2 %vm868_vm6, %v2382_v20  ;;  %2671 = vmatpush.msrb.mxu3 %v4968_v43  ;;  %v4993_v20 = vld [vmem:[%s7112_s7 + $0x2b0] sm:$0xff] }
0x11a4   :  { %2640 = vmatpush.msra.mxu2 %v4965_v55  ;;  %2696 = vmatpush.msrb.mxu0 %v4977_v44 }
0x11a6   :  { %2641 = vmatpush.msra.mxu2 %v4964_v19  ;;  %2697 = vmatpush.msrb.mxu0 %v4976_v45 }
0x11a8   :  { %2642 = vmatpush.msra.mxu2 %v4963_v22  ;;  %2698 = vmatpush.msrb.mxu0 %v4975_v46 }
0x11aa   :  { %2643 = vmatpush.msra.mxu2 %v4962_v23  ;;  %2699 = vmatpush.msrb.mxu0 %v4974_v48  ;;  %v4999_v48 = vld [vmem:[%s7112_s7 + $0x2d0] sm:$0xff] }
0x11ab   :  { %4966 = vmatmul.msk.f32.vlgmr.msra.gmra.mxu2 %vm66_vm0, %v6281_v12 }
0x11b3   :  { %4967 = vmatmul.msk.f32.gmra.mxu2 %vm66_vm0, %v6292_v15 }
0x120d   :  { %v6385_v24 = vpop.f32.mrf.mxu1 }
0x1215   :  { %v6387_v25 = vpop.f32.mrf.mxu1 }
0x121d   :  { %v2464_v26 = vpop.f32.mrf.mxu1 }
0x121e   :  { %v2493_v27 = vsel %vm868_vm6, %v2464_v26, -inf }
0x121f   :  { %2494 = vmax.xlane.f32.xlu1 %v2493_v27  ;;  %v4991_v27 = vld [vmem:[%s7112_s7 + $0x2a0] sm:$0xff] }
0x1226   :  { %v2490_v28 = vpop.f32.mrf.mxu2 }
0x1227   :  { %v2496_v29 = vsel %vm868_vm6, %v2490_v28, -inf }
0x1228   :  { %2497 = vmax.xlane.f32.xlu2 %v2496_v29 }
0x122e   :  { %v2645_v55 = vpop.f32.mrf.mxu2 }
0x1236   :  { %v2648_v22 = vpop.f32.mrf.mxu2 }
0x1292   :  { %v2495_v30 = vpop.xlane.xlu1 %2494 }
0x1293   :  { %v2499_v31 = vsub.f32 %v2464_v26, %v2495_v30  ;;  %v4992_v26 = vld [vmem:[%s7112_s7 + $0x2a8] sm:$0xff] }
0x1295   :  { %v2501_v32 = vmul.f32 1.442695, %v2499_v31 }
0x1297   :  { %5283 = vpow2.f32 %v2501_v32 }
0x129b   :  { %v2498_v33 = vpop.xlane.xlu2 %2497 }
0x129c   :  { %v2500_v34 = vsub.f32 %v2490_v28, %v2498_v33  ;;  %v5219_v28 = vld [vmem:[%s7115_s10 + $0x1] ss:$0 sm:$0xff] }
0x129d   :  { %v5284_v35 = vpop.eup %5283  ;;  %v2086_v29 = vadd.f32 %v5219_v28, %v6308_v18  ;;  %v2089_v33 = vadd.f32 %v5219_v28, %v6312_v21 }
0x129e   :  { %v2503_v36 = vmul.f32 1.442695, %v2500_v34  ;;  %v2505_v37 = vsel %vm868_vm6, %v5284_v35, 0.0 }
0x129f   :  { %2506 = vadd.xlane.f32.xlu0 %v2505_v37  ;;  %v2355_v30 = vadd.f32 %v6385_v24, %v2086_v29  ;;  %v2356_v34 = vadd.f32 %v6387_v25, %v2089_v33 }
0x12a0   :  { %5285 = vpow2.f32 %v2503_v36 }
0x12a6   :  { %v5286_v38 = vpop.eup %5285 }
0x12a7   :  { %v2508_v39 = vsel %vm868_vm6, %v5286_v38, 0.0 }
0x12a8   :  { %2509 = vadd.xlane.f32.xlu1 %v2508_v39 }
0x1312   :  { %v2507_v47 = vpop.xlane.xlu0 %2506 }
0x1313   :  { %5287 = vrcp.f32 %v2507_v47  ;;  %v2522_v54 = vand.u32 2147483648, %v2507_v47  ;;  %v2520_v57 = vand.u32 2147483647, %v2507_v47  ;;  %vm2516_vm4 = vweird.f32 %v2507_v47 }
0x1315   :  { %v2523_v59 = vor.u32 1.1754944e-38, %v2522_v54  ;;  %vm2521_vm7 = vcmp.eq.f32.partialorder %v2520_v57, 8.507059e+37  ;;  %v5004_v54 = vld [vmem:[%s7112_s7 + $0x2e8] sm:$0xff]  ;;  %v5003_v57 = vld [vmem:[%s7112_s7 + $0x2e0] sm:$0xff] }
0x1319   :  { %v5288_v49 = vpop.eup %5287 }
0x131a   :  { %v2512_v51 = vmul.f32 %v5288_v49, %v2507_v47  ;;  %vm2517_vm3 = vweird.f32 %v5288_v49  ;;  %v5000_v47 = vld [vmem:[%s7112_s7 + $0x2d8] sm:$0xff] }
0x131b   :  { %v2510_v52 = vpop.xlane.xlu1 %2509  ;;  %vm2518_vm5 = vmor %vm2516_vm4, %vm2517_vm3 }
0x131c   :  { %v2513_v53 = vsub.f32 1.0, %v2512_v51  ;;  %5289 = vrcp.f32 %v2510_v52  ;;  %v2537_v0 = vand.u32 2147483648, %v2510_v52  ;;  %v2535_v5 = vand.u32 2147483647, %v2510_v52  ;;  %v4997_v51 = vld [vmem:[%s7112_s7 + $0x2c0] sm:$0xff] }
0x131d   :  { %vm2531_vm9 = vweird.f32 %v2510_v52 }
0x131e   :  { %v2514_v56 = vmul.f32 %v5288_v49, %v2513_v53  ;;  %v2538_v9 = vor.u32 1.1754944e-38, %v2537_v0  ;;  %vm2536_vm11 = vcmp.eq.f32.partialorder %v2535_v5, 8.507059e+37  ;;  %v5005_v53 = vld [vmem:[%s7112_s7 + $0x2f0] sm:$0xff] }
0x1320   :  { %v2515_v58 = vadd.f32 %v5288_v49, %v2514_v56 }
0x1322   :  { %v5290_v60 = vpop.eup %5289  ;;  %v2519_v61 = vsel %vm2518_vm5, %v5288_v49, %v2515_v58  ;;  %v4998_v49 = vld [vmem:[%s7112_s7 + $0x2c8] sm:$0xff] }
0x1323   :  { %v2524_v62 = vsel %vm2521_vm7, %v2523_v59, %v2519_v61  ;;  %v2527_v63 = vmul.f32 %v5290_v60, %v2510_v52  ;;  %vm2532_vm8 = vweird.f32 %v5290_v60  ;;  %v5006_v52 = vld [vmem:[%s7112_s7 + $0x2f8] sm:$0xff] }
0x1324   :  { %v2525_v2 = vmul.f32 %v5284_v35, %v2524_v62  ;;  %vm2533_vm10 = vmor %vm2531_vm9, %vm2532_vm8 }
0x1325   :  { %v2528_v1 = vsub.f32 1.0, %v2527_v63 }
0x1326   :  { %4955 = vst.msk [vmem:[%s7125_s20 + $0x50] sm:$0xff] %vm868_vm6, %v2525_v2  ;;  %4957 = vmatmul.msk.f32.vlgmr.msra.gmra.mxu3 %vm868_vm6, %v2525_v2 }
0x1327   :  { %v2529_v6 = vmul.f32 %v5290_v60, %v2528_v1 }
0x1329   :  { %v2530_v3 = vadd.f32 %v5290_v60, %v2529_v6 }
0x132b   :  { %v2534_v4 = vsel %vm2533_vm10, %v5290_v60, %v2530_v3 }
0x132c   :  { %v2539_v10 = vsel %vm2536_vm11, %v2538_v9, %v2534_v4 }
0x132d   :  { %v2540_v50 = vmul.f32 %v5286_v38, %v2539_v10 }
0x132e   :  { %4972 = vmatmul.msk.f32.vlgmr.msrb.gmra.mxu3 %vm66_vm0, %v6281_v12 }
0x132f   :  { %4956 = vst.msk [vmem:[%s7125_s20 + $0x58] sm:$0xff] %vm868_vm6, %v2540_v50  ;;  %4958 = vmatmul.msk.f32.vlgmr.msra.gmra.mxu0 %vm868_vm6, %v2540_v50 }
0x1336   :  { %4973 = vmatmul.msk.f32.gmra.mxu3 %vm66_vm0, %v6292_v15 }
0x1337   :  { %4978 = vmatmul.msk.f32.vlgmr.msrb.gmra.mxu0 %vm66_vm0, %v6281_v12 }
0x133f   :  { %4979 = vmatmul.msk.f32.gmra.mxu0 %vm66_vm0, %v6292_v15 }
0x13a9   :  { %v2564_v8 = vpop.f32.mrf.mxu3 }
0x13aa   :  { %4960 = vmatmul.msk.f32.vlgmr.msra.gmra.mxu1 %vm868_vm6, %v2564_v8 }
0x13ac   :  { %v2587_v13 = vpop.f32.mrf.mxu0 }
0x13b1   :  { %v2673_v14 = vpop.f32.mrf.mxu3 }
0x13b2   :  { %4961 = vmatmul.msk.f32.gmra.mxu1 %vm868_vm6, %v2587_v13 }
0x13b3   :  { %4980 = vmatpush.xpose.msk.msrb.mxu1 %vm868_vm6, %v2673_v14 }
0x13b4   :  { %v2701_v16 = vpop.f32.mrf.mxu0 }
0x13b5   :  { %2828 = vmatpush.msra.mxu3 %v2701_v16 }
0x13b7   :  { %2934 = vmatpush.msrb.mxu3 %v5000_v47 }
0x13b9   :  { %v2676_v19 = vpop.f32.mrf.mxu3  ;;  %2935 = vmatpush.msrb.mxu3 %v4999_v48 }
0x13ba   :  { %4981 = vmatmul.msk.f32.vlgmr.msrb.gmra.mxu1 %vm868_vm6, %v2645_v55  ;;  %4982 = vmatpush.xpose.msk.msrb.mxu2 %vm868_vm6, %v2676_v19  ;;  %v4988_v19 = vld [vmem:[%s7114_s9 + $0x30] sm:$0xff] }
0x13bb   :  { %2936 = vmatpush.msrb.mxu3 %v4998_v49  ;;  %2879 = vmatpush.msra.mxu1 %v4988_v19 }
0x13bc   :  { %v2704_v23 = vpop.f32.mrf.mxu0 }
0x13bd   :  { %4983 = vmatmul.msk.f32.vlgmr.msrb.gmra.mxu2 %vm868_vm6, %v2648_v22  ;;  %2851 = vmatpush.msra.mxu0 %v2704_v23 }
0x13be   :  { %2906 = vmatpush.msra.mxu2 %v4994_v17  ;;  %2937 = vmatpush.msrb.mxu3 %v4997_v51 }
0x13bf   :  { %2962 = vmatpush.msrb.mxu0 %v5006_v52 }
0x13c0   :  { %2907 = vmatpush.msra.mxu2 %v4993_v20 }
0x13c1   :  { %2963 = vmatpush.msrb.mxu0 %v5005_v53 }
0x13c2   :  { %2908 = vmatpush.msra.mxu2 %v4992_v26 }
0x13c3   :  { %2964 = vmatpush.msrb.mxu0 %v5004_v54 }
0x13c4   :  { %2909 = vmatpush.msra.mxu2 %v4991_v27 }
0x13c5   :  { %4995 = vmatmul.msk.f32.vlgmr.msra.gmra.mxu2 %vm66_vm0, %v6281_v12  ;;  %2965 = vmatpush.msrb.mxu0 %v5003_v57 }
0x13cd   :  { %4996 = vmatmul.msk.f32.gmra.mxu2 %vm66_vm0, %v6292_v15 }
0x1427   :  { %v2615_v31 = vpop.f32.mrf.mxu1 }
0x1428   :  { %v6465_v32 = vadd.f32 %v2615_v31, %v2355_v30 }
0x142f   :  { %v2618_v35 = vpop.f32.mrf.mxu1 }
0x1430   :  { %v6469_v36 = vadd.f32 %v2618_v35, %v2356_v34 }
0x1437   :  { %v2730_v37 = vpop.f32.mrf.mxu1 }
0x1438   :  { %v2759_v38 = vsel %vm868_vm6, %v2730_v37, -inf }
0x1439   :  { %2760 = vmax.xlane.f32.xlu2 %v2759_v38 }
0x1440   :  { %v2756_v39 = vpop.f32.mrf.mxu2 }
0x1441   :  { %v2762_v40 = vsel %vm868_vm6, %v2756_v39, -inf }
0x1442   :  { %2763 = vmax.xlane.f32.xlu0 %v2762_v40 }
0x1448   :  { %v2911_v26 = vpop.f32.mrf.mxu2 }
0x1450   :  { %v2914_v29 = vpop.f32.mrf.mxu2 }
0x14ac   :  { %v2761_v18 = vpop.xlane.xlu2 %2760 }
0x14ad   :  { %v2765_v24 = vsub.f32 %v2730_v37, %v2761_v18 }
0x14af   :  { %v2767_v41 = vmul.f32 1.442695, %v2765_v24 }
0x14b1   :  { %5291 = vpow2.f32 %v2767_v41 }
0x14b5   :  { %v2764_v42 = vpop.xlane.xlu0 %2763 }
0x14b6   :  { %v2766_v43 = vsub.f32 %v2756_v39, %v2764_v42 }
0x14b7   :  { %v5292_v21 = vpop.eup %5291 }
0x14b8   :  { %v2769_v44 = vmul.f32 1.442695, %v2766_v43  ;;  %v2771_v25 = vsel %vm868_vm6, %v5292_v21, 0.0 }
0x14b9   :  { %2772 = vadd.xlane.f32.xlu1 %v2771_v25 }
0x14ba   :  { %5293 = vpow2.f32 %v2769_v44 }
0x14c0   :  { %v5294_v45 = vpop.eup %5293 }
0x14c1   :  { %v2774_v46 = vsel %vm868_vm6, %v5294_v45, 0.0 }
0x14c2   :  { %2775 = vadd.xlane.f32.xlu2 %v2774_v46 }
0x152c   :  { %v2773_v56 = vpop.xlane.xlu1 %2772 }
0x152d   :  { %5295 = vrcp.f32 %v2773_v56  ;;  %v2788_v62 = vand.u32 2147483648, %v2773_v56  ;;  %v2786_v2 = vand.u32 2147483647, %v2773_v56  ;;  %vm2782_vm13 = vweird.f32 %v2773_v56 }
0x152f   :  { %v2789_v0 = vor.u32 1.1754944e-38, %v2788_v62  ;;  %vm2787_vm15 = vcmp.eq.f32.partialorder %v2786_v2, 8.507059e+37 }
0x1533   :  { %v5296_v58 = vpop.eup %5295 }
0x1534   :  { %v2778_v59 = vmul.f32 %v5296_v58, %v2773_v56  ;;  %vm2783_vm12 = vweird.f32 %v5296_v58 }
0x1535   :  { %v2776_v60 = vpop.xlane.xlu2 %2775  ;;  %vm2784_vm14 = vmor %vm2782_vm13, %vm2783_vm12 }
0x1536   :  { %v2779_v61 = vsub.f32 1.0, %v2778_v59  ;;  %5297 = vrcp.f32 %v2776_v60  ;;  %v2803_v50 = vand.u32 2147483648, %v2776_v60  ;;  %v2801_v8 = vand.u32 2147483647, %v2776_v60 }
0x1537   :  { %vm2797_vm2 = vweird.f32 %v2776_v60 }
0x1538   :  { %v2780_v63 = vmul.f32 %v5296_v58, %v2779_v61  ;;  %v2804_v14 = vor.u32 1.1754944e-38, %v2803_v50  ;;  %vm2802_vm4 = vcmp.eq.f32.partialorder %v2801_v8, 8.507059e+37 }
0x153a   :  { %v2781_v1 = vadd.f32 %v5296_v58, %v2780_v63 }
0x153c   :  { %v5298_v6 = vpop.eup %5297  ;;  %v2785_v5 = vsel %vm2784_vm14, %v5296_v58, %v2781_v1 }
0x153d   :  { %v2790_v3 = vsel %vm2787_vm15, %v2789_v0, %v2785_v5  ;;  %v2793_v9 = vmul.f32 %v5298_v6, %v2776_v60  ;;  %vm2798_vm1 = vweird.f32 %v5298_v6 }
0x153e   :  { %v2791_v4 = vmul.f32 %v5292_v21, %v2790_v3  ;;  %vm2799_vm3 = vmor %vm2797_vm2, %vm2798_vm1 }
0x153f   :  { %v2794_v10 = vsub.f32 1.0, %v2793_v9 }
0x1540   :  { %4984 = vst.msk [vmem:[%s7125_s20 + $0x60] sm:$0xff] %vm868_vm6, %v2791_v4  ;;  %4986 = vmatmul.msk.f32.vlgmr.msra.gmra.mxu3 %vm868_vm6, %v2791_v4  ;;  %v5017_v4 = vld [vmem:[%s7114_s9 + $0x38] sm:$0xff] }
0x1541   :  { %v2795_v11 = vmul.f32 %v5298_v6, %v2794_v10 }
0x1543   :  { %v2796_v13 = vadd.f32 %v5298_v6, %v2795_v11 }
0x1545   :  { %v2800_v55 = vsel %vm2799_vm3, %v5298_v6, %v2796_v13 }
0x1546   :  { %v2805_v16 = vsel %vm2802_vm4, %v2804_v14, %v2800_v55 }
0x1547   :  { %v2806_v17 = vmul.f32 %v5294_v45, %v2805_v16 }
0x1548   :  { %5001 = vmatmul.msk.f32.vlgmr.msrb.gmra.mxu3 %vm66_vm0, %v6281_v12 }
0x1549   :  { %4985 = vst.msk [vmem:[%s7125_s20 + $0x68] sm:$0xff] %vm868_vm6, %v2806_v17  ;;  %4987 = vmatmul.msk.f32.vlgmr.msra.gmra.mxu0 %vm868_vm6, %v2806_v17 }
0x1550   :  { %5002 = vmatmul.msk.f32.gmra.mxu3 %vm66_vm0, %v6292_v15 }
0x1551   :  { %5007 = vmatmul.msk.f32.vlgmr.msrb.gmra.mxu0 %vm66_vm0, %v6281_v12 }
0x1559   :  { %5008 = vmatmul.msk.f32.gmra.mxu0 %vm66_vm0, %v6292_v15 }
0x15c3   :  { %v2830_v20 = vpop.f32.mrf.mxu3 }
0x15c4   :  { %4989 = vmatmul.msk.f32.vlgmr.msra.gmra.mxu1 %vm868_vm6, %v2830_v20 }
0x15c6   :  { %v2853_v22 = vpop.f32.mrf.mxu0 }
0x15cb   :  { %v2939_v23 = vpop.f32.mrf.mxu3 }
0x15cc   :  { %4990 = vmatmul.msk.f32.gmra.mxu1 %vm868_vm6, %v2853_v22 }
0x15cd   :  { %5009 = vmatpush.xpose.msk.msrb.mxu1 %vm868_vm6, %v2939_v23 }
0x15ce   :  { %v2967_v27 = vpop.f32.mrf.mxu0 }
0x15cf   :  { %3094 = vmatpush.msra.mxu3 %v2967_v27 }
0x15d1   :  { %3145 = vmatpush.msra.mxu1 %v5017_v4 }
0x15d3   :  { %v2942_v28 = vpop.f32.mrf.mxu3 }
0x15d4   :  { %5010 = vmatmul.msk.f32.vlgmr.msrb.gmra.mxu1 %vm868_vm6, %v2911_v26  ;;  %5011 = vmatpush.xpose.msk.msrb.mxu2 %vm868_vm6, %v2942_v28 }
0x15d6   :  { %v2970_v30 = vpop.f32.mrf.mxu0 }
0x15d7   :  { %5012 = vmatmul.msk.f32.vlgmr.msrb.gmra.mxu2 %vm868_vm6, %v2914_v29  ;;  %3117 = vmatpush.msra.mxu0 %v2970_v30 }
0x1641   :  { %v2881_v31 = vpop.f32.mrf.mxu1 }
0x1642   :  { %v6527_v33 = vadd.f32 %v2881_v31, %v6465_v32  ;;  %v5025_v31 = vld [vmem:[%s7118_s13 + $0x38] sm:$0xff] }
0x1643   :  { %3243 = vmatpush.msra.mxu2 %v5025_v31 }
0x1649   :  { %v2884_v34 = vpop.f32.mrf.mxu1 }
0x164a   :  { %v6530_v35 = vadd.f32 %v2884_v34, %v6469_v36  ;;  %v5023_v34 = vld [vmem:[%s7118_s13 + $0x28] sm:$0xff] }
0x1651   :  { %v2996_v37 = vpop.f32.mrf.mxu1 }
0x1652   :  { %v3025_v38 = vsel %vm868_vm6, %v2996_v37, -inf }
0x1653   :  { %3026 = vmax.xlane.f32.xlu0 %v3025_v38 }
0x165a   :  { %v3022_v39 = vpop.f32.mrf.mxu2 }
0x165b   :  { %v3028_v40 = vsel %vm868_vm6, %v3022_v39, -inf }
0x165c   :  { %3029 = vmax.xlane.f32.xlu1 %v3028_v40  ;;  %v5044_v40 = vld [vmem:[%s7120_s15 + $0xf8] sm:$0xff] }
0x165d   :  { %3278 = vmatpush.msrb.mxu3 %v5044_v40 }
0x16c6   :  { %v3027_v18 = vpop.xlane.xlu0 %3026 }
0x16c7   :  { %v3031_v24 = vsub.f32 %v2996_v37, %v3027_v18  ;;  %v5043_v18 = vld [vmem:[%s7120_s15 + $0xf0] sm:$0xff] }
0x16c8   :  { %3279 = vmatpush.msrb.mxu3 %v5043_v18 }
0x16c9   :  { %v3033_v41 = vmul.f32 1.442695, %v3031_v24  ;;  %v5042_v24 = vld [vmem:[%s7120_s15 + $0xe8] sm:$0xff] }
0x16ca   :  { %3280 = vmatpush.msrb.mxu3 %v5042_v24 }
0x16cb   :  { %5299 = vpow2.f32 %v3033_v41 }
0x16cf   :  { %v3030_v42 = vpop.xlane.xlu1 %3029 }
0x16d0   :  { %v3032_v43 = vsub.f32 %v3022_v39, %v3030_v42 }
0x16d1   :  { %v5300_v32 = vpop.eup %5299 }
0x16d2   :  { %v3035_v21 = vmul.f32 1.442695, %v3032_v43  ;;  %v3037_v44 = vsel %vm868_vm6, %v5300_v32, 0.0  ;;  %v5041_v43 = vld [vmem:[%s7120_s15 + $0xe0] sm:$0xff] }
0x16d3   :  { %3038 = vadd.xlane.f32.xlu2 %v3037_v44  ;;  %v5040_v44 = vld [vmem:[%s7120_s15 + $0xd8] sm:$0xff]  ;;  %3281 = vmatpush.msrb.mxu3 %v5041_v43 }
0x16d4   :  { %5301 = vpow2.f32 %v3035_v21  ;;  %v5058_v43 = vld [vmem:[%s7112_s7 + $0x318] sm:$0xff] }
0x16d5   :  { %3282 = vmatpush.msrb.mxu3 %v5040_v44  ;;  %3417 = vmatpush.msrb.mxu1 %v5058_v43  ;;  %v5050_v44 = vld [vmem:[%s7113_s8 + $0x50] sm:$0xff] }
0x16da   :  { %v5302_v36 = vpop.eup %5301 }
0x16db   :  { %v3040_v25 = vsel %vm868_vm6, %v5302_v36, 0.0 }
0x16dc   :  { %3041 = vadd.xlane.f32.xlu0 %v3040_v25  ;;  %v5039_v25 = vld [vmem:[%s7120_s15 + $0xd0] sm:$0xff] }
0x16dd   :  { %3283 = vmatpush.msrb.mxu3 %v5039_v25  ;;  %v5063_v25 = vld [vmem:[%s7112_s7 + $0x330] sm:$0xff] }
0x1746   :  { %v3039_v45 = vpop.xlane.xlu2 %3038 }
0x1747   :  { %5303 = vrcp.f32 %v3039_v45  ;;  %v3054_v51 = vand.u32 2147483648, %v3039_v45  ;;  %v3052_v53 = vand.u32 2147483647, %v3039_v45  ;;  %vm3048_vm7 = vweird.f32 %v3039_v45 }
0x1749   :  { %v3055_v56 = vor.u32 1.1754944e-38, %v3054_v51  ;;  %vm3053_vm9 = vcmp.eq.f32.partialorder %v3052_v53, 8.507059e+37 }
0x174d   :  { %v5304_v46 = vpop.eup %5303 }
0x174e   :  { %v3044_v47 = vmul.f32 %v5304_v46, %v3039_v45  ;;  %vm3049_vm5 = vweird.f32 %v5304_v46 }
0x174f   :  { %v3042_v48 = vpop.xlane.xlu0 %3041  ;;  %vm3050_vm8 = vmor %vm3048_vm7, %vm3049_vm5 }
0x1750   :  { %v3045_v49 = vsub.f32 1.0, %v3044_v47  ;;  %5305 = vrcp.f32 %v3042_v48  ;;  %v3069_v63 = vand.u32 2147483648, %v3042_v48  ;;  %v3067_v1 = vand.u32 2147483647, %v3042_v48 }
0x1751   :  { %vm3063_vm11 = vweird.f32 %v3042_v48 }
0x1752   :  { %v3046_v52 = vmul.f32 %v5304_v46, %v3045_v49  ;;  %v3070_v6 = vor.u32 1.1754944e-38, %v3069_v63  ;;  %vm3068_vm13 = vcmp.eq.f32.partialorder %v3067_v1, 8.507059e+37  ;;  %v5033_v1 = vld [vmem:[%s7120_s15 + $0xa0] sm:$0xff] }
0x1754   :  { %v3047_v54 = vadd.f32 %v5304_v46, %v3046_v52  ;;  %v5036_v52 = vld [vmem:[%s7120_s15 + $0xb8] sm:$0xff] }
0x1756   :  { %v5306_v57 = vpop.eup %5305  ;;  %v3051_v58 = vsel %vm3050_vm8, %v5304_v46, %v3047_v54  ;;  %v5038_v46 = vld [vmem:[%s7120_s15 + $0xc8] sm:$0xff] }
0x1757   :  { %v3056_v59 = vsel %vm3053_vm9, %v3055_v56, %v3051_v58  ;;  %v3059_v60 = vmul.f32 %v5306_v57, %v3042_v48  ;;  %vm3064_vm10 = vweird.f32 %v5306_v57  ;;  %v5037_v48 = vld [vmem:[%s7120_s15 + $0xc0] sm:$0xff]  ;;  %3284 = vmatpush.msrb.mxu3 %v5038_v46  ;;  %v5049_v46 = vld [vmem:[%s7113_s8 + $0x48] sm:$0xff] }
0x1758   :  { %v3057_v61 = vmul.f32 %v5300_v32, %v3056_v59  ;;  %vm3065_vm12 = vmor %vm3063_vm11, %vm3064_vm10  ;;  %v5220_v56 = vld [vmem:[%s7116_s11 + $0x1] ss:$0 sm:$0xff] }
0x1759   :  { %v3060_v62 = vsub.f32 1.0, %v3059_v60  ;;  %3285 = vmatpush.msrb.mxu3 %v5037_v48  ;;  %v5221_v60 = vld [vmem:[%s7117_s12 + $0x1] ss:$0 sm:$0xff]  ;;  %v5062_v48 = vld [vmem:[%s7112_s7 + $0x328] sm:$0xff] }
0x175a   :  { %5013 = vst.msk [vmem:[%s7125_s20 + $0x70] sm:$0xff] %vm868_vm6, %v3057_v61  ;;  %5015 = vmatmul.msk.f32.vlgmr.msra.gmra.mxu3 %vm868_vm6, %v3057_v61 }
0x175b   :  { %v3061_v2 = vmul.f32 %v5306_v57, %v3060_v62  ;;  %3286 = vmatpush.msrb.mxu3 %v5036_v52  ;;  %v5034_v62 = vld [vmem:[%s7120_s15 + $0xa8] sm:$0xff]  ;;  %v5055_v52 = vld [vmem:[%s7112_s7 + $0x300] sm:$0xff] }
0x175d   :  { %v3062_v0 = vadd.f32 %v5306_v57, %v3061_v2 }
0x175f   :  { %v3066_v5 = vsel %vm3065_vm12, %v5306_v57, %v3062_v0  ;;  %v5035_v57 = vld [vmem:[%s7120_s15 + $0xb0] sm:$0xff] }
0x1760   :  { %v3071_v3 = vsel %vm3068_vm13, %v3070_v6, %v3066_v5  ;;  %3287 = vmatpush.msrb.mxu3 %v5035_v57  ;;  %v5032_v5 = vld [vmem:[%s7120_s15 + $0x98] sm:$0xff] }
0x1761   :  { %v3072_v9 = vmul.f32 %v5302_v36, %v3071_v3 }
0x1762   :  { %3288 = vmatpush.msrb.mxu3 %v5034_v62  ;;  %v5068_v62 = vld [vmem:[%s7112_s7 + $0x348] sm:$0xff] }
0x1763   :  { %5014 = vst.msk [vmem:[%s7125_s20 + $0x78] sm:$0xff] %vm868_vm6, %v3072_v9  ;;  %5016 = vmatmul.msk.f32.vlgmr.msra.gmra.mxu0 %vm868_vm6, %v3072_v9 }
0x1764   :  { %3289 = vmatpush.msrb.mxu3 %v5033_v1 }
0x1766   :  { %3290 = vmatpush.msrb.mxu3 %v5032_v5 }
0x17dd   :  { %v3096_v10 = vpop.f32.mrf.mxu3 }
0x17de   :  { %5018 = vmatmul.msk.f32.vlgmr.msra.gmra.mxu1 %vm868_vm6, %v3096_v10 }
0x17e0   :  { %v3119_v50 = vpop.f32.mrf.mxu0 }
0x17e6   :  { %5019 = vmatmul.msk.f32.gmra.mxu1 %vm868_vm6, %v3119_v50 }
0x185b   :  { %v3147_v11 = vpop.f32.mrf.mxu1 }
0x185c   :  { %v3153_v8 = vadd.f32 %v3147_v11, %v6527_v33  ;;  %v5024_v33 = vld [vmem:[%s7118_s13 + $0x30] sm:$0xff] }
0x185d   :  { %3244 = vmatpush.msra.mxu2 %v5024_v33  ;;  %v5031_v11 = vld [vmem:[%s7120_s15 + $0x90] sm:$0xff] }
0x185e   :  { %v3155_v13 = vadd.f32 %v3153_v8, %v6281_v12  ;;  %3291 = vmatpush.msrb.mxu3 %v5031_v11  ;;  %v5030_v8 = vld [vmem:[%s7120_s15 + $0x88] sm:$0xff]  ;;  %v5224_v11 = vld [vmem:[%s7122_s17 + $0x1] ss:$0 sm:$0xff] }
0x185f   :  { %3245 = vmatpush.msra.mxu2 %v5023_v34 }
0x1860   :  { %v3161_v14 = vsel %vm66_vm0, %v3155_v13, 0.0  ;;  %3292 = vmatpush.msrb.mxu3 %v5030_v8 }
0x1861   :  { %3162 = vadd.xlane.f32.xlu1 %v3161_v14  ;;  %v5222_v14 = vld [vmem:[%s7119_s14 + $0x1] ss:$0 sm:$0xff] }
0x1863   :  { %v3150_v55 = vpop.f32.mrf.mxu1 }
0x1864   :  { %v3154_v16 = vadd.f32 %v3150_v55, %v6530_v35  ;;  %v5022_v35 = vld [vmem:[%s7118_s13 + $0x20] sm:$0xff] }
0x1865   :  { %3246 = vmatpush.msra.mxu2 %v5022_v35 }
0x1866   :  { %v3156_v17 = vadd.f32 %v3154_v16, %v6292_v15 }
0x1868   :  { %v3164_v19 = vsel %vm66_vm0, %v3156_v17, 0.0 }
0x1869   :  { %3165 = vadd.xlane.f32.xlu2 %v3164_v19 }
0x18d4   :  { %v3163_v20 = vpop.xlane.xlu1 %3162 }
0x18d5   :  { %v3167_v22 = vmul.f32 %v3163_v20, %v6111_v7 }
0x18d7   :  { %v3169_v23 = vsub.f32 %v3155_v13, %v3167_v22  ;;  %v5029_v13 = vld [vmem:[%s7120_s15 + $0x80] sm:$0xff] }
0x18d8   :  { %3293 = vmatpush.msrb.mxu3 %v5029_v13 }
0x18d9   :  { %v3171_v26 = vmul.f32 %v3169_v23, %v3169_v23 }
0x18db   :  { %v3173_v27 = vsel %vm66_vm0, %v3171_v26, 0.0 }
0x18dc   :  { %3174 = vadd.xlane.f32.xlu0 %v3173_v27  ;;  %v3166_v12 = vpop.xlane.xlu2 %3165 }
0x18dd   :  { %v3168_v28 = vmul.f32 %v3166_v12, %v6111_v7 }
0x18df   :  { %v6560_v29 = vsub.f32 %v3156_v17, %v3168_v28 }
0x18e1   :  { %v3172_v30 = vmul.f32 %v6560_v29, %v6560_v29 }
0x18e3   :  { %v3176_v15 = vsel %vm66_vm0, %v3172_v30, 0.0 }
0x18e4   :  { %3177 = vadd.xlane.f32.xlu1 %v3176_v15 }
0x194f   :  { %v3175_v37 = vpop.xlane.xlu0 %3174 }
0x1950   :  { %v3179_v38 = vmul.f32 %v3175_v37, %v6111_v7 }
0x1952   :  { %v3181_v39 = vadd.f32 1e-05, %v3179_v38 }
0x1954   :  { %5307 = vrsqrt.f32 %v3181_v39  ;;  %vm3189_vm15 = vweird.f32 %v3181_v39 }
0x1957   :  { %v3178_v41 = vpop.xlane.xlu1 %3177 }
0x1958   :  { %v3180_v42 = vmul.f32 %v3178_v41, %v6111_v7 }
0x195a   :  { %v5308_v32 = vpop.eup %5307  ;;  %v3182_v21 = vadd.f32 1e-05, %v3180_v42  ;;  %v5051_v42 = vld [vmem:[%s7113_s8 + $0x58] sm:$0xff] }
0x195b   :  { %v3184_v36 = vmul.f32 %v5308_v32, %v3181_v39  ;;  %vm3190_vm14 = vweird.f32 %v5308_v32  ;;  %3389 = vmatpush.msrb.mxu0 %v5051_v42 }
0x195c   :  { %5309 = vrsqrt.f32 %v3182_v21  ;;  %vm3191_vm1 = vmor %vm3189_vm15, %vm3190_vm14  ;;  %vm3199_vm3 = vweird.f32 %v3182_v21 }
0x195d   :  { %v3185_v45 = vmul.f32 %v5308_v32, %v3184_v36  ;;  %v5057_v36 = vld [vmem:[%s7112_s7 + $0x310] sm:$0xff]  ;;  %3390 = vmatpush.msrb.mxu0 %v5050_v44 }
0x195e   :  { %3418 = vmatpush.msrb.mxu1 %v5057_v36 }
0x195f   :  { %v3186_v47 = vmul.f32 0.5, %v3185_v45  ;;  %v5086_v45 = vld [vmem:[%s7112_s7 + $0x370] sm:$0xff]  ;;  %3391 = vmatpush.msrb.mxu0 %v5049_v46 }
0x1960   :  { %v5092_v46 = vld [vmem:[%s7112_s7 + $0x390] sm:$0xff] }
0x1961   :  { %v3187_v49 = vsub.f32 1.5, %v3186_v47  ;;  %v5056_v47 = vld [vmem:[%s7112_s7 + $0x308] sm:$0xff] }
0x1962   :  { %v5310_v51 = vpop.eup %5309  ;;  %3419 = vmatpush.msrb.mxu1 %v5056_v47  ;;  %v5091_v47 = vld [vmem:[%s7112_s7 + $0x388] sm:$0xff] }
0x1963   :  { %v3188_v53 = vmul.f32 %v5308_v32, %v3187_v49  ;;  %v3194_v54 = vmul.f32 %v5310_v51, %v3182_v21  ;;  %vm3200_vm2 = vweird.f32 %v5310_v51  ;;  %v5087_v21 = vld [vmem:[%s7112_s7 + $0x378] sm:$0xff]  ;;  %v5085_v49 = vld [vmem:[%s7112_s7 + $0x368] sm:$0xff] }
0x1964   :  { %vm3201_vm4 = vmor %vm3199_vm3, %vm3200_vm2  ;;  %3683 = vmatpush.msra.mxu3 %v5087_v21  ;;  %3420 = vmatpush.msrb.mxu1 %v5055_v52  ;;  %v5098_v52 = vld [vmem:[%s7112_s7 + $0x3b0] sm:$0xff] }
0x1965   :  { %v3192_v58 = vsel %vm3191_vm1, %v5308_v32, %v3188_v53  ;;  %v3195_v59 = vmul.f32 %v5310_v51, %v3194_v54  ;;  %v5064_v32 = vld [vmem:[%s7112_s7 + $0x338] sm:$0xff]  ;;  %v5061_v53 = vld [vmem:[%s7112_s7 + $0x320] sm:$0xff] }
0x1966   :  { %v3203_v61 = vmul.f32 %v3192_v58, %v3169_v23  ;;  %v5223_v23 = vld [vmem:[%s7121_s16 + $0x1] ss:$0 sm:$0xff]  ;;  %3445 = vmatpush.msrb.mxu2 %v5064_v32  ;;  %3684 = vmatpush.msra.mxu3 %v5086_v45  ;;  %v5093_v45 = vld [vmem:[%s7112_s7 + $0x398] sm:$0xff] }
0x1967   :  { %v3196_v63 = vmul.f32 0.5, %v3195_v59  ;;  %v5084_v54 = vld [vmem:[%s7112_s7 + $0x360] sm:$0xff]  ;;  %v5070_v59 = vld [vmem:[%s7112_s7 + $0x358] sm:$0xff] }
0x1968   :  { %v3208_v2 = vmul.f32 %v5220_v56, %v3203_v61  ;;  %3446 = vmatpush.msrb.mxu2 %v5063_v25  ;;  %3685 = vmatpush.msra.mxu3 %v5085_v49 }
0x1969   :  { %v3197_v0 = vsub.f32 1.5, %v3196_v63 }
0x196a   :  { %v3213_v6 = vadd.f32 %v5221_v60, %v3208_v2  ;;  %3447 = vmatpush.msrb.mxu2 %v5062_v48  ;;  %3686 = vmatpush.msra.mxu3 %v5084_v54  ;;  %v5067_v2 = vld [vmem:[%s7112_s7 + $0x340] sm:$0xff] }
0x196b   :  { %v3198_v3 = vmul.f32 %v5310_v51, %v3197_v0  ;;  %v5090_v48 = vld [vmem:[%s7112_s7 + $0x380] sm:$0xff] }
0x196c   :  { %5027 = vmatmul.msk.f32.vlgmr.msra.gmra.mxu2 %vm66_vm0, %v3213_v6  ;;  %v5096_v54 = vld [vmem:[%s7112_s7 + $0x3a0] sm:$0xff] }
0x196d   :  { %v3202_v9 = vsel %vm3201_vm4, %v5310_v51, %v3198_v3  ;;  %v5048_v51 = vld [vmem:[%s7113_s8 + $0x40] sm:$0xff]  ;;  %3448 = vmatpush.msrb.mxu2 %v5061_v53  ;;  %v5097_v53 = vld [vmem:[%s7112_s7 + $0x3a8] sm:$0xff] }
0x196e   :  { %v3204_v4 = vmul.f32 %v3202_v9, %v6560_v29  ;;  %3392 = vmatpush.msrb.mxu0 %v5048_v51  ;;  %v5099_v51 = vld [vmem:[%s7112_s7 + $0x3b8] sm:$0xff] }
0x1970   :  { %v3209_v10 = vmul.f32 %v5220_v56, %v3204_v4  ;;  %3473 = vmatpush.msra.mxu0 %v5070_v59 }
0x1972   :  { %v3214_v50 = vadd.f32 %v5221_v60, %v3209_v10  ;;  %v5069_v60 = vld [vmem:[%s7112_s7 + $0x350] sm:$0xff] }
0x1973   :  { %3474 = vmatpush.msra.mxu0 %v5069_v60 }
0x1974   :  { %5028 = vmatmul.msk.f32.gmra.mxu2 %vm66_vm0, %v3214_v50 }
0x1975   :  { %3475 = vmatpush.msra.mxu0 %v5068_v62 }
0x1977   :  { %3476 = vmatpush.msra.mxu0 %v5067_v2 }
0x19ef   :  { %v3248_v55 = vpop.f32.mrf.mxu2 }
0x19f0   :  { %v3249_v16 = vadd.f32 %v5222_v14, %v3248_v55 }
0x19f2   :  { %v3254_v17 = vmax.f32 %v3249_v16, 0.0 }
0x19f4   :  { %3294 = vmatmul.f32.vlgmr.msrb.gmra.mxu3 %v3254_v17 }
0x19f7   :  { %v3251_v19 = vpop.f32.mrf.mxu2 }
0x19f8   :  { %v3252_v20 = vadd.f32 %v5222_v14, %v3251_v19  ;;  %v5225_v14 = vld [vmem:[%s7123_s18 + $0x1] ss:$0 sm:$0xff] }
0x19fa   :  { %v3255_v22 = vmax.f32 %v3252_v20, 0.0 }
0x19fc   :  { %3297 = vmatmul.f32.gmra.mxu3 %v3255_v22 }
0x1a77   :  { %v3295_v26 = vpop.f32.mrf.mxu3 }
0x1a78   :  { %v3296_v27 = vadd.f32 %v5223_v23, %v3295_v26 }
0x1a7a   :  { %v3301_v12 = vadd.f32 %v3296_v27, %v3213_v6 }
0x1a7c   :  { %v3307_v28 = vsel %vm66_vm0, %v3301_v12, 0.0 }
0x1a7d   :  { %3308 = vadd.xlane.f32.xlu2 %v3307_v28 }
0x1a7f   :  { %v3298_v29 = vpop.f32.mrf.mxu3 }
0x1a80   :  { %v3299_v30 = vadd.f32 %v5223_v23, %v3298_v29 }
0x1a82   :  { %v3302_v15 = vadd.f32 %v3299_v30, %v3214_v50 }
0x1a84   :  { %v3310_v31 = vsel %vm66_vm0, %v3302_v15, 0.0 }
0x1a85   :  { %3311 = vadd.xlane.f32.xlu0 %v3310_v31 }
0x1af0   :  { %v3309_v33 = vpop.xlane.xlu2 %3308 }
0x1af1   :  { %v3313_v34 = vmul.f32 %v3309_v33, %v6111_v7 }
0x1af3   :  { %v6645_v35 = vsub.f32 %v3301_v12, %v3313_v34 }
0x1af5   :  { %v3317_v37 = vmul.f32 %v6645_v35, %v6645_v35 }
0x1af7   :  { %v3319_v38 = vsel %vm66_vm0, %v3317_v37, 0.0 }
0x1af8   :  { %v3312_v39 = vpop.xlane.xlu0 %3311  ;;  %3320 = vadd.xlane.f32.xlu1 %v3319_v38 }
0x1af9   :  { %v3314_v40 = vmul.f32 %v3312_v39, %v6111_v7 }
0x1afb   :  { %v6651_v18 = vsub.f32 %v3302_v15, %v3314_v40 }
0x1afd   :  { %v3318_v24 = vmul.f32 %v6651_v18, %v6651_v18 }
0x1aff   :  { %v3322_v41 = vsel %vm66_vm0, %v3318_v24, 0.0 }
0x1b00   :  { %3323 = vadd.xlane.f32.xlu2 %v3322_v41 }
0x1b6b   :  { %v3321_v56 = vpop.xlane.xlu1 %3320 }
0x1b6c   :  { %v3325_v57 = vmul.f32 %v3321_v56, %v6111_v7 }
0x1b6e   :  { %v3327_v58 = vadd.f32 1e-05, %v3325_v57 }
0x1b70   :  { %5311 = vrsqrt.f32 %v3327_v58  ;;  %vm3335_vm7 = vweird.f32 %v3327_v58 }
0x1b73   :  { %v3324_v61 = vpop.xlane.xlu2 %3323 }
0x1b74   :  { %v3326_v63 = vmul.f32 %v3324_v61, %v6111_v7 }
0x1b76   :  { %v5312_v1 = vpop.eup %5311  ;;  %v3328_v0 = vadd.f32 1e-05, %v3326_v63 }
0x1b77   :  { %v3330_v6 = vmul.f32 %v5312_v1, %v3327_v58  ;;  %vm3336_vm5 = vweird.f32 %v5312_v1 }
0x1b78   :  { %5313 = vrsqrt.f32 %v3328_v0  ;;  %vm3337_vm8 = vmor %vm3335_vm7, %vm3336_vm5  ;;  %vm3345_vm10 = vweird.f32 %v3328_v0 }
0x1b79   :  { %v3331_v5 = vmul.f32 %v5312_v1, %v3330_v6 }
0x1b7b   :  { %v3332_v3 = vmul.f32 0.5, %v3331_v5 }
0x1b7d   :  { %v3333_v9 = vsub.f32 1.5, %v3332_v3 }
0x1b7e   :  { %v5314_v4 = vpop.eup %5313 }
0x1b7f   :  { %v3334_v10 = vmul.f32 %v5312_v1, %v3333_v9  ;;  %v3340_v50 = vmul.f32 %v5314_v4, %v3328_v0  ;;  %vm3346_vm9 = vweird.f32 %v5314_v4 }
0x1b80   :  { %vm3347_vm11 = vmor %vm3345_vm10, %vm3346_vm9 }
0x1b81   :  { %v3338_v8 = vsel %vm3337_vm8, %v5312_v1, %v3334_v10  ;;  %v3341_v13 = vmul.f32 %v5314_v4, %v3340_v50 }
0x1b82   :  { %v3349_v55 = vmul.f32 %v3338_v8, %v6645_v35 }
0x1b83   :  { %v3342_v16 = vmul.f32 0.5, %v3341_v13 }
0x1b84   :  { %v3354_v17 = vmul.f32 %v5224_v11, %v3349_v55 }
0x1b85   :  { %v3343_v19 = vsub.f32 1.5, %v3342_v16  ;;  %v5081_v16 = vld [vmem:[%s7114_s9 + $0x40] sm:$0xff] }
0x1b86   :  { %v6725_v20 = vadd.f32 %v5225_v14, %v3354_v17 }
0x1b87   :  { %v3344_v22 = vmul.f32 %v5314_v4, %v3343_v19 }
0x1b88   :  { %5053 = vmatmul.msk.f32.vlgmr.msrb.gmra.mxu0 %vm66_vm0, %v6725_v20  ;;  %5059 = vmatmul.msk.f32.vlgmr.msrb.gmra.mxu1 %vm66_vm0, %v6725_v20 }
0x1b89   :  { %v3348_v23 = vsel %vm3347_vm11, %v5314_v4, %v3344_v22  ;;  %5065 = vmatmul.msk.f32.vlgmr.msrb.gmra.mxu2 %vm66_vm0, %v6725_v20  ;;  %5088 = vmatmul.msk.f32.vlgmr.msra.gmra.mxu3 %vm66_vm0, %v6725_v20 }
0x1b8a   :  { %v3350_v26 = vmul.f32 %v3348_v23, %v6651_v18 }
0x1b8c   :  { %v3355_v27 = vmul.f32 %v5224_v11, %v3350_v26  ;;  %v5116_v26 = vld [vmem:[%s7112_s7 + $0x3d8] sm:$0xff] }
0x1b8e   :  { %v6736_v12 = vadd.f32 %v5225_v14, %v3355_v27 }
0x1b90   :  { %5054 = vmatmul.msk.f32.gmra.mxu0 %vm66_vm0, %v6736_v12  ;;  %5060 = vmatmul.msk.f32.gmra.mxu1 %vm66_vm0, %v6736_v12 }
0x1b91   :  { %5066 = vmatmul.msk.f32.gmra.mxu2 %vm66_vm0, %v6736_v12  ;;  %5089 = vmatmul.msk.f32.gmra.mxu3 %vm66_vm0, %v6736_v12 }
0x1b98   :  { %5071 = vmatmul.msk.f32.vlgmr.msra.gmra.mxu0 %vm66_vm0, %v6725_v20 }
0x1ba0   :  { %5072 = vmatmul.msk.f32.gmra.mxu0 %vm66_vm0, %v6736_v12 }
0x1c05   :  { %v6750_v28 = vpop.f32.mrf.mxu0  ;;  %v3422_v30 = vpop.f32.mrf.mxu1 }
0x1c0c   :  { %v3450_v29 = vpop.f32.mrf.mxu2  ;;  %v3688_v22 = vpop.f32.mrf.mxu3 }
0x1c0d   :  { %5073 = vmatpush.xpose.msk.msra.mxu1 %vm868_vm6, %v3450_v29  ;;  %v6753_v15 = vpop.f32.mrf.mxu0  ;;  %v3425_v34 = vpop.f32.mrf.mxu1  ;;  %v5115_v29 = vld [vmem:[%s7112_s7 + $0x3d0] sm:$0xff] }
0x1c10   :  { %5074 = vmatmul.msk.f32.vlgmr.msra.gmra.mxu1 %vm868_vm6, %v3422_v30 }
0x1c14   :  { %v3453_v31 = vpop.f32.mrf.mxu2  ;;  %v3691_v30 = vpop.f32.mrf.mxu3 }
0x1c15   :  { %5075 = vmatpush.xpose.msk.msra.mxu2 %vm868_vm6, %v3453_v31  ;;  %v3478_v33 = vpop.f32.mrf.mxu0  ;;  %v5114_v31 = vld [vmem:[%s7112_s7 + $0x3c8] sm:$0xff] }
0x1c16   :  { %3605 = vmatpush.msrb.mxu0 %v3478_v33 }
0x1c18   :  { %5076 = vmatmul.msk.f32.vlgmr.msra.gmra.mxu2 %vm868_vm6, %v3425_v34  ;;  %3711 = vmatpush.msra.mxu0 %v5093_v45  ;;  %v5113_v34 = vld [vmem:[%s7112_s7 + $0x3c0] sm:$0xff] }
0x1c19   :  { %3656 = vmatpush.msrb.mxu2 %v5081_v16 }
0x1c1a   :  { %3712 = vmatpush.msra.mxu0 %v5092_v46 }
0x1c1c   :  { %3713 = vmatpush.msra.mxu0 %v5091_v47 }
0x1c1d   :  { %v3481_v35 = vpop.f32.mrf.mxu0 }
0x1c1e   :  { %3628 = vmatpush.msrb.mxu1 %v3481_v35  ;;  %3714 = vmatpush.msra.mxu0 %v5090_v48 }
0x1c20   :  { %3739 = vmatpush.msra.mxu1 %v5099_v51  ;;  %v5128_v51 = vld [vmem:[%s7112_s7 + $0x418] sm:$0xff] }
0x1c22   :  { %3740 = vmatpush.msra.mxu1 %v5098_v52  ;;  %v5127_v52 = vld [vmem:[%s7112_s7 + $0x410] sm:$0xff] }
0x1c24   :  { %3741 = vmatpush.msra.mxu1 %v5097_v53  ;;  %v5122_v53 = vld [vmem:[%s7112_s7 + $0x3f8] sm:$0xff] }
0x1c26   :  { %3742 = vmatpush.msra.mxu1 %v5096_v54  ;;  %v5126_v54 = vld [vmem:[%s7112_s7 + $0x408] sm:$0xff] }
0x1c8d   :  { %v3507_v37 = vpop.f32.mrf.mxu1 }
0x1c8e   :  { %v3536_v38 = vsel %vm868_vm6, %v3507_v37, -inf }
0x1c8f   :  { %3537 = vmax.xlane.f32.xlu0 %v3536_v38 }
0x1c9b   :  { %v3533_v39 = vpop.f32.mrf.mxu2 }
0x1c9c   :  { %v3539_v40 = vsel %vm868_vm6, %v3533_v39, -inf }
0x1c9d   :  { %3540 = vmax.xlane.f32.xlu1 %v3539_v40 }
0x1d02   :  { %v3538_v18 = vpop.xlane.xlu0 %3537 }
0x1d03   :  { %v3542_v24 = vsub.f32 %v3507_v37, %v3538_v18  ;;  %v5226_v37 = vld [vmem:[%s7115_s10 + $0x2] ss:$0 sm:$0xff] }
0x1d04   :  { %v3395_v38 = vadd.f32 %v5226_v37, %v6750_v28  ;;  %v3398_v18 = vadd.f32 %v5226_v37, %v6753_v15 }
0x1d05   :  { %v3544_v41 = vmul.f32 1.442695, %v3542_v24 }
0x1d07   :  { %5315 = vpow2.f32 %v3544_v41 }
0x1d0d   :  { %v5316_v42 = vpop.eup %5315 }
0x1d0e   :  { %v3548_v43 = vsel %vm868_vm6, %v5316_v42, 0.0 }
0x1d0f   :  { %3549 = vadd.xlane.f32.xlu2 %v3548_v43 }
0x1d10   :  { %v3541_v32 = vpop.xlane.xlu1 %3540 }
0x1d11   :  { %v3543_v21 = vsub.f32 %v3533_v39, %v3541_v32 }
0x1d13   :  { %v3546_v44 = vmul.f32 1.442695, %v3543_v21 }
0x1d15   :  { %5317 = vpow2.f32 %v3546_v44 }
0x1d1b   :  { %v5318_v36 = vpop.eup %5317 }
0x1d1c   :  { %v3551_v25 = vsel %vm868_vm6, %v5318_v36, 0.0 }
0x1d1d   :  { %3552 = vadd.xlane.f32.xlu0 %v3551_v25 }
0x1d82   :  { %v3550_v49 = vpop.xlane.xlu2 %3549 }
0x1d83   :  { %5319 = vrcp.f32 %v3550_v49  ;;  %v3565_v59 = vand.u32 2147483648, %v3550_v49  ;;  %v3563_v61 = vand.u32 2147483647, %v3550_v49  ;;  %vm3559_vm13 = vweird.f32 %v3550_v49 }
0x1d85   :  { %v3566_v2 = vor.u32 1.1754944e-38, %v3565_v59  ;;  %vm3564_vm15 = vcmp.eq.f32.partialorder %v3563_v61, 8.507059e+37  ;;  %v5119_v59 = vld [vmem:[%s7112_s7 + $0x3e0] sm:$0xff] }
0x1d89   :  { %v5320_v56 = vpop.eup %5319 }
0x1d8a   :  { %v3555_v57 = vmul.f32 %v5320_v56, %v3550_v49  ;;  %vm3560_vm12 = vweird.f32 %v5320_v56 }
0x1d8b   :  { %vm3561_vm14 = vmor %vm3559_vm13, %vm3560_vm12 }
0x1d8c   :  { %v3556_v58 = vsub.f32 1.0, %v3555_v57  ;;  %v5125_v57 = vld [vmem:[%s7112_s7 + $0x400] sm:$0xff] }
0x1d8e   :  { %v3557_v60 = vmul.f32 %v5320_v56, %v3556_v58  ;;  %v5120_v58 = vld [vmem:[%s7112_s7 + $0x3e8] sm:$0xff] }
0x1d90   :  { %v3558_v62 = vadd.f32 %v5320_v56, %v3557_v60  ;;  %v3553_v63 = vpop.xlane.xlu0 %3552 }
0x1d91   :  { %5321 = vrcp.f32 %v3553_v63  ;;  %v3580_v4 = vand.u32 2147483648, %v3553_v63  ;;  %v3578_v50 = vand.u32 2147483647, %v3553_v63  ;;  %vm3574_vm2 = vweird.f32 %v3553_v63 }
0x1d92   :  { %v3562_v1 = vsel %vm3561_vm14, %v5320_v56, %v3558_v62  ;;  %v5121_v56 = vld [vmem:[%s7112_s7 + $0x3f0] sm:$0xff] }
0x1d93   :  { %v3567_v0 = vsel %vm3564_vm15, %v3566_v2, %v3562_v1  ;;  %v3581_v8 = vor.u32 1.1754944e-38, %v3580_v4  ;;  %vm3579_vm4 = vcmp.eq.f32.partialorder %v3578_v50, 8.507059e+37 }
0x1d94   :  { %v3568_v6 = vmul.f32 %v5316_v42, %v3567_v0 }
0x1d96   :  { %5077 = vst.msk [vmem:[%s7125_s20 + $0x80] sm:$0xff] %vm868_vm6, %v3568_v6  ;;  %5079 = vmatmul.msk.f32.vlgmr.msrb.gmra.mxu0 %vm868_vm6, %v3568_v6 }
0x1d97   :  { %v5322_v5 = vpop.eup %5321 }
0x1d98   :  { %v3570_v3 = vmul.f32 %v5322_v5, %v3553_v63  ;;  %vm3575_vm1 = vweird.f32 %v5322_v5 }
0x1d99   :  { %vm3576_vm3 = vmor %vm3574_vm2, %vm3575_vm1 }
0x1d9a   :  { %v3571_v9 = vsub.f32 1.0, %v3570_v3 }
0x1d9c   :  { %v3572_v10 = vmul.f32 %v5322_v5, %v3571_v9 }
0x1d9e   :  { %v3573_v11 = vadd.f32 %v5322_v5, %v3572_v10  ;;  %5094 = vmatmul.msk.f32.vlgmr.msra.gmra.mxu0 %vm66_vm0, %v6725_v20 }
0x1da0   :  { %v3577_v13 = vsel %vm3576_vm3, %v5322_v5, %v3573_v11 }
0x1da1   :  { %v3582_v14 = vsel %vm3579_vm4, %v3581_v8, %v3577_v13 }
0x1da2   :  { %v3583_v55 = vmul.f32 %v5318_v36, %v3582_v14 }
0x1da4   :  { %5078 = vst.msk [vmem:[%s7125_s20 + $0x88] sm:$0xff] %vm868_vm6, %v3583_v55  ;;  %5080 = vmatmul.msk.f32.vlgmr.msrb.gmra.mxu1 %vm868_vm6, %v3583_v55 }
0x1da6   :  { %5095 = vmatmul.msk.f32.gmra.mxu0 %vm66_vm0, %v6736_v12 }
0x1dac   :  { %5100 = vmatmul.msk.f32.vlgmr.msra.gmra.mxu1 %vm66_vm0, %v6725_v20 }
0x1db4   :  { %5101 = vmatmul.msk.f32.gmra.mxu1 %vm66_vm0, %v6736_v12 }
0x1e13   :  { %v3607_v17 = vpop.f32.mrf.mxu0 }
0x1e14   :  { %5082 = vmatmul.msk.f32.vlgmr.msrb.gmra.mxu2 %vm868_vm6, %v3607_v17 }
0x1e1b   :  { %v3716_v19 = vpop.f32.mrf.mxu0 }
0x1e1c   :  { %5102 = vmatpush.xpose.msk.msra.mxu2 %vm868_vm6, %v3716_v19 }
0x1e21   :  { %v3630_v23 = vpop.f32.mrf.mxu1 }
0x1e22   :  { %5083 = vmatmul.msk.f32.gmra.mxu2 %vm868_vm6, %v3630_v23 }
0x1e23   :  { %v3719_v27 = vpop.f32.mrf.mxu0 }
0x1e24   :  { %5104 = vmatpush.xpose.msk.msrb.mxu3 %vm868_vm6, %v3719_v27 }
0x1e27   :  { %5105 = vmatmul.msk.f32.vlgmr.msrb.gmra.mxu3 %vm868_vm6, %v3691_v30 }
0x1e28   :  { %3949 = vmatpush.msra.mxu3 %v5116_v26  ;;  %v5110_v26 = vld [vmem:[%s7114_s9 + $0x48] sm:$0xff] }
0x1e29   :  { %v3744_v33 = vpop.f32.mrf.mxu1  ;;  %3922 = vmatpush.msrb.mxu2 %v5110_v26 }
0x1e2a   :  { %3950 = vmatpush.msra.mxu3 %v5115_v29  ;;  %5103 = vmatmul.msk.f32.vlgmr.msra.gmra.mxu2 %vm868_vm6, %v3688_v22 }
0x1e2b   :  { %3871 = vmatpush.msrb.mxu0 %v3744_v33 }
0x1e2c   :  { %3951 = vmatpush.msra.mxu3 %v5114_v31 }
0x1e2d   :  { %3977 = vmatpush.msra.mxu0 %v5122_v53  ;;  %v5151_v53 = vld [vmem:[%s7112_s7 + $0x458] sm:$0xff] }
0x1e2e   :  { %3952 = vmatpush.msra.mxu3 %v5113_v34 }
0x1e2f   :  { %5117 = vmatmul.msk.f32.vlgmr.msra.gmra.mxu3 %vm66_vm0, %v6725_v20  ;;  %3978 = vmatpush.msra.mxu0 %v5121_v56  ;;  %v5157_v56 = vld [vmem:[%s7112_s7 + $0x478] sm:$0xff] }
0x1e31   :  { %v3747_v35 = vpop.f32.mrf.mxu1  ;;  %3979 = vmatpush.msra.mxu0 %v5120_v58  ;;  %v5156_v58 = vld [vmem:[%s7112_s7 + $0x470] sm:$0xff] }
0x1e32   :  { %3894 = vmatpush.msrb.mxu1 %v3747_v35  ;;  %v5145_v35 = vld [vmem:[%s7112_s7 + $0x438] sm:$0xff] }
0x1e33   :  { %3980 = vmatpush.msra.mxu0 %v5119_v59  ;;  %v5148_v59 = vld [vmem:[%s7112_s7 + $0x440] sm:$0xff] }
0x1e34   :  { %4005 = vmatpush.msra.mxu1 %v5128_v51 }
0x1e36   :  { %4006 = vmatpush.msra.mxu1 %v5127_v52 }
0x1e37   :  { %5118 = vmatmul.msk.f32.gmra.mxu3 %vm66_vm0, %v6736_v12 }
0x1e38   :  { %4007 = vmatpush.msra.mxu1 %v5126_v54  ;;  %v5150_v54 = vld [vmem:[%s7112_s7 + $0x450] sm:$0xff] }
0x1e3a   :  { %4008 = vmatpush.msra.mxu1 %v5125_v57  ;;  %v5149_v57 = vld [vmem:[%s7112_s7 + $0x448] sm:$0xff] }
0x1e97   :  { %v3658_v39 = vpop.f32.mrf.mxu2 }
0x1e98   :  { %v6833_v40 = vadd.f32 %v3658_v39, %v3395_v38  ;;  %v5144_v38 = vld [vmem:[%s7112_s7 + $0x430] sm:$0xff] }
0x1ea5   :  { %v3661_v24 = vpop.f32.mrf.mxu2 }
0x1ea6   :  { %v6836_v41 = vadd.f32 %v3661_v24, %v3398_v18  ;;  %v5143_v18 = vld [vmem:[%s7112_s7 + $0x428] sm:$0xff]  ;;  %v5142_v24 = vld [vmem:[%s7112_s7 + $0x420] sm:$0xff] }
0x1eaa   :  { %v3799_v42 = vpop.f32.mrf.mxu3 }
0x1eab   :  { %v3805_v43 = vsel %vm868_vm6, %v3799_v42, -inf }
0x1eac   :  { %3806 = vmax.xlane.f32.xlu2 %v3805_v43 }
0x1ead   :  { %v3773_v32 = vpop.f32.mrf.mxu2 }
0x1eae   :  { %v3802_v21 = vsel %vm868_vm6, %v3773_v32, -inf }
0x1eaf   :  { %3803 = vmax.xlane.f32.xlu1 %v3802_v21 }
0x1eb2   :  { %v3954_v33 = vpop.f32.mrf.mxu3 }
0x1eba   :  { %v3957_v39 = vpop.f32.mrf.mxu3 }
0x1f1f   :  { %v3807_v44 = vpop.xlane.xlu2 %3806 }
0x1f20   :  { %v3809_v36 = vsub.f32 %v3799_v42, %v3807_v44 }
0x1f22   :  { %v3812_v25 = vmul.f32 1.442695, %v3809_v36  ;;  %v3804_v28 = vpop.xlane.xlu1 %3803 }
0x1f23   :  { %v3808_v45 = vsub.f32 %v3773_v32, %v3804_v28 }
0x1f24   :  { %5323 = vpow2.f32 %v3812_v25 }
0x1f25   :  { %v3810_v46 = vmul.f32 1.442695, %v3808_v45 }
0x1f27   :  { %5325 = vpow2.f32 %v3810_v46 }
0x1f2a   :  { %v5324_v15 = vpop.eup %5323 }
0x1f2b   :  { %v3817_v47 = vsel %vm868_vm6, %v5324_v15, 0.0 }
0x1f2c   :  { %3818 = vadd.xlane.f32.xlu1 %v3817_v47 }
0x1f2d   :  { %v5326_v48 = vpop.eup %5325 }
0x1f2e   :  { %v3814_v49 = vsel %vm868_vm6, %v5326_v48, 0.0 }
0x1f2f   :  { %3815 = vadd.xlane.f32.xlu0 %v3814_v49 }
0x1f9f   :  { %v3819_v60 = vpop.xlane.xlu1 %3818 }
0x1fa0   :  { %5327 = vrcp.f32 %v3819_v60  ;;  %v3846_v0 = vand.u32 2147483648, %v3819_v60  ;;  %v3844_v3 = vand.u32 2147483647, %v3819_v60  ;;  %vm3840_vm7 = vweird.f32 %v3819_v60 }
0x1fa2   :  { %v3816_v61 = vpop.xlane.xlu0 %3815  ;;  %v3847_v50 = vor.u32 1.1754944e-38, %v3846_v0  ;;  %vm3845_vm10 = vcmp.eq.f32.partialorder %v3844_v3, 8.507059e+37 }
0x1fa3   :  { %5329 = vrcp.f32 %v3816_v61  ;;  %v3831_v10 = vand.u32 2147483648, %v3816_v61  ;;  %v3829_v8 = vand.u32 2147483647, %v3816_v61  ;;  %vm3825_vm11 = vweird.f32 %v3816_v61 }
0x1fa5   :  { %v3832_v17 = vor.u32 1.1754944e-38, %v3831_v10  ;;  %vm3830_vm13 = vcmp.eq.f32.partialorder %v3829_v8, 8.507059e+37 }
0x1fa6   :  { %v5328_v62 = vpop.eup %5327 }
0x1fa7   :  { %v3836_v63 = vmul.f32 %v5328_v62, %v3819_v60  ;;  %vm3841_vm5 = vweird.f32 %v5328_v62  ;;  %v5155_v60 = vld [vmem:[%s7112_s7 + $0x468] sm:$0xff] }
0x1fa8   :  { %vm3842_vm8 = vmor %vm3840_vm7, %vm3841_vm5 }
0x1fa9   :  { %v5330_v2 = vpop.eup %5329  ;;  %v3837_v1 = vsub.f32 1.0, %v3836_v63 }
0x1faa   :  { %v3821_v6 = vmul.f32 %v5330_v2, %v3816_v61  ;;  %vm3826_vm9 = vweird.f32 %v5330_v2  ;;  %v5154_v61 = vld [vmem:[%s7112_s7 + $0x460] sm:$0xff] }
0x1fab   :  { %v3838_v5 = vmul.f32 %v5328_v62, %v3837_v1  ;;  %vm3827_vm12 = vmor %vm3825_vm11, %vm3826_vm9 }
0x1fac   :  { %v3822_v9 = vsub.f32 1.0, %v3821_v6 }
0x1fad   :  { %v3839_v4 = vadd.f32 %v5328_v62, %v3838_v5 }
0x1fae   :  { %v3823_v11 = vmul.f32 %v5330_v2, %v3822_v9 }
0x1faf   :  { %v3843_v13 = vsel %vm3842_vm8, %v5328_v62, %v3839_v4 }
0x1fb0   :  { %v3848_v14 = vsel %vm3845_vm10, %v3847_v50, %v3843_v13  ;;  %v3824_v55 = vadd.f32 %v5330_v2, %v3823_v11 }
0x1fb1   :  { %v3849_v16 = vmul.f32 %v5324_v15, %v3848_v14 }
0x1fb2   :  { %v3828_v19 = vsel %vm3827_vm12, %v5330_v2, %v3824_v55 }
0x1fb3   :  { %5107 = vst.msk [vmem:[%s7125_s20 + $0x98] sm:$0xff] %vm868_vm6, %v3849_v16  ;;  %v3833_v22 = vsel %vm3830_vm13, %v3832_v17, %v3828_v19  ;;  %5109 = vmatmul.msk.f32.vlgmr.msrb.gmra.mxu1 %vm868_vm6, %v3849_v16 }
0x1fb4   :  { %v3834_v23 = vmul.f32 %v5326_v48, %v3833_v22 }
0x1fb6   :  { %5106 = vst.msk [vmem:[%s7125_s20 + $0x90] sm:$0xff] %vm868_vm6, %v3834_v23  ;;  %5108 = vmatmul.msk.f32.vlgmr.msrb.gmra.mxu0 %vm868_vm6, %v3834_v23 }
0x1fbb   :  { %5129 = vmatmul.msk.f32.vlgmr.msra.gmra.mxu1 %vm66_vm0, %v6725_v20 }
0x1fbe   :  { %5123 = vmatmul.msk.f32.vlgmr.msra.gmra.mxu0 %vm66_vm0, %v6725_v20 }
0x1fc3   :  { %5130 = vmatmul.msk.f32.gmra.mxu1 %vm66_vm0, %v6736_v12 }
0x1fc6   :  { %5124 = vmatmul.msk.f32.gmra.mxu0 %vm66_vm0, %v6736_v12 }
0x2030   :  { %v3896_v27 = vpop.f32.mrf.mxu1 }
0x2033   :  { %v3873_v29 = vpop.f32.mrf.mxu0 }
0x2034   :  { %5111 = vmatmul.msk.f32.vlgmr.msrb.gmra.mxu2 %vm868_vm6, %v3873_v29  ;;  %v5139_v29 = vld [vmem:[%s7114_s9 + $0x50] sm:$0xff] }
0x2038   :  { %v4010_v30 = vpop.f32.mrf.mxu1 }
0x2039   :  { %4137 = vmatpush.msrb.mxu0 %v4010_v30 }
0x203b   :  { %v3982_v31 = vpop.f32.mrf.mxu0  ;;  %4243 = vmatpush.msra.mxu0 %v5151_v53 }
0x203c   :  { %5112 = vmatmul.msk.f32.gmra.mxu2 %vm868_vm6, %v3896_v27 }
0x203d   :  { %5131 = vmatpush.xpose.msk.msra.mxu2 %vm868_vm6, %v3982_v31  ;;  %4244 = vmatpush.msra.mxu0 %v5150_v54 }
0x203f   :  { %4245 = vmatpush.msra.mxu0 %v5149_v57 }
0x2040   :  { %v4013_v34 = vpop.f32.mrf.mxu1 }
0x2041   :  { %4160 = vmatpush.msrb.mxu1 %v4013_v34  ;;  %4246 = vmatpush.msra.mxu0 %v5148_v59 }
0x2042   :  { %4188 = vmatpush.msrb.mxu2 %v5139_v29 }
0x2043   :  { %v3985_v37 = vpop.f32.mrf.mxu0  ;;  %4271 = vmatpush.msra.mxu1 %v5157_v56 }
0x2044   :  { %5132 = vmatmul.msk.f32.vlgmr.msra.gmra.mxu2 %vm868_vm6, %v3954_v33  ;;  %5133 = vmatpush.xpose.msk.msrb.mxu3 %vm868_vm6, %v3985_v37 }
0x2045   :  { %4272 = vmatpush.msra.mxu1 %v5156_v58 }
0x2047   :  { %5134 = vmatmul.msk.f32.vlgmr.msrb.gmra.mxu3 %vm868_vm6, %v3957_v39  ;;  %4273 = vmatpush.msra.mxu1 %v5155_v60 }
0x2048   :  { %4215 = vmatpush.msra.mxu3 %v5145_v35 }
0x2049   :  { %4274 = vmatpush.msra.mxu1 %v5154_v61 }
0x204a   :  { %4216 = vmatpush.msra.mxu3 %v5144_v38 }
0x204c   :  { %4217 = vmatpush.msra.mxu3 %v5143_v18 }
0x204e   :  { %4218 = vmatpush.msra.mxu3 %v5142_v24 }
0x204f   :  { %5146 = vmatmul.msk.f32.vlgmr.msra.gmra.mxu3 %vm66_vm0, %v6725_v20 }
0x2057   :  { %5147 = vmatmul.msk.f32.gmra.mxu3 %vm66_vm0, %v6736_v12 }
0x20b7   :  { %v3924_v42 = vpop.f32.mrf.mxu2 }
0x20b8   :  { %v6910_v43 = vadd.f32 %v3924_v42, %v6833_v40 }
0x20bf   :  { %v3927_v32 = vpop.f32.mrf.mxu2 }
0x20c0   :  { %v6913_v21 = vadd.f32 %v3927_v32, %v6836_v41 }
0x20c7   :  { %v4039_v44 = vpop.f32.mrf.mxu2 }
0x20c8   :  { %v4068_v36 = vsel %vm868_vm6, %v4039_v44, -inf }
0x20c9   :  { %4069 = vmax.xlane.f32.xlu2 %v4068_v36 }
0x20ca   :  { %v4065_v25 = vpop.f32.mrf.mxu3 }
0x20cb   :  { %v4071_v28 = vsel %vm868_vm6, %v4065_v25, -inf }
0x20cc   :  { %4072 = vmax.xlane.f32.xlu0 %v4071_v28 }
0x20d2   :  { %v4220_v34 = vpop.f32.mrf.mxu3 }
0x20da   :  { %v4223_v38 = vpop.f32.mrf.mxu3 }
0x213c   :  { %v4070_v45 = vpop.xlane.xlu2 %4069 }
0x213d   :  { %v4074_v46 = vsub.f32 %v4039_v44, %v4070_v45 }
0x213f   :  { %v4076_v15 = vmul.f32 1.442695, %v4074_v46  ;;  %v4073_v47 = vpop.xlane.xlu0 %4072 }
0x2140   :  { %v4075_v48 = vsub.f32 %v4065_v25, %v4073_v47 }
0x2141   :  { %5331 = vpow2.f32 %v4076_v15 }
0x2142   :  { %v4078_v40 = vmul.f32 1.442695, %v4075_v48 }
0x2144   :  { %5333 = vpow2.f32 %v4078_v40 }
0x2147   :  { %v5332_v49 = vpop.eup %5331 }
0x2148   :  { %v4080_v41 = vsel %vm868_vm6, %v5332_v49, 0.0 }
0x2149   :  { %4081 = vadd.xlane.f32.xlu1 %v4080_v41 }
0x214a   :  { %v5334_v51 = vpop.eup %5333 }
0x214b   :  { %v4083_v52 = vsel %vm868_vm6, %v5334_v51, 0.0 }
0x214c   :  { %4084 = vadd.xlane.f32.xlu2 %v4083_v52 }
0x21bc   :  { %v4082_v62 = vpop.xlane.xlu1 %4081 }
0x21bd   :  { %5335 = vrcp.f32 %v4082_v62  ;;  %v4097_v5 = vand.u32 2147483648, %v4082_v62  ;;  %v4095_v4 = vand.u32 2147483647, %v4082_v62  ;;  %vm4091_vm15 = vweird.f32 %v4082_v62 }
0x21bf   :  { %v4085_v63 = vpop.xlane.xlu2 %4084  ;;  %v4098_v8 = vor.u32 1.1754944e-38, %v4097_v5  ;;  %vm4096_vm3 = vcmp.eq.f32.partialorder %v4095_v4, 8.507059e+37 }
0x21c0   :  { %5337 = vrcp.f32 %v4085_v63  ;;  %v4112_v11 = vand.u32 2147483648, %v4085_v63  ;;  %v4110_v14 = vand.u32 2147483647, %v4085_v63  ;;  %vm4106_vm4 = vweird.f32 %v4085_v63 }
0x21c2   :  { %v4113_v22 = vor.u32 1.1754944e-38, %v4112_v11  ;;  %vm4111_vm7 = vcmp.eq.f32.partialorder %v4110_v14, 8.507059e+37 }
0x21c3   :  { %v5336_v2 = vpop.eup %5335 }
0x21c4   :  { %v4087_v1 = vmul.f32 %v5336_v2, %v4082_v62  ;;  %vm4092_vm14 = vweird.f32 %v5336_v2 }
0x21c5   :  { %vm4093_vm1 = vmor %vm4091_vm15, %vm4092_vm14 }
0x21c6   :  { %v5338_v0 = vpop.eup %5337  ;;  %v4088_v6 = vsub.f32 1.0, %v4087_v1 }
0x21c7   :  { %v4102_v3 = vmul.f32 %v5338_v0, %v4085_v63  ;;  %vm4107_vm2 = vweird.f32 %v5338_v0 }
0x21c8   :  { %v4089_v9 = vmul.f32 %v5336_v2, %v4088_v6  ;;  %vm4108_vm5 = vmor %vm4106_vm4, %vm4107_vm2 }
0x21c9   :  { %v4103_v10 = vsub.f32 1.0, %v4102_v3 }
0x21ca   :  { %v4090_v50 = vadd.f32 %v5336_v2, %v4089_v9 }
0x21cb   :  { %v4104_v13 = vmul.f32 %v5338_v0, %v4103_v10 }
0x21cc   :  { %v4094_v55 = vsel %vm4093_vm1, %v5336_v2, %v4090_v50 }
0x21cd   :  { %v4099_v16 = vsel %vm4096_vm3, %v4098_v8, %v4094_v55  ;;  %v4105_v17 = vadd.f32 %v5338_v0, %v4104_v13  ;;  %v5168_v13 = vld [vmem:[%s7114_s9 + $0x58] sm:$0xff] }
0x21ce   :  { %v4100_v19 = vmul.f32 %v5332_v49, %v4099_v16 }
0x21cf   :  { %v4109_v23 = vsel %vm4108_vm5, %v5338_v0, %v4105_v17 }
0x21d0   :  { %5135 = vst.msk [vmem:[%s7125_s20 + $0xa0] sm:$0xff] %vm868_vm6, %v4100_v19  ;;  %v4114_v26 = vsel %vm4111_vm7, %v4113_v22, %v4109_v23  ;;  %5137 = vmatmul.msk.f32.vlgmr.msrb.gmra.mxu0 %vm868_vm6, %v4100_v19 }
0x21d1   :  { %v4115_v27 = vmul.f32 %v5334_v51, %v4114_v26 }
0x21d3   :  { %5136 = vst.msk [vmem:[%s7125_s20 + $0xa8] sm:$0xff] %vm868_vm6, %v4115_v27  ;;  %5138 = vmatmul.msk.f32.vlgmr.msrb.gmra.mxu1 %vm868_vm6, %v4115_v27 }
0x21d8   :  { %5152 = vmatmul.msk.f32.vlgmr.msra.gmra.mxu0 %vm66_vm0, %v6725_v20 }
0x21db   :  { %5158 = vmatmul.msk.f32.vlgmr.msra.gmra.mxu1 %vm66_vm0, %v6725_v20 }
0x21e0   :  { %5153 = vmatmul.msk.f32.gmra.mxu0 %vm66_vm0, %v6736_v12 }
0x21e3   :  { %5159 = vmatmul.msk.f32.gmra.mxu1 %vm66_vm0, %v6736_v12 }
0x224d   :  { %v4139_v30 = vpop.f32.mrf.mxu0 }
0x224e   :  { %5140 = vmatmul.msk.f32.vlgmr.msrb.gmra.mxu2 %vm868_vm6, %v4139_v30 }
0x2250   :  { %v4162_v31 = vpop.f32.mrf.mxu1 }
0x2255   :  { %v4248_v33 = vpop.f32.mrf.mxu0 }
0x2256   :  { %5141 = vmatmul.msk.f32.gmra.mxu2 %vm868_vm6, %v4162_v31 }
0x2257   :  { %5160 = vmatpush.xpose.msk.msra.mxu2 %vm868_vm6, %v4248_v33 }
0x2258   :  { %v4276_v35 = vpop.f32.mrf.mxu1 }
0x2259   :  { %4403 = vmatpush.msrb.mxu0 %v4276_v35 }
0x225b   :  { %4454 = vmatpush.msrb.mxu2 %v5168_v13 }
0x225d   :  { %v4251_v37 = vpop.f32.mrf.mxu0 }
0x225e   :  { %5161 = vmatmul.msk.f32.vlgmr.msra.gmra.mxu2 %vm868_vm6, %v4220_v34  ;;  %5162 = vmatpush.xpose.msk.msrb.mxu3 %vm868_vm6, %v4251_v37 }
0x2260   :  { %v4279_v39 = vpop.f32.mrf.mxu1 }
0x2261   :  { %5163 = vmatmul.msk.f32.vlgmr.msrb.gmra.mxu3 %vm868_vm6, %v4223_v38  ;;  %4426 = vmatpush.msrb.mxu1 %v4279_v39 }
0x22d1   :  { %v4190_v18 = vpop.f32.mrf.mxu2 }
0x22d2   :  { %v6971_v24 = vadd.f32 %v4190_v18, %v6910_v43  ;;  %v5176_v18 = vld [vmem:[%s7118_s13 + $0x58] sm:$0xff] }
0x22d3   :  { %4552 = vmatpush.msra.mxu3 %v5176_v18 }
0x22d9   :  { %v4193_v42 = vpop.f32.mrf.mxu2 }
0x22da   :  { %v6974_v32 = vadd.f32 %v4193_v42, %v6913_v21  ;;  %v5174_v42 = vld [vmem:[%s7118_s13 + $0x48] sm:$0xff] }
0x22e1   :  { %v4305_v44 = vpop.f32.mrf.mxu2 }
0x22e2   :  { %v4334_v36 = vsel %vm868_vm6, %v4305_v44, -inf }
0x22e3   :  { %4335 = vmax.xlane.f32.xlu0 %v4334_v36 }
0x22e4   :  { %v4331_v25 = vpop.f32.mrf.mxu3 }
0x22e5   :  { %v4337_v28 = vsel %vm868_vm6, %v4331_v25, -inf }
0x22e6   :  { %4338 = vmax.xlane.f32.xlu1 %v4337_v28  ;;  %v5195_v28 = vld [vmem:[%s7120_s15 + $0x178] sm:$0xff] }
0x22e7   :  { %4587 = vmatpush.msra.mxu0 %v5195_v28 }
0x2356   :  { %v4336_v45 = vpop.xlane.xlu0 %4335 }
0x2357   :  { %v4340_v46 = vsub.f32 %v4305_v44, %v4336_v45  ;;  %v5194_v45 = vld [vmem:[%s7120_s15 + $0x170] sm:$0xff] }
0x2358   :  { %4588 = vmatpush.msra.mxu0 %v5194_v45 }
0x2359   :  { %v4342_v15 = vmul.f32 1.442695, %v4340_v46  ;;  %v4339_v47 = vpop.xlane.xlu1 %4338  ;;  %v5193_v46 = vld [vmem:[%s7120_s15 + $0x168] sm:$0xff] }
0x235a   :  { %v4341_v48 = vsub.f32 %v4331_v25, %v4339_v47  ;;  %4589 = vmatpush.msra.mxu0 %v5193_v46 }
0x235b   :  { %5339 = vpow2.f32 %v4342_v15 }
0x235c   :  { %v4344_v43 = vmul.f32 1.442695, %v4341_v48  ;;  %v5192_v48 = vld [vmem:[%s7120_s15 + $0x160] sm:$0xff] }
0x235d   :  { %4590 = vmatpush.msra.mxu0 %v5192_v48 }
0x235e   :  { %5341 = vpow2.f32 %v4344_v43 }
0x2361   :  { %v5340_v40 = vpop.eup %5339 }
0x2362   :  { %v4346_v21 = vsel %vm868_vm6, %v5340_v40, 0.0 }
0x2363   :  { %4347 = vadd.xlane.f32.xlu2 %v4346_v21  ;;  %v5191_v21 = vld [vmem:[%s7120_s15 + $0x158] sm:$0xff] }
0x2364   :  { %v5342_v49 = vpop.eup %5341  ;;  %4591 = vmatpush.msra.mxu0 %v5191_v21 }
0x2365   :  { %v4349_v41 = vsel %vm868_vm6, %v5342_v49, 0.0 }
0x2366   :  { %4350 = vadd.xlane.f32.xlu0 %v4349_v41  ;;  %v5190_v41 = vld [vmem:[%s7120_s15 + $0x150] sm:$0xff] }
0x2367   :  { %4592 = vmatpush.msra.mxu0 %v5190_v41 }
0x23d6   :  { %v4348_v51 = vpop.xlane.xlu2 %4347 }
0x23d7   :  { %5343 = vrcp.f32 %v4348_v51  ;;  %v4363_v58 = vand.u32 2147483648, %v4348_v51  ;;  %v4361_v61 = vand.u32 2147483647, %v4348_v51  ;;  %vm4357_vm9 = vweird.f32 %v4348_v51 }
0x23d9   :  { %v4351_v52 = vpop.xlane.xlu0 %4350  ;;  %v4364_v1 = vor.u32 1.1754944e-38, %v4363_v58  ;;  %vm4362_vm12 = vcmp.eq.f32.partialorder %v4361_v61, 8.507059e+37  ;;  %v5187_v58 = vld [vmem:[%s7120_s15 + $0x138] sm:$0xff]  ;;  %v5227_v61 = vld [vmem:[%s7116_s11 + $0x2] ss:$0 sm:$0xff] }
0x23da   :  { %5345 = vrcp.f32 %v4351_v52  ;;  %v4378_v2 = vand.u32 2147483648, %v4351_v52  ;;  %v4376_v6 = vand.u32 2147483647, %v4351_v52  ;;  %vm4372_vm13 = vweird.f32 %v4351_v52 }
0x23dc   :  { %v4379_v10 = vor.u32 1.1754944e-38, %v4378_v2  ;;  %vm4377_vm15 = vcmp.eq.f32.partialorder %v4376_v6, 8.507059e+37  ;;  %v5185_v6 = vld [vmem:[%s7120_s15 + $0x128] sm:$0xff] }
0x23dd   :  { %v5344_v53 = vpop.eup %5343 }
0x23de   :  { %v4353_v54 = vmul.f32 %v5344_v53, %v4348_v51  ;;  %vm4358_vm8 = vweird.f32 %v5344_v53 }
0x23df   :  { %vm4359_vm10 = vmor %vm4357_vm9, %vm4358_vm8 }
0x23e0   :  { %v5346_v56 = vpop.eup %5345  ;;  %v4354_v57 = vsub.f32 1.0, %v4353_v54  ;;  %v5188_v54 = vld [vmem:[%s7120_s15 + $0x140] sm:$0xff] }
0x23e1   :  { %v4368_v59 = vmul.f32 %v5346_v56, %v4351_v52  ;;  %vm4373_vm11 = vweird.f32 %v5346_v56  ;;  %v5189_v52 = vld [vmem:[%s7120_s15 + $0x148] sm:$0xff] }
0x23e2   :  { %v4355_v60 = vmul.f32 %v5344_v53, %v4354_v57  ;;  %vm4374_vm14 = vmor %vm4372_vm13, %vm4373_vm11  ;;  %4593 = vmatpush.msra.mxu0 %v5189_v52 }
0x23e3   :  { %v4369_v62 = vsub.f32 1.0, %v4368_v59 }
0x23e4   :  { %v4356_v63 = vadd.f32 %v5344_v53, %v4355_v60  ;;  %4594 = vmatpush.msra.mxu0 %v5188_v54 }
0x23e5   :  { %v4370_v0 = vmul.f32 %v5346_v56, %v4369_v62  ;;  %v5186_v62 = vld [vmem:[%s7120_s15 + $0x130] sm:$0xff] }
0x23e6   :  { %v4360_v5 = vsel %vm4359_vm10, %v5344_v53, %v4356_v63  ;;  %4595 = vmatpush.msra.mxu0 %v5187_v58 }
0x23e7   :  { %v4365_v3 = vsel %vm4362_vm12, %v4364_v1, %v4360_v5  ;;  %v4371_v9 = vadd.f32 %v5346_v56, %v4370_v0  ;;  %v5228_v1 = vld [vmem:[%s7117_s12 + $0x2] ss:$0 sm:$0xff] }
0x23e8   :  { %v4366_v4 = vmul.f32 %v5340_v40, %v4365_v3  ;;  %4596 = vmatpush.msra.mxu0 %v5186_v62  ;;  %v5232_v62 = vld [vmem:[%s7123_s18 + $0x2] ss:$0 sm:$0xff]  ;;  %s5384_s18 = smov 128  }
0x23e9   :  { %v4375_v50 = vsel %vm4374_vm14, %v5346_v56, %v4371_v9  ;;  %v5184_v9 = vld [vmem:[%s7120_s15 + $0x120] sm:$0xff] }
0x23ea   :  { %5164 = vst.msk [vmem:[%s7125_s20 + $0xb0] sm:$0xff] %vm868_vm6, %v4366_v4  ;;  %v4380_v11 = vsel %vm4377_vm15, %v4379_v10, %v4375_v50  ;;  %5166 = vmatmul.msk.f32.vlgmr.msrb.gmra.mxu0 %vm868_vm6, %v4366_v4  ;;  %v5183_v50 = vld [vmem:[%s7120_s15 + $0x118] sm:$0xff] }
0x23eb   :  { %v4381_v8 = vmul.f32 %v5342_v49, %v4380_v11  ;;  %4597 = vmatpush.msra.mxu0 %v5185_v6 }
0x23ed   :  { %5165 = vst.msk [vmem:[%s7125_s20 + $0xb8] sm:$0xff] %vm868_vm6, %v4381_v8  ;;  %5167 = vmatmul.msk.f32.vlgmr.msrb.gmra.mxu1 %vm868_vm6, %v4381_v8  ;;  %4598 = vmatpush.msra.mxu0 %v5184_v9 }
0x23ef   :  { %4599 = vmatpush.msra.mxu0 %v5183_v50 }
0x2467   :  { %v4405_v14 = vpop.f32.mrf.mxu0 }
0x2468   :  { %5169 = vmatmul.msk.f32.vlgmr.msrb.gmra.mxu2 %vm868_vm6, %v4405_v14 }
0x246a   :  { %v4428_v55 = vpop.f32.mrf.mxu1 }
0x2470   :  { %5170 = vmatmul.msk.f32.gmra.mxu2 %vm868_vm6, %v4428_v55 }
0x24eb   :  { %v4456_v16 = vpop.f32.mrf.mxu2 }
0x24ec   :  { %v4462_v17 = vadd.f32 %v4456_v16, %v6971_v24  ;;  %v5175_v24 = vld [vmem:[%s7118_s13 + $0x50] sm:$0xff] }
0x24ed   :  { %4553 = vmatpush.msra.mxu3 %v5175_v24  ;;  %v5182_v16 = vld [vmem:[%s7120_s15 + $0x110] sm:$0xff] }
0x24ee   :  { %v4464_v19 = vadd.f32 %v4462_v17, %v6725_v20  ;;  %4600 = vmatpush.msra.mxu0 %v5182_v16  ;;  %v5181_v17 = vld [vmem:[%s7120_s15 + $0x108] sm:$0xff] }
0x24ef   :  { %4554 = vmatpush.msra.mxu3 %v5174_v42 }
0x24f0   :  { %v4470_v22 = vsel %vm66_vm0, %v4464_v19, 0.0  ;;  %4601 = vmatpush.msra.mxu0 %v5181_v17 }
0x24f1   :  { %4471 = vadd.xlane.f32.xlu1 %v4470_v22  ;;  %v5229_v22 = vld [vmem:[%s7119_s14 + $0x2] ss:$0 sm:$0xff] }
0x24f3   :  { %v4459_v23 = vpop.f32.mrf.mxu2 }
0x24f4   :  { %v4463_v26 = vadd.f32 %v4459_v23, %v6974_v32  ;;  %v5173_v32 = vld [vmem:[%s7118_s13 + $0x40] sm:$0xff] }
0x24f5   :  { %4555 = vmatpush.msra.mxu3 %v5173_v32 }
0x24f6   :  { %v4465_v27 = vadd.f32 %v4463_v26, %v6736_v12 }
0x24f8   :  { %v4473_v29 = vsel %vm66_vm0, %v4465_v27, 0.0 }
0x24f9   :  { %4474 = vadd.xlane.f32.xlu2 %v4473_v29 }
0x2564   :  { %v4472_v30 = vpop.xlane.xlu1 %4471 }
0x2565   :  { %v4476_v31 = vmul.f32 %v4472_v30, %v6111_v7 }
0x2567   :  { %v4478_v33 = vsub.f32 %v4464_v19, %v4476_v31  ;;  %v5180_v19 = vld [vmem:[%s7120_s15 + $0x100] sm:$0xff] }
0x2568   :  { %4602 = vmatpush.msra.mxu0 %v5180_v19 }
0x2569   :  { %v4480_v34 = vmul.f32 %v4478_v33, %v4478_v33 }
0x256b   :  { %v4482_v35 = vsel %vm66_vm0, %v4480_v34, 0.0 }
0x256c   :  { %4483 = vadd.xlane.f32.xlu0 %v4482_v35  ;;  %v4475_v20 = vpop.xlane.xlu2 %4474 }
0x256d   :  { %v4477_v37 = vmul.f32 %v4475_v20, %v6111_v7 }
0x256f   :  { %v7004_v38 = vsub.f32 %v4465_v27, %v4477_v37 }
0x2571   :  { %v4481_v39 = vmul.f32 %v7004_v38, %v7004_v38 }
0x2573   :  { %v4485_v12 = vsel %vm66_vm0, %v4481_v39, 0.0 }
0x2574   :  { %4486 = vadd.xlane.f32.xlu1 %v4485_v12 }
0x25df   :  { %v4484_v44 = vpop.xlane.xlu0 %4483 }
0x25e0   :  { %v4488_v36 = vmul.f32 %v4484_v44, %v6111_v7 }
0x25e2   :  { %v4490_v25 = vadd.f32 1e-05, %v4488_v36 }
0x25e4   :  { %5347 = vrsqrt.f32 %v4490_v25  ;;  %vm4498_vm1 = vweird.f32 %v4490_v25 }
0x25e7   :  { %v4487_v15 = vpop.xlane.xlu1 %4486 }
0x25e8   :  { %v4489_v47 = vmul.f32 %v4487_v15, %v6111_v7 }
0x25ea   :  { %v5348_v43 = vpop.eup %5347  ;;  %v4491_v40 = vadd.f32 1e-05, %v4489_v47 }
0x25eb   :  { %v4493_v49 = vmul.f32 %v5348_v43, %v4490_v25  ;;  %vm4499_vm6 = vweird.f32 %v5348_v43 }
0x25ec   :  { %5349 = vrsqrt.f32 %v4491_v40  ;;  %vm4500_vm2 = vmor %vm4498_vm1, %vm4499_vm6  ;;  %vm4508_vm4 = vweird.f32 %v4491_v40 }
0x25ed   :  { %v4494_v51 = vmul.f32 %v5348_v43, %v4493_v49 }
0x25ef   :  { %v4495_v53 = vmul.f32 0.5, %v4494_v51 }
0x25f1   :  { %v4496_v56 = vsub.f32 1.5, %v4495_v53 }
0x25f2   :  { %v5350_v57 = vpop.eup %5349 }
0x25f3   :  { %v4497_v59 = vmul.f32 %v5348_v43, %v4496_v56  ;;  %v4503_v60 = vmul.f32 %v5350_v57, %v4491_v40  ;;  %vm4509_vm3 = vweird.f32 %v5350_v57 }
0x25f4   :  { %vm4510_vm5 = vmor %vm4508_vm4, %vm4509_vm3 }
0x25f5   :  { %v4501_v63 = vsel %vm4500_vm2, %v5348_v43, %v4497_v59  ;;  %v4504_v2 = vmul.f32 %v5350_v57, %v4503_v60  ;;  %v5231_v59 = vld [vmem:[%s7122_s17 + $0x2] ss:$0 sm:$0xff]  ;;  %s5383_s17 = smov [#allocation4]  }
0x25f6   :  { %v4512_v0 = vmul.f32 %v4501_v63, %v4478_v33  ;;  %v5230_v33 = vld [vmem:[%s7121_s16 + $0x2] ss:$0 sm:$0xff]  ;;  %s4676_s20 = sshll.u32 %s5383_s17, 4  ;;  %s4677_s20 = int_to_ptr.vmem [resolvable:$true] %s4676_s20 }
0x25f7   :  { %v4505_v5 = vmul.f32 0.5, %v4504_v2 }
0x25f8   :  { %v4517_v3 = vmul.f32 %v5227_v61, %v4512_v0 }
0x25f9   :  { %v4506_v4 = vsub.f32 1.5, %v4505_v5 }
0x25fa   :  { %v4522_v10 = vadd.f32 %v5228_v1, %v4517_v3 }
0x25fb   :  { %v4507_v11 = vmul.f32 %v5350_v57, %v4506_v4 }
0x25fc   :  { %5178 = vmatmul.msk.f32.vlgmr.msra.gmra.mxu3 %vm66_vm0, %v4522_v10 }
0x25fd   :  { %v4511_v8 = vsel %vm4510_vm5, %v5350_v57, %v4507_v11 }
0x25fe   :  { %v4513_v13 = vmul.f32 %v4511_v8, %v7004_v38 }
0x2600   :  { %v4518_v14 = vmul.f32 %v5227_v61, %v4513_v13 }
0x2602   :  { %v4523_v55 = vadd.f32 %v5228_v1, %v4518_v14 }
0x2604   :  { %5179 = vmatmul.msk.f32.gmra.mxu3 %vm66_vm0, %v4523_v55 }
0x267f   :  { %v4557_v23 = vpop.f32.mrf.mxu3 }
0x2680   :  { %v4558_v26 = vadd.f32 %v5229_v22, %v4557_v23 }
0x2682   :  { %v4563_v27 = vmax.f32 %v4558_v26, 0.0 }
0x2684   :  { %4603 = vmatmul.f32.vlgmr.msra.gmra.mxu0 %v4563_v27 }
0x2687   :  { %v4560_v29 = vpop.f32.mrf.mxu3 }
0x2688   :  { %v4561_v30 = vadd.f32 %v5229_v22, %v4560_v29 }
0x268a   :  { %v4564_v31 = vmax.f32 %v4561_v30, 0.0 }
0x268c   :  { %4606 = vmatmul.f32.gmra.mxu0 %v4564_v31 }
0x2701   :  { %v4604_v34 = vpop.f32.mrf.mxu0 }
0x2702   :  { %v4605_v35 = vadd.f32 %v5230_v33, %v4604_v34 }
0x2704   :  { %v4610_v20 = vadd.f32 %v4605_v35, %v4522_v10 }
0x2706   :  { %v4616_v37 = vsel %vm66_vm0, %v4610_v20, 0.0 }
0x2707   :  { %4617 = vadd.xlane.f32.xlu2 %v4616_v37 }
0x2709   :  { %v4607_v38 = vpop.f32.mrf.mxu0 }
0x270a   :  { %v4608_v39 = vadd.f32 %v5230_v33, %v4607_v38 }
0x270c   :  { %v4611_v12 = vadd.f32 %v4608_v39, %v4523_v55 }
0x270e   :  { %v4619_v18 = vsel %vm66_vm0, %v4611_v12, 0.0 }
0x270f   :  { %4620 = vadd.xlane.f32.xlu0 %v4619_v18 }
0x277a   :  { %v4618_v24 = vpop.xlane.xlu2 %4617 }
0x277b   :  { %v4622_v42 = vmul.f32 %v4618_v24, %v6111_v7 }
0x277d   :  { %v4624_v32 = vsub.f32 %v4610_v20, %v4622_v42 }
0x277f   :  { %v4626_v44 = vmul.f32 %v4624_v32, %v4624_v32 }
0x2781   :  { %v4628_v36 = vsel %vm66_vm0, %v4626_v44, 0.0 }
0x2782   :  { %v4621_v25 = vpop.xlane.xlu0 %4620  ;;  %4629 = vadd.xlane.f32.xlu1 %v4628_v36 }
0x2783   :  { %v4623_v28 = vmul.f32 %v4621_v25, %v6111_v7 }
0x2785   :  { %v4625_v45 = vsub.f32 %v4611_v12, %v4623_v28 }
0x2787   :  { %v4627_v46 = vmul.f32 %v4625_v45, %v4625_v45 }
0x2789   :  { %v4631_v15 = vsel %vm66_vm0, %v4627_v46, 0.0 }
0x278a   :  { %4632 = vadd.xlane.f32.xlu2 %v4631_v15 }
0x27f5   :  { %v4630_v47 = vpop.xlane.xlu1 %4629 }
0x27f6   :  { %v4634_v48 = vmul.f32 %v4630_v47, %v6111_v7 }
0x27f8   :  { %v4636_v43 = vadd.f32 1e-05, %v4634_v48 }
0x27fa   :  { %5351 = vrsqrt.f32 %v4636_v43  ;;  %vm4644_vm8 = vweird.f32 %v4636_v43 }
0x27fd   :  { %v4633_v40 = vpop.xlane.xlu2 %4632 }
0x27fe   :  { %v4635_v21 = vmul.f32 %v4633_v40, %v6111_v7 }
0x2800   :  { %v5352_v49 = vpop.eup %5351  ;;  %v4637_v41 = vadd.f32 1e-05, %v4635_v21 }
0x2801   :  { %v4639_v51 = vmul.f32 %v5352_v49, %v4636_v43  ;;  %vm4645_vm7 = vweird.f32 %v5352_v49 }
0x2802   :  { %5353 = vrsqrt.f32 %v4637_v41  ;;  %vm4646_vm9 = vmor %vm4644_vm8, %vm4645_vm7  ;;  %vm4654_vm11 = vweird.f32 %v4637_v41 }
0x2803   :  { %v4640_v52 = vmul.f32 %v5352_v49, %v4639_v51 }
0x2805   :  { %v4641_v53 = vmul.f32 0.5, %v4640_v52 }
0x2807   :  { %v4642_v54 = vsub.f32 1.5, %v4641_v53 }
0x2808   :  { %v5354_v56 = vpop.eup %5353 }
0x2809   :  { %v4643_v57 = vmul.f32 %v5352_v49, %v4642_v54  ;;  %v4649_v58 = vmul.f32 %v5354_v56, %v4637_v41  ;;  %vm4655_vm10 = vweird.f32 %v5354_v56 }
0x280a   :  { %vm4656_vm12 = vmor %vm4654_vm11, %vm4655_vm10 }
0x280b   :  { %v4647_v60 = vsel %vm4646_vm9, %v5352_v49, %v4643_v57  ;;  %v4650_v61 = vmul.f32 %v5354_v56, %v4649_v58 }
0x280c   :  { %v4658_v7 = vmul.f32 %v4647_v60, %v4624_v32 }
0x280d   :  { %v4651_v63 = vmul.f32 0.5, %v4650_v61 }
0x280e   :  { %v4663_v2 = vmul.f32 %v5231_v59, %v4658_v7 }
0x280f   :  { %v4652_v1 = vsub.f32 1.5, %v4651_v63 }
0x2810   :  { %v4668_v0 = vadd.f32 %v5232_v62, %v4663_v2 }
0x2811   :  { %v4653_v6 = vmul.f32 %v5354_v56, %v4652_v1 }
0x2812   :  { %4670 = vst.msk [vmem:[#allocation4] sm:$0xff] %vm66_vm0, %v4668_v0 }
0x2813   :  { %v4657_v5 = vsel %vm4656_vm12, %v5354_v56, %v4653_v6 }
0x2814   :  { %v4659_v3 = vmul.f32 %v4657_v5, %v4625_v45 }
0x2816   :  { %v4664_v9 = vmul.f32 %v5231_v59, %v4659_v3 }
0x2818   :  { %v4669_v4 = vadd.f32 %v5232_v62, %v4664_v9 }
0x281a   :  { %4671 = vst.msk [vmem:[#allocation4 + $0x8] sm:$0xff] %vm66_vm0, %v4669_v4 }
0x281b   :  { %4684 = dma.vmem_to_hbm [thread:$0]  %s4677_s20, 256, %s4679_s23, [#allocation5], %s5384_s18, %s5384_s18, %s5385_s28  }
0x281c   :  { %5379 = dma.done.wait [#allocation5], 256  }
0x281d   :  { %5380 = vsyncadd [#allocation5], 4294967040 }
0x281e   :  { %4693 = vsyncpa [#allocation5], 1 }

</bundles_post_ra>
